<compile_context>
chip_gen: v7x
topology: tpu7x:2x2x1
jax: 0.10.0
libtpu: 0.0.40
codegen_flags: <defaults>
</compile_context>

<pallas_src>
import functools

import jax
import jax.numpy as jnp
from jax import lax
from jax.experimental import pallas as pl
from jax.experimental.pallas import tpu as pltpu

LANE = 128            # TPU lane width: every feature dim is padded to this
TM = 128              # node-row tile (safe on v5e/v6e/v7x; bump to 256 on v6e)
H1, H2, H3 = 300, 100, 1
H1P, H2P, H3P = 384, 128, 128   # lane-dense padded widths

_VMEM = pl.BlockSpec(memory_space=pltpu.MemorySpace.VMEM)
_PARAMS_1D = pltpu.CompilerParams(
    dimension_semantics=("parallel",),
    vmem_limit_bytes=32 * 1024 * 1024)
_PARAMS_2D = pltpu.CompilerParams(
    dimension_semantics=("parallel", "arbitrary"),
    vmem_limit_bytes=32 * 1024 * 1024)


def _round_up(v, m):
    return (v + m - 1) // m * m


def _pick_tk(n_pad):
    """Source-node (contraction) tile for the aggregation pass."""
    for tk in (512, 256, 128):
        if n_pad % tk == 0:
            return tk
    return TM


# ---------------------------------------------------------------------------
# Kernels
# ---------------------------------------------------------------------------
def _xw_kernel(x_ref, w_ref, out_ref):
    """Row-tiled dense matmul: out = X[tile] @ W (bf16 in, f32 acc, bf16 out)."""
    out_ref[...] = jnp.dot(x_ref[...], w_ref[...],
                           preferred_element_type=jnp.float32).astype(out_ref.dtype)


def _gcn_agg_kernel(adj_ref, xw_ref, b_ref, out_ref, acc_ref, *, apply_relu):
    """K-tiled aggregation: out[tile] = A_hat[tile, :] @ XW + b (+ReLU).

    Grid = (row tile i, source tile k); f32 accumulator persists across k."""
    k = pl.program_id(1)

    @pl.when(k == 0)
    def _():
        acc_ref[...] = jnp.zeros_like(acc_ref)

    acc_ref[...] += jnp.dot(adj_ref[...], xw_ref[...],
                            preferred_element_type=jnp.float32)

    @pl.when(k == pl.num_programs(1) - 1)
    def _():
        out = acc_ref[...] + b_ref[...]
        if apply_relu:
            out = jnp.maximum(out, 0.0)
        out_ref[...] = out.astype(out_ref.dtype)


def _lin_fused_kernel(x0_ref, x1_ref, w_ref, b_ref, xc_ref, z_ref, *, h):
    """Fused lin1 + lin2 (concatenated weight) with residual add:
         y  = relu(x0 @ [W1 | W2] + [b1 | b2])
         xc = x1 + y[:, :h] ; z = x1 + y[:, h:]"""
    y = jnp.dot(x0_ref[...], w_ref[...],
                preferred_element_type=jnp.float32) + b_ref[...]
    y = jnp.maximum(y, 0.0)
    x1 = x1_ref[...].astype(jnp.float32)
    xc_ref[...] = (x1 + y[:, :h]).astype(xc_ref.dtype)
    z_ref[...] = (x1 + y[:, h:]).astype(z_ref.dtype)


def _link_loss_kernel(zps_ref, zpd_ref, zns_ref, znd_ref, out_ref):
    """r_loss = mean(-log(sigmoid(<zs,zd>)+1e-15)) over positive edges
             + mean(-log(1-sigmoid(<zs,zd>)+1e-15)) over negative edges.

    Exact sigmoid (no approx reciprocal): saturates to exactly 0/1 in f32, so
    the log arguments are always >= 1e-15 and the result is always finite."""
    d_pos = jnp.sum(zps_ref[...] * zpd_ref[...], axis=1, keepdims=True)
    d_neg = jnp.sum(zns_ref[...] * znd_ref[...], axis=1, keepdims=True)
    sig_pos = 1.0 / (1.0 + jnp.exp(-d_pos))
    sig_neg = 1.0 / (1.0 + jnp.exp(-d_neg))
    pos_loss = -jnp.log(sig_pos + 1e-15)
    neg_loss = -jnp.log(1.0 - sig_neg + 1e-15)
    out_ref[...] = (jnp.mean(pos_loss, keepdims=True)
                    + jnp.mean(neg_loss, keepdims=True))


# ---------------------------------------------------------------------------
# pallas_call wrappers
# ---------------------------------------------------------------------------
def dense_xw(x, w):
    """XW for all nodes, row-tiled (computed exactly once per layer)."""
    n_pad, f_in = x.shape
    f_out = w.shape[1]
    return pl.pallas_call(
        _xw_kernel,
        out_shape=jax.ShapeDtypeStruct((n_pad, f_out), jnp.bfloat16),
        grid_spec=pltpu.PrefetchScalarGridSpec(
            num_scalar_prefetch=0,
            grid=(n_pad // TM,),
            in_specs=[pl.BlockSpec((TM, f_in), lambda i: (i, 0)),
                      pl.BlockSpec((f_in, f_out), lambda i: (0, 0))],
            out_specs=pl.BlockSpec((TM, f_out), lambda i: (i, 0))),
        compiler_params=_PARAMS_1D,
    )(x, w)


def gcn_agg(adj, xw, b, *, apply_relu, out_dtype):
    """A_hat @ XW + b (optional ReLU), K-tiled with an f32 accumulator."""
    n_pad = adj.shape[0]
    f_out = xw.shape[1]
    tk = _pick_tk(n_pad)
    kernel = functools.partial(_gcn_agg_kernel, apply_relu=apply_relu)
    return pl.pallas_call(
        kernel,
        out_shape=jax.ShapeDtypeStruct((n_pad, f_out), out_dtype),
        grid_spec=pltpu.PrefetchScalarGridSpec(
            num_scalar_prefetch=0,
            grid=(n_pad // TM, n_pad // tk),
            in_specs=[pl.BlockSpec((TM, tk), lambda i, k: (i, k)),     # A_hat tile
                      pl.BlockSpec((tk, f_out), lambda i, k: (k, 0)),  # XW K-tile
                      pl.BlockSpec((1, f_out), lambda i, k: (0, 0))],  # bias
            out_specs=pl.BlockSpec((TM, f_out), lambda i, k: (i, 0)),
            scratch_shapes=[pltpu.VMEM((TM, f_out), jnp.float32)]),
        compiler_params=_PARAMS_2D,
    )(adj, xw, b)


def gcn_layer(adj_bf16, x_bf16, w_bf16, b, *, apply_relu,
              out_dtype=jnp.bfloat16):
    """One GCNConv layer: A_hat @ (X @ W) + b, optional ReLU."""
    xw = dense_xw(x_bf16, w_bf16)
    return gcn_agg(adj_bf16, xw, b, apply_relu=apply_relu, out_dtype=out_dtype)


def lin_fused(x0, x1, w, b):
    n_pad, f_in = x0.shape
    h = x1.shape[1]
    kernel = functools.partial(_lin_fused_kernel, h=h)
    return pl.pallas_call(
        kernel,
        out_shape=(jax.ShapeDtypeStruct((n_pad, h), jnp.bfloat16),  # xc -> conv3
                   jax.ShapeDtypeStruct((n_pad, h), jnp.float32)),  # z  -> loss
        grid_spec=pltpu.PrefetchScalarGridSpec(
            num_scalar_prefetch=0,
            grid=(n_pad // TM,),
            in_specs=[pl.BlockSpec((TM, f_in), lambda i: (i, 0)),
                      pl.BlockSpec((TM, h), lambda i: (i, 0)),
                      pl.BlockSpec((f_in, 2 * h), lambda i: (0, 0)),
                      pl.BlockSpec((1, 2 * h), lambda i: (0, 0))],
            out_specs=(pl.BlockSpec((TM, h), lambda i: (i, 0)),
                       pl.BlockSpec((TM, h), lambda i: (i, 0)))),
        compiler_params=_PARAMS_1D,
    )(x0, x1, w, b)


def link_losses(zps, zpd, zns, znd):
    return pl.pallas_call(
        _link_loss_kernel,
        out_shape=jax.ShapeDtypeStruct((1, 1), jnp.float32),
        in_specs=[_VMEM] * 4,
        out_specs=_VMEM,
    )(zps, zpd, zns, znd)


# ---------------------------------------------------------------------------
# Parameters (deterministic glorot init, zero-padded to lane-dense shapes)
# ---------------------------------------------------------------------------
def init_params(key, input_size):
    f_in_p = _round_up(max(input_size, LANE), LANE)

    def glorot(k, fin, fout):
        scale = jnp.sqrt(2.0 / (fin + fout))
        return scale * jax.random.normal(k, (fin, fout), jnp.float32)

    def pad_w(w, fin_p, fout_p):
        return jnp.zeros((fin_p, fout_p), jnp.float32).at[:w.shape[0],
                                                          :w.shape[1]].set(w)

    def gcn_stack(k, dims_real, dims_pad):
        ks = jax.random.split(k, len(dims_real) - 1)
        layers = []
        for li in range(len(dims_real) - 1):
            w = glorot(ks[li], dims_real[li], dims_real[li + 1])
            layers.append((pad_w(w, dims_pad[li], dims_pad[li + 1]),
                           jnp.zeros((1, dims_pad[li + 1]), jnp.float32)))
        return layers

    k1, k2, k3, k4, k5 = jax.random.split(key, 5)
    params = {
        'conv1': gcn_stack(k1, (input_size, H1, H1, H1, H1),
                           (f_in_p, H1P, H1P, H1P, H1P)),
        'conv2': gcn_stack(k2, (H1, H2, H2, H2, H2),
                           (H1P, H2P, H2P, H2P, H2P)),
        'conv3': gcn_stack(k3, (H2, H3), (H2P, H3P)),
        'c1': jnp.array(0.5, jnp.float32),
        'c2': jnp.array(0.5, jnp.float32),
    }
    w1 = pad_w(glorot(k4, input_size, H2), f_in_p, H2P)
    w2 = pad_w(glorot(k5, input_size, H2), f_in_p, H2P)
    params['lin12'] = (jnp.concatenate([w1, w2], axis=1),
                       jnp.zeros((1, 2 * H2P), jnp.float32))
    return params


# ---------------------------------------------------------------------------
# Forward (plain-JAX glue: adjacency normalization, padding, edge gathers)
# ---------------------------------------------------------------------------
def build_norm_adj(edge_index, n, n_pad):
    """Dense A_hat = D^-1/2 (A + I) D^-1/2; row = target node, col = source."""
    src, dst = edge_index[0], edge_index[1]
    a = jnp.zeros((n_pad, n_pad), jnp.float32)
    a = a.at[dst, src].set(1.0)
    idx = jnp.arange(n)
    a = a.at[idx, idx].set(1.0)                   # GCNConv adds self-loops
    deg = jnp.sum(a, axis=1)                      # degree incl. self-loop
    d_inv_sqrt = jnp.where(deg > 0, lax.rsqrt(jnp.maximum(deg, 1e-12)), 0.0)
    return a * d_inv_sqrt[:, None] * d_inv_sqrt[None, :]


def gcn_bayes_forward(x, edge_index, neg_edge_index, params):
    n, f_in = x.shape
    f_in_p = params['lin12'][0].shape[0]
    n_pad = _round_up(max(n, TM), TM)

    # zero-padded node features: padded rows / columns are exactly 0 and never
    # contaminate real rows (padded adjacency columns are zero); real rows are
    # sliced out at the end.
    x0 = jnp.zeros((n_pad, f_in_p), jnp.float32).at[:n, :f_in].set(x)

    # One-time bf16 casts in the wrapper (no per-grid-step casts in kernels).
    adj = build_norm_adj(edge_index, n, n_pad).astype(jnp.bfloat16)
    x0_bf = x0.astype(jnp.bfloat16)

    # eval mode: dropout_adj / F.dropout are identity
    h = x0_bf
    for w, b in params['conv1']:
        h = gcn_layer(adj, h, w.astype(jnp.bfloat16), b, apply_relu=True)
    for w, b in params['conv2']:
        h = gcn_layer(adj, h, w.astype(jnp.bfloat16), b, apply_relu=True)
    x1 = h                                                     # (n_pad, H2P) bf16

    wl, bl = params['lin12']
    xc, z = lin_fused(x0_bf, x1, wl.astype(jnp.bfloat16), bl)  # x1 + relu(lin*(x0))

    r_loss = link_losses(z[edge_index[0]], z[edge_index[1]],
                         z[neg_edge_index[0]], z[neg_edge_index[1]])[0, 0]

    (w3, b3), = params['conv3']
    out = gcn_layer(adj, xc, w3.astype(jnp.bfloat16), b3,
                    apply_relu=False, out_dtype=jnp.float32)[:n, :H3]  # (n, 1)
    return out, r_loss, params['c1'], params['c2']


# ---------------------------------------------------------------------------
if __name__ == "__main__":
    N, INPUT_SIZE, E_NEG = 16, 8, 64
    key = jax.random.PRNGKey(0)
    kx, kp, kn = jax.random.split(key, 3)

    x = jax.random.normal(kx, (N, INPUT_SIZE), jnp.float32)

    # deterministic undirected ring graph: edge_index (2, 2N)
    s = jnp.arange(N, dtype=jnp.int32)
    d = (s + 1) % N
    edge_index = jnp.stack([jnp.concatenate([s, d]), jnp.concatenate([d, s])])

    # TODO(synk): PyG negative_sampling (rejection sampling against existing
    # edges) is replaced by deterministic uniform random node pairs.
    neg_edge_index = jax.random.randint(kn, (2, E_NEG), 0, N, jnp.int32)

    params = init_params(kp, INPUT_SIZE)
    fwd = jax.jit(gcn_bayes_forward)
    out, r_loss, c1, c2 = fwd(x, edge_index, neg_edge_index, params)
    jax.block_until_ready((out, r_loss, c1, c2))

    assert out.shape == (N, 1) and bool(jnp.isfinite(r_loss))
    print("KERNEL_OK")
</pallas_src>

<mosaic_0001>
module attributes {stable_mosaic.version = 11 : i64} {
  func.func @_xw_kernel(%arg0: i32, %arg1: memref<128x128xbf16, #tpu.memory_space<vmem>>, %arg2: memref<128x384xbf16, #tpu.memory_space<vmem>>, %arg3: memref<128x384xbf16, #tpu.memory_space<vmem>>) attributes {dimension_semantics = [#tpu.dimension_semantics<parallel>], iteration_bounds = array<i64: 1>, scalar_prefetch = 0 : i64, scratch_operands = 0 : i64, tpu.core_type = #tpu.core_type<tc>, window_params = [{transform_indices = @transform_0, window_bounds = array<i64: 128, 128>}, {pipeline_mode = #tpu.pipeline_mode<synchronous>, transform_indices = @transform_1, window_bounds = array<i64: 128, 384>}, {transform_indices = @transform_2, window_bounds = array<i64: 128, 384>}]} {
    %c0 = arith.constant 0 : index
    %c0_0 = arith.constant 0 : index
    %0 = vector.load %arg1[%c0, %c0_0] : memref<128x128xbf16, #tpu.memory_space<vmem>>, vector<128x128xbf16>
    %c0_1 = arith.constant 0 : index
    %c0_2 = arith.constant 0 : index
    %1 = vector.load %arg2[%c0_1, %c0_2] : memref<128x384xbf16, #tpu.memory_space<vmem>>, vector<128x384xbf16>
    %cst = arith.constant dense<0.000000e+00> : vector<128x384xf32>
    %2 = tpu.matmul %0, %1, %cst {dimension_numbers = #tpu.dot_dimension_numbers<[1], [0], [0], [1], [0, 0, 1, 1], [], []>} : vector<128x128xbf16>, vector<128x384xbf16>, vector<128x384xf32> -> vector<128x384xf32>
    %3 = arith.truncf %2 : vector<128x384xf32> to vector<128x384xbf16>
    %c0_3 = arith.constant 0 : index
    %c0_4 = arith.constant 0 : index
    %4 = vector.load %arg3[%c0_3, %c0_4] : memref<128x384xbf16, #tpu.memory_space<vmem>>, vector<128x384xbf16>
    tpu.vector_store %arg3[%c0_3, %c0_4], %3 {strides = array<i32>} : memref<128x384xbf16, #tpu.memory_space<vmem>>, vector<128x384xbf16>,
    return
  }
  func.func @transform_0(%arg0: i32) -> (i32, i32) {
    %c0_i32 = arith.constant 0 : i32
    %c0_i32_0 = arith.constant 0 : i32
    return %arg0, %c0_i32 : i32, i32
  }
  func.func @transform_1(%arg0: i32) -> (i32, i32) {
    %c0_i32 = arith.constant 0 : i32
    %c0_i32_0 = arith.constant 0 : i32
    %c0_i32_1 = arith.constant 0 : i32
    return %c0_i32, %c0_i32_0 : i32, i32
  }
  func.func @transform_2(%arg0: i32) -> (i32, i32) {
    %c0_i32 = arith.constant 0 : i32
    %c0_i32_0 = arith.constant 0 : i32
    return %arg0, %c0_i32 : i32, i32
  }
}

module attributes {stable_mosaic.version = 11 : i64} {
  func.func @_gcn_agg_kernel(%arg0: i32, %arg1: i32, %arg2: memref<128x128xbf16, #tpu.memory_space<vmem>>, %arg3: memref<128x384xbf16, #tpu.memory_space<vmem>>, %arg4: memref<1x384xf32, #tpu.memory_space<vmem>>, %arg5: memref<128x384xbf16, #tpu.memory_space<vmem>>, %arg6: memref<128x384xf32, #tpu.memory_space<vmem>>) attributes {dimension_semantics = [#tpu.dimension_semantics<parallel>, #tpu.dimension_semantics<arbitrary>], iteration_bounds = array<i64: 1, 1>, scalar_prefetch = 0 : i64, scratch_operands = 1 : i64, tpu.core_type = #tpu.core_type<tc>, window_params = [{transform_indices = @transform_0, window_bounds = array<i64: 128, 128>}, {transform_indices = @transform_1, window_bounds = array<i64: 128, 384>}, {pipeline_mode = #tpu.pipeline_mode<synchronous>, transform_indices = @transform_2, window_bounds = array<i64: 1, 384>}, {transform_indices = @transform_3, window_bounds = array<i64: 128, 384>}]} {
    %c0_i32 = arith.constant 0 : i32
    %0 = arith.cmpi eq, %arg1, %c0_i32 : i32
    %1 = arith.extui %0 : i1 to i32
    %c0_i32_0 = arith.constant 0 : i32
    %2 = arith.cmpi ne, %1, %c0_i32_0 : i32
    scf.if %2 {
      %cst_10 = arith.constant 0.000000e+00 : f32
      %12 = vector.broadcast %cst_10 : f32 to vector<128x384xf32>
      %c0_11 = arith.constant 0 : index
      %c0_12 = arith.constant 0 : index
      %13 = vector.load %arg6[%c0_11, %c0_12] : memref<128x384xf32, #tpu.memory_space<vmem>>, vector<128x384xf32>
      tpu.vector_store %arg6[%c0_11, %c0_12], %12 {strides = array<i32>} : memref<128x384xf32, #tpu.memory_space<vmem>>, vector<128x384xf32>,
    } else {
    }
    %c0 = arith.constant 0 : index
    %c0_1 = arith.constant 0 : index
    %3 = vector.load %arg6[%c0, %c0_1] : memref<128x384xf32, #tpu.memory_space<vmem>>, vector<128x384xf32>
    %c0_2 = arith.constant 0 : index
    %c0_3 = arith.constant 0 : index
    %4 = vector.load %arg2[%c0_2, %c0_3] : memref<128x128xbf16, #tpu.memory_space<vmem>>, vector<128x128xbf16>
    %c0_4 = arith.constant 0 : index
    %c0_5 = arith.constant 0 : index
    %5 = vector.load %arg3[%c0_4, %c0_5] : memref<128x384xbf16, #tpu.memory_space<vmem>>, vector<128x384xbf16>
    %cst = arith.constant dense<0.000000e+00> : vector<128x384xf32>
    %6 = tpu.matmul %4, %5, %cst {dimension_numbers = #tpu.dot_dimension_numbers<[1], [0], [0], [1], [0, 0, 1, 1], [], []>} : vector<128x128xbf16>, vector<128x384xbf16>, vector<128x384xf32> -> vector<128x384xf32>
    %7 = arith.addf %3, %6 : vector<128x384xf32>
    %c0_6 = arith.constant 0 : index
    %c0_7 = arith.constant 0 : index
    %8 = vector.load %arg6[%c0_6, %c0_7] : memref<128x384xf32, #tpu.memory_space<vmem>>, vector<128x384xf32>
    tpu.vector_store %arg6[%c0_6, %c0_7], %7 {strides = array<i32>} : memref<128x384xf32, #tpu.memory_space<vmem>>, vector<128x384xf32>,
    %c0_i32_8 = arith.constant 0 : i32
    %9 = arith.cmpi eq, %arg1, %c0_i32_8 : i32
    %10 = arith.extui %9 : i1 to i32
    %c0_i32_9 = arith.constant 0 : i32
    %11 = arith.cmpi ne, %10, %c0_i32_9 : i32
    scf.if %11 {
      %c0_10 = arith.constant 0 : index
      %c0_11 = arith.constant 0 : index
      %12 = vector.load %arg6[%c0_10, %c0_11] : memref<128x384xf32, #tpu.memory_space<vmem>>, vector<128x384xf32>
      %c0_12 = arith.constant 0 : index
      %c0_13 = arith.constant 0 : index
      %13 = vector.load %arg4[%c0_12, %c0_13] : memref<1x384xf32, #tpu.memory_space<vmem>>, vector<1x384xf32>
      %14 = vector.broadcast %13 : vector<1x384xf32> to vector<128x384xf32>
      %15 = arith.addf %12, %14 : vector<128x384xf32>
      %cst_14 = arith.constant 0.000000e+00 : f32
      %16 = vector.broadcast %cst_14 : f32 to vector<128x384xf32>
      %17 = arith.maximumf %15, %16 : vector<128x384xf32>
      %18 = arith.truncf %17 : vector<128x384xf32> to vector<128x384xbf16>
      %c0_15 = arith.constant 0 : index
      %c0_16 = arith.constant 0 : index
      %19 = vector.load %arg5[%c0_15, %c0_16] : memref<128x384xbf16, #tpu.memory_space<vmem>>, vector<128x384xbf16>
      tpu.vector_store %arg5[%c0_15, %c0_16], %18 {strides = array<i32>} : memref<128x384xbf16, #tpu.memory_space<vmem>>, vector<128x384xbf16>,
    } else {
    }
    return
  }
  func.func @transform_0(%arg0: i32, %arg1: i32) -> (i32, i32) {
    %c0_i32 = arith.constant 0 : i32
    return %arg0, %arg1 : i32, i32
  }
  func.func @transform_1(%arg0: i32, %arg1: i32) -> (i32, i32) {
    %c0_i32 = arith.constant 0 : i32
    %c0_i32_0 = arith.constant 0 : i32
    return %arg1, %c0_i32 : i32, i32
  }
  func.func @transform_2(%arg0: i32, %arg1: i32) -> (i32, i32) {
    %c0_i32 = arith.constant 0 : i32
    %c0_i32_0 = arith.constant 0 : i32
    %c0_i32_1 = arith.constant 0 : i32
    return %c0_i32, %c0_i32_0 : i32, i32
  }
  func.func @transform_3(%arg0: i32, %arg1: i32) -> (i32, i32) {
    %c0_i32 = arith.constant 0 : i32
    %c0_i32_0 = arith.constant 0 : i32
    return %arg0, %c0_i32 : i32, i32
  }
}

module attributes {stable_mosaic.version = 11 : i64} {
  func.func @_gcn_agg_kernel(%arg0: i32, %arg1: i32, %arg2: memref<128x128xbf16, #tpu.memory_space<vmem>>, %arg3: memref<128x128xbf16, #tpu.memory_space<vmem>>, %arg4: memref<1x128xf32, #tpu.memory_space<vmem>>, %arg5: memref<128x128xbf16, #tpu.memory_space<vmem>>, %arg6: memref<128x128xf32, #tpu.memory_space<vmem>>) attributes {dimension_semantics = [#tpu.dimension_semantics<parallel>, #tpu.dimension_semantics<arbitrary>], iteration_bounds = array<i64: 1, 1>, scalar_prefetch = 0 : i64, scratch_operands = 1 : i64, tpu.core_type = #tpu.core_type<tc>, window_params = [{transform_indices = @transform_0, window_bounds = array<i64: 128, 128>}, {transform_indices = @transform_1, window_bounds = array<i64: 128, 128>}, {pipeline_mode = #tpu.pipeline_mode<synchronous>, transform_indices = @transform_2, window_bounds = array<i64: 1, 128>}, {transform_indices = @transform_3, window_bounds = array<i64: 128, 128>}]} {
    %c0_i32 = arith.constant 0 : i32
    %0 = arith.cmpi eq, %arg1, %c0_i32 : i32
    %1 = arith.extui %0 : i1 to i32
    %c0_i32_0 = arith.constant 0 : i32
    %2 = arith.cmpi ne, %1, %c0_i32_0 : i32
    scf.if %2 {
      %cst_10 = arith.constant 0.000000e+00 : f32
      %12 = vector.broadcast %cst_10 : f32 to vector<128x128xf32>
      %c0_11 = arith.constant 0 : index
      %c0_12 = arith.constant 0 : index
      %13 = vector.load %arg6[%c0_11, %c0_12] : memref<128x128xf32, #tpu.memory_space<vmem>>, vector<128x128xf32>
      tpu.vector_store %arg6[%c0_11, %c0_12], %12 {strides = array<i32>} : memref<128x128xf32, #tpu.memory_space<vmem>>, vector<128x128xf32>,
    } else {
    }
    %c0 = arith.constant 0 : index
    %c0_1 = arith.constant 0 : index
    %3 = vector.load %arg6[%c0, %c0_1] : memref<128x128xf32, #tpu.memory_space<vmem>>, vector<128x128xf32>
    %c0_2 = arith.constant 0 : index
    %c0_3 = arith.constant 0 : index
    %4 = vector.load %arg2[%c0_2, %c0_3] : memref<128x128xbf16, #tpu.memory_space<vmem>>, vector<128x128xbf16>
    %c0_4 = arith.constant 0 : index
    %c0_5 = arith.constant 0 : index
    %5 = vector.load %arg3[%c0_4, %c0_5] : memref<128x128xbf16, #tpu.memory_space<vmem>>, vector<128x128xbf16>
    %cst = arith.constant dense<0.000000e+00> : vector<128x128xf32>
    %6 = tpu.matmul %4, %5, %cst {dimension_numbers = #tpu.dot_dimension_numbers<[1], [0], [0], [1], [0, 0, 1, 1], [], []>} : vector<128x128xbf16>, vector<128x128xbf16>, vector<128x128xf32> -> vector<128x128xf32>
    %7 = arith.addf %3, %6 : vector<128x128xf32>
    %c0_6 = arith.constant 0 : index
    %c0_7 = arith.constant 0 : index
    %8 = vector.load %arg6[%c0_6, %c0_7] : memref<128x128xf32, #tpu.memory_space<vmem>>, vector<128x128xf32>
    tpu.vector_store %arg6[%c0_6, %c0_7], %7 {strides = array<i32>} : memref<128x128xf32, #tpu.memory_space<vmem>>, vector<128x128xf32>,
    %c0_i32_8 = arith.constant 0 : i32
    %9 = arith.cmpi eq, %arg1, %c0_i32_8 : i32
    %10 = arith.extui %9 : i1 to i32
    %c0_i32_9 = arith.constant 0 : i32
    %11 = arith.cmpi ne, %10, %c0_i32_9 : i32
    scf.if %11 {
      %c0_10 = arith.constant 0 : index
      %c0_11 = arith.constant 0 : index
      %12 = vector.load %arg6[%c0_10, %c0_11] : memref<128x128xf32, #tpu.memory_space<vmem>>, vector<128x128xf32>
      %c0_12 = arith.constant 0 : index
      %c0_13 = arith.constant 0 : index
      %13 = vector.load %arg4[%c0_12, %c0_13] : memref<1x128xf32, #tpu.memory_space<vmem>>, vector<1x128xf32>
      %14 = vector.broadcast %13 : vector<1x128xf32> to vector<128x128xf32>
      %15 = arith.addf %12, %14 : vector<128x128xf32>
      %cst_14 = arith.constant 0.000000e+00 : f32
      %16 = vector.broadcast %cst_14 : f32 to vector<128x128xf32>
      %17 = arith.maximumf %15, %16 : vector<128x128xf32>
      %18 = arith.truncf %17 : vector<128x128xf32> to vector<128x128xbf16>
      %c0_15 = arith.constant 0 : index
      %c0_16 = arith.constant 0 : index
      %19 = vector.load %arg5[%c0_15, %c0_16] : memref<128x128xbf16, #tpu.memory_space<vmem>>, vector<128x128xbf16>
      tpu.vector_store %arg5[%c0_15, %c0_16], %18 {strides = array<i32>} : memref<128x128xbf16, #tpu.memory_space<vmem>>, vector<128x128xbf16>,
    } else {
    }
    return
  }
  func.func @transform_0(%arg0: i32, %arg1: i32) -> (i32, i32) {
    %c0_i32 = arith.constant 0 : i32
    return %arg0, %arg1 : i32, i32
  }
  func.func @transform_1(%arg0: i32, %arg1: i32) -> (i32, i32) {
    %c0_i32 = arith.constant 0 : i32
    %c0_i32_0 = arith.constant 0 : i32
    return %arg1, %c0_i32 : i32, i32
  }
  func.func @transform_2(%arg0: i32, %arg1: i32) -> (i32, i32) {
    %c0_i32 = arith.constant 0 : i32
    %c0_i32_0 = arith.constant 0 : i32
    %c0_i32_1 = arith.constant 0 : i32
    return %c0_i32, %c0_i32_0 : i32, i32
  }
  func.func @transform_3(%arg0: i32, %arg1: i32) -> (i32, i32) {
    %c0_i32 = arith.constant 0 : i32
    %c0_i32_0 = arith.constant 0 : i32
    return %arg0, %c0_i32 : i32, i32
  }
}

module attributes {stable_mosaic.version = 11 : i64} {
  func.func @_xw_kernel(%arg0: i32, %arg1: memref<128x384xbf16, #tpu.memory_space<vmem>>, %arg2: memref<384x384xbf16, #tpu.memory_space<vmem>>, %arg3: memref<128x384xbf16, #tpu.memory_space<vmem>>) attributes {dimension_semantics = [#tpu.dimension_semantics<parallel>], iteration_bounds = array<i64: 1>, scalar_prefetch = 0 : i64, scratch_operands = 0 : i64, tpu.core_type = #tpu.core_type<tc>, window_params = [{transform_indices = @transform_0, window_bounds = array<i64: 128, 384>}, {pipeline_mode = #tpu.pipeline_mode<synchronous>, transform_indices = @transform_1, window_bounds = array<i64: 384, 384>}, {transform_indices = @transform_2, window_bounds = array<i64: 128, 384>}]} {
    %c0 = arith.constant 0 : index
    %c0_0 = arith.constant 0 : index
    %0 = vector.load %arg1[%c0, %c0_0] : memref<128x384xbf16, #tpu.memory_space<vmem>>, vector<128x384xbf16>
    %c0_1 = arith.constant 0 : index
    %c0_2 = arith.constant 0 : index
    %1 = vector.load %arg2[%c0_1, %c0_2] : memref<384x384xbf16, #tpu.memory_space<vmem>>, vector<384x384xbf16>
    %cst = arith.constant dense<0.000000e+00> : vector<128x384xf32>
    %2 = tpu.matmul %0, %1, %cst {dimension_numbers = #tpu.dot_dimension_numbers<[1], [0], [0], [1], [0, 0, 1, 1], [], []>} : vector<128x384xbf16>, vector<384x384xbf16>, vector<128x384xf32> -> vector<128x384xf32>
    %3 = arith.truncf %2 : vector<128x384xf32> to vector<128x384xbf16>
    %c0_3 = arith.constant 0 : index
    %c0_4 = arith.constant 0 : index
    %4 = vector.load %arg3[%c0_3, %c0_4] : memref<128x384xbf16, #tpu.memory_space<vmem>>, vector<128x384xbf16>
    tpu.vector_store %arg3[%c0_3, %c0_4], %3 {strides = array<i32>} : memref<128x384xbf16, #tpu.memory_space<vmem>>, vector<128x384xbf16>,
    return
  }
  func.func @transform_0(%arg0: i32) -> (i32, i32) {
    %c0_i32 = arith.constant 0 : i32
    %c0_i32_0 = arith.constant 0 : i32
    return %arg0, %c0_i32 : i32, i32
  }
  func.func @transform_1(%arg0: i32) -> (i32, i32) {
    %c0_i32 = arith.constant 0 : i32
    %c0_i32_0 = arith.constant 0 : i32
    %c0_i32_1 = arith.constant 0 : i32
    return %c0_i32, %c0_i32_0 : i32, i32
  }
  func.func @transform_2(%arg0: i32) -> (i32, i32) {
    %c0_i32 = arith.constant 0 : i32
    %c0_i32_0 = arith.constant 0 : i32
    return %arg0, %c0_i32 : i32, i32
  }
}

module attributes {stable_mosaic.version = 11 : i64} {
  func.func @_xw_kernel(%arg0: i32, %arg1: memref<128x384xbf16, #tpu.memory_space<vmem>>, %arg2: memref<384x128xbf16, #tpu.memory_space<vmem>>, %arg3: memref<128x128xbf16, #tpu.memory_space<vmem>>) attributes {dimension_semantics = [#tpu.dimension_semantics<parallel>], iteration_bounds = array<i64: 1>, scalar_prefetch = 0 : i64, scratch_operands = 0 : i64, tpu.core_type = #tpu.core_type<tc>, window_params = [{transform_indices = @transform_0, window_bounds = array<i64: 128, 384>}, {pipeline_mode = #tpu.pipeline_mode<synchronous>, transform_indices = @transform_1, window_bounds = array<i64: 384, 128>}, {transform_indices = @transform_2, window_bounds = array<i64: 128, 128>}]} {
    %c0 = arith.constant 0 : index
    %c0_0 = arith.constant 0 : index
    %0 = vector.load %arg1[%c0, %c0_0] : memref<128x384xbf16, #tpu.memory_space<vmem>>, vector<128x384xbf16>
    %c0_1 = arith.constant 0 : index
    %c0_2 = arith.constant 0 : index
    %1 = vector.load %arg2[%c0_1, %c0_2] : memref<384x128xbf16, #tpu.memory_space<vmem>>, vector<384x128xbf16>
    %cst = arith.constant dense<0.000000e+00> : vector<128x128xf32>
    %2 = tpu.matmul %0, %1, %cst {dimension_numbers = #tpu.dot_dimension_numbers<[1], [0], [0], [1], [0, 0, 1, 1], [], []>} : vector<128x384xbf16>, vector<384x128xbf16>, vector<128x128xf32> -> vector<128x128xf32>
    %3 = arith.truncf %2 : vector<128x128xf32> to vector<128x128xbf16>
    %c0_3 = arith.constant 0 : index
    %c0_4 = arith.constant 0 : index
    %4 = vector.load %arg3[%c0_3, %c0_4] : memref<128x128xbf16, #tpu.memory_space<vmem>>, vector<128x128xbf16>
    tpu.vector_store %arg3[%c0_3, %c0_4], %3 {strides = array<i32>} : memref<128x128xbf16, #tpu.memory_space<vmem>>, vector<128x128xbf16>,
    return
  }
  func.func @transform_0(%arg0: i32) -> (i32, i32) {
    %c0_i32 = arith.constant 0 : i32
    %c0_i32_0 = arith.constant 0 : i32
    return %arg0, %c0_i32 : i32, i32
  }
  func.func @transform_1(%arg0: i32) -> (i32, i32) {
    %c0_i32 = arith.constant 0 : i32
    %c0_i32_0 = arith.constant 0 : i32
    %c0_i32_1 = arith.constant 0 : i32
    return %c0_i32, %c0_i32_0 : i32, i32
  }
  func.func @transform_2(%arg0: i32) -> (i32, i32) {
    %c0_i32 = arith.constant 0 : i32
    %c0_i32_0 = arith.constant 0 : i32
    return %arg0, %c0_i32 : i32, i32
  }
}

module attributes {stable_mosaic.version = 11 : i64} {
  func.func @_lin_fused_kernel(%arg0: i32, %arg1: memref<128x128xbf16, #tpu.memory_space<vmem>>, %arg2: memref<128x128xbf16, #tpu.memory_space<vmem>>, %arg3: memref<128x256xbf16, #tpu.memory_space<vmem>>, %arg4: memref<1x256xf32, #tpu.memory_space<vmem>>, %arg5: memref<128x128xbf16, #tpu.memory_space<vmem>>, %arg6: memref<128x128xf32, #tpu.memory_space<vmem>>) attributes {dimension_semantics = [#tpu.dimension_semantics<parallel>], iteration_bounds = array<i64: 1>, scalar_prefetch = 0 : i64, scratch_operands = 0 : i64, tpu.core_type = #tpu.core_type<tc>, window_params = [{transform_indices = @transform_0, window_bounds = array<i64: 128, 128>}, {transform_indices = @transform_1, window_bounds = array<i64: 128, 128>}, {pipeline_mode = #tpu.pipeline_mode<synchronous>, transform_indices = @transform_2, window_bounds = array<i64: 128, 256>}, {pipeline_mode = #tpu.pipeline_mode<synchronous>, transform_indices = @transform_3, window_bounds = array<i64: 1, 256>}, {transform_indices = @transform_4, window_bounds = array<i64: 128, 128>}, {transform_indices = @transform_5, window_bounds = array<i64: 128, 128>}]} {
    %c0 = arith.constant 0 : index
    %c0_0 = arith.constant 0 : index
    %0 = vector.load %arg1[%c0, %c0_0] : memref<128x128xbf16, #tpu.memory_space<vmem>>, vector<128x128xbf16>
    %c0_1 = arith.constant 0 : index
    %c0_2 = arith.constant 0 : index
    %1 = vector.load %arg3[%c0_1, %c0_2] : memref<128x256xbf16, #tpu.memory_space<vmem>>, vector<128x256xbf16>
    %cst = arith.constant dense<0.000000e+00> : vector<128x256xf32>
    %2 = tpu.matmul %0, %1, %cst {dimension_numbers = #tpu.dot_dimension_numbers<[1], [0], [0], [1], [0, 0, 1, 1], [], []>} : vector<128x128xbf16>, vector<128x256xbf16>, vector<128x256xf32> -> vector<128x256xf32>
    %c0_3 = arith.constant 0 : index
    %c0_4 = arith.constant 0 : index
    %3 = vector.load %arg4[%c0_3, %c0_4] : memref<1x256xf32, #tpu.memory_space<vmem>>, vector<1x256xf32>
    %4 = vector.broadcast %3 : vector<1x256xf32> to vector<128x256xf32>
    %5 = arith.addf %2, %4 : vector<128x256xf32>
    %cst_5 = arith.constant 0.000000e+00 : f32
    %6 = vector.broadcast %cst_5 : f32 to vector<128x256xf32>
    %7 = arith.maximumf %5, %6 : vector<128x256xf32>
    %c0_6 = arith.constant 0 : index
    %c0_7 = arith.constant 0 : index
    %8 = vector.load %arg2[%c0_6, %c0_7] : memref<128x128xbf16, #tpu.memory_space<vmem>>, vector<128x128xbf16>
    %9 = arith.extf %8 : vector<128x128xbf16> to vector<128x128xf32>
    %10 = vector.extract_strided_slice %7 {offsets = [0, 0], sizes = [128, 128], strides = [1, 1]} : vector<128x256xf32> to vector<128x128xf32>
    %11 = arith.addf %9, %10 : vector<128x128xf32>
    %12 = arith.truncf %11 : vector<128x128xf32> to vector<128x128xbf16>
    %c0_8 = arith.constant 0 : index
    %c0_9 = arith.constant 0 : index
    %13 = vector.load %arg5[%c0_8, %c0_9] : memref<128x128xbf16, #tpu.memory_space<vmem>>, vector<128x128xbf16>
    tpu.vector_store %arg5[%c0_8, %c0_9], %12 {strides = array<i32>} : memref<128x128xbf16, #tpu.memory_space<vmem>>, vector<128x128xbf16>,
    %14 = vector.extract_strided_slice %7 {offsets = [0, 128], sizes = [128, 128], strides = [1, 1]} : vector<128x256xf32> to vector<128x128xf32>
    %15 = arith.addf %9, %14 : vector<128x128xf32>
    %c0_10 = arith.constant 0 : index
    %c0_11 = arith.constant 0 : index
    %16 = vector.load %arg6[%c0_10, %c0_11] : memref<128x128xf32, #tpu.memory_space<vmem>>, vector<128x128xf32>
    tpu.vector_store %arg6[%c0_10, %c0_11], %15 {strides = array<i32>} : memref<128x128xf32, #tpu.memory_space<vmem>>, vector<128x128xf32>,
    return
  }
  func.func @transform_0(%arg0: i32) -> (i32, i32) {
    %c0_i32 = arith.constant 0 : i32
    %c0_i32_0 = arith.constant 0 : i32
    return %arg0, %c0_i32 : i32, i32
  }
  func.func @transform_1(%arg0: i32) -> (i32, i32) {
    %c0_i32 = arith.constant 0 : i32
    %c0_i32_0 = arith.constant 0 : i32
    return %arg0, %c0_i32 : i32, i32
  }
  func.func @transform_2(%arg0: i32) -> (i32, i32) {
    %c0_i32 = arith.constant 0 : i32
    %c0_i32_0 = arith.constant 0 : i32
    %c0_i32_1 = arith.constant 0 : i32
    return %c0_i32, %c0_i32_0 : i32, i32
  }
  func.func @transform_3(%arg0: i32) -> (i32, i32) {
    %c0_i32 = arith.constant 0 : i32
    %c0_i32_0 = arith.constant 0 : i32
    %c0_i32_1 = arith.constant 0 : i32
    return %c0_i32, %c0_i32_0 : i32, i32
  }
  func.func @transform_4(%arg0: i32) -> (i32, i32) {
    %c0_i32 = arith.constant 0 : i32
    %c0_i32_0 = arith.constant 0 : i32
    return %arg0, %c0_i32 : i32, i32
  }
  func.func @transform_5(%arg0: i32) -> (i32, i32) {
    %c0_i32 = arith.constant 0 : i32
    %c0_i32_0 = arith.constant 0 : i32
    return %arg0, %c0_i32 : i32, i32
  }
}

module attributes {stable_mosaic.version = 11 : i64} {
  func.func @_xw_kernel(%arg0: i32, %arg1: memref<128x128xbf16, #tpu.memory_space<vmem>>, %arg2: memref<128x128xbf16, #tpu.memory_space<vmem>>, %arg3: memref<128x128xbf16, #tpu.memory_space<vmem>>) attributes {dimension_semantics = [#tpu.dimension_semantics<parallel>], iteration_bounds = array<i64: 1>, scalar_prefetch = 0 : i64, scratch_operands = 0 : i64, tpu.core_type = #tpu.core_type<tc>, window_params = [{transform_indices = @transform_0, window_bounds = array<i64: 128, 128>}, {pipeline_mode = #tpu.pipeline_mode<synchronous>, transform_indices = @transform_1, window_bounds = array<i64: 128, 128>}, {transform_indices = @transform_2, window_bounds = array<i64: 128, 128>}]} {
    %c0 = arith.constant 0 : index
    %c0_0 = arith.constant 0 : index
    %0 = vector.load %arg1[%c0, %c0_0] : memref<128x128xbf16, #tpu.memory_space<vmem>>, vector<128x128xbf16>
    %c0_1 = arith.constant 0 : index
    %c0_2 = arith.constant 0 : index
    %1 = vector.load %arg2[%c0_1, %c0_2] : memref<128x128xbf16, #tpu.memory_space<vmem>>, vector<128x128xbf16>
    %cst = arith.constant dense<0.000000e+00> : vector<128x128xf32>
    %2 = tpu.matmul %0, %1, %cst {dimension_numbers = #tpu.dot_dimension_numbers<[1], [0], [0], [1], [0, 0, 1, 1], [], []>} : vector<128x128xbf16>, vector<128x128xbf16>, vector<128x128xf32> -> vector<128x128xf32>
    %3 = arith.truncf %2 : vector<128x128xf32> to vector<128x128xbf16>
    %c0_3 = arith.constant 0 : index
    %c0_4 = arith.constant 0 : index
    %4 = vector.load %arg3[%c0_3, %c0_4] : memref<128x128xbf16, #tpu.memory_space<vmem>>, vector<128x128xbf16>
    tpu.vector_store %arg3[%c0_3, %c0_4], %3 {strides = array<i32>} : memref<128x128xbf16, #tpu.memory_space<vmem>>, vector<128x128xbf16>,
    return
  }
  func.func @transform_0(%arg0: i32) -> (i32, i32) {
    %c0_i32 = arith.constant 0 : i32
    %c0_i32_0 = arith.constant 0 : i32
    return %arg0, %c0_i32 : i32, i32
  }
  func.func @transform_1(%arg0: i32) -> (i32, i32) {
    %c0_i32 = arith.constant 0 : i32
    %c0_i32_0 = arith.constant 0 : i32
    %c0_i32_1 = arith.constant 0 : i32
    return %c0_i32, %c0_i32_0 : i32, i32
  }
  func.func @transform_2(%arg0: i32) -> (i32, i32) {
    %c0_i32 = arith.constant 0 : i32
    %c0_i32_0 = arith.constant 0 : i32
    return %arg0, %c0_i32 : i32, i32
  }
}

module attributes {stable_mosaic.version = 11 : i64} {
  func.func @_link_loss_kernel(%arg0: memref<32x128xf32, #tpu.memory_space<vmem>>, %arg1: memref<32x128xf32, #tpu.memory_space<vmem>>, %arg2: memref<64x128xf32, #tpu.memory_space<vmem>>, %arg3: memref<64x128xf32, #tpu.memory_space<vmem>>, %arg4: memref<1x1xf32, #tpu.memory_space<vmem>>) attributes {dimension_semantics = [], scalar_prefetch = 0 : i64, scratch_operands = 0 : i64, tpu.core_type = #tpu.core_type<tc>} {
    %c0 = arith.constant 0 : index
    %c0_0 = arith.constant 0 : index
    %0 = vector.load %arg0[%c0, %c0_0] : memref<32x128xf32, #tpu.memory_space<vmem>>, vector<32x128xf32>
    %c0_1 = arith.constant 0 : index
    %c0_2 = arith.constant 0 : index
    %1 = vector.load %arg1[%c0_1, %c0_2] : memref<32x128xf32, #tpu.memory_space<vmem>>, vector<32x128xf32>
    %2 = arith.mulf %0, %1 : vector<32x128xf32>
    %cst = arith.constant dense<0.000000e+00> : vector<32xf32>
    %3 = vector.multi_reduction <add>, %2, %cst [1] : vector<32x128xf32> to vector<32xf32>
    %4 = vector.shape_cast %3 : vector<32xf32> to vector<32x1xf32>
    %c0_3 = arith.constant 0 : index
    %c0_4 = arith.constant 0 : index
    %5 = vector.load %arg2[%c0_3, %c0_4] : memref<64x128xf32, #tpu.memory_space<vmem>>, vector<64x128xf32>
    %c0_5 = arith.constant 0 : index
    %c0_6 = arith.constant 0 : index
    %6 = vector.load %arg3[%c0_5, %c0_6] : memref<64x128xf32, #tpu.memory_space<vmem>>, vector<64x128xf32>
    %7 = arith.mulf %5, %6 : vector<64x128xf32>
    %cst_7 = arith.constant dense<0.000000e+00> : vector<64xf32>
    %8 = vector.multi_reduction <add>, %7, %cst_7 [1] : vector<64x128xf32> to vector<64xf32>
    %9 = vector.shape_cast %8 : vector<64xf32> to vector<64x1xf32>
    %cst_8 = arith.constant 0.000000e+00 : f32
    %10 = vector.broadcast %cst_8 : f32 to vector<32x1xf32>
    %11 = arith.subf %10, %4 : vector<32x1xf32>
    %12 = math.exp %11 : vector<32x1xf32>
    %cst_9 = arith.constant 1.000000e+00 : f32
    %13 = vector.broadcast %cst_9 : f32 to vector<32x1xf32>
    %14 = arith.addf %13, %12 : vector<32x1xf32>
    %cst_10 = arith.constant 1.000000e+00 : f32
    %15 = vector.broadcast %cst_10 : f32 to vector<32x1xf32>
    %16 = arith.divf %15, %14 : vector<32x1xf32>
    %cst_11 = arith.constant 0.000000e+00 : f32
    %17 = vector.broadcast %cst_11 : f32 to vector<64x1xf32>
    %18 = arith.subf %17, %9 : vector<64x1xf32>
    %19 = math.exp %18 : vector<64x1xf32>
    %cst_12 = arith.constant 1.000000e+00 : f32
    %20 = vector.broadcast %cst_12 : f32 to vector<64x1xf32>
    %21 = arith.addf %20, %19 : vector<64x1xf32>
    %cst_13 = arith.constant 1.000000e+00 : f32
    %22 = vector.broadcast %cst_13 : f32 to vector<64x1xf32>
    %23 = arith.divf %22, %21 : vector<64x1xf32>
    %cst_14 = arith.constant 1.000000e-15 : f32
    %24 = vector.broadcast %cst_14 : f32 to vector<32x1xf32>
    %25 = arith.addf %16, %24 : vector<32x1xf32>
    %26 = math.log %25 : vector<32x1xf32>
    %cst_15 = arith.constant 0.000000e+00 : f32
    %27 = vector.broadcast %cst_15 : f32 to vector<32x1xf32>
    %28 = arith.subf %27, %26 : vector<32x1xf32>
    %cst_16 = arith.constant 1.000000e+00 : f32
    %29 = vector.broadcast %cst_16 : f32 to vector<64x1xf32>
    %30 = arith.subf %29, %23 : vector<64x1xf32>
    %cst_17 = arith.constant 1.000000e-15 : f32
    %31 = vector.broadcast %cst_17 : f32 to vector<64x1xf32>
    %32 = arith.addf %30, %31 : vector<64x1xf32>
    %33 = math.log %32 : vector<64x1xf32>
    %cst_18 = arith.constant 0.000000e+00 : f32
    %34 = vector.broadcast %cst_18 : f32 to vector<64x1xf32>
    %35 = arith.subf %34, %33 : vector<64x1xf32>
    %36 = vector.shape_cast %28 : vector<32x1xf32> to vector<1x32x1xf32>
    %cst_19 = arith.constant dense<0.000000e+00> : vector<1xf32>
    %37 = vector.multi_reduction <add>, %36, %cst_19 [1, 2] : vector<1x32x1xf32> to vector<1xf32>
    %38 = vector.shape_cast %37 : vector<1xf32> to vector<1x1x1xf32>
    %39 = vector.extract %38[0, 0, 0] : f32 from vector<1x1x1xf32>
    %40 = vector.broadcast %39 : f32 to vector<1x1xf32>
    %cst_20 = arith.constant 3.200000e+01 : f32
    %41 = vector.broadcast %cst_20 : f32 to vector<1x1xf32>
    %42 = arith.divf %40, %41 : vector<1x1xf32>
    %43 = vector.shape_cast %35 : vector<64x1xf32> to vector<1x64x1xf32>
    %cst_21 = arith.constant dense<0.000000e+00> : vector<1xf32>
    %44 = vector.multi_reduction <add>, %43, %cst_21 [1, 2] : vector<1x64x1xf32> to vector<1xf32>
    %45 = vector.shape_cast %44 : vector<1xf32> to vector<1x1x1xf32>
    %46 = vector.extract %45[0, 0, 0] : f32 from vector<1x1x1xf32>
    %47 = vector.broadcast %46 : f32 to vector<1x1xf32>
    %cst_22 = arith.constant 6.400000e+01 : f32
    %48 = vector.broadcast %cst_22 : f32 to vector<1x1xf32>
    %49 = arith.divf %47, %48 : vector<1x1xf32>
    %50 = arith.addf %42, %49 : vector<1x1xf32>
    %c0_23 = arith.constant 0 : index
    %c0_24 = arith.constant 0 : index
    %51 = vector.load %arg4[%c0_23, %c0_24] : memref<1x1xf32, #tpu.memory_space<vmem>>, vector<1x1xf32>
    tpu.vector_store %arg4[%c0_23, %c0_24], %50 {strides = array<i32>} : memref<1x1xf32, #tpu.memory_space<vmem>>, vector<1x1xf32>,
    return
  }
}

module attributes {stable_mosaic.version = 11 : i64} {
  func.func @_gcn_agg_kernel(%arg0: i32, %arg1: i32, %arg2: memref<128x128xbf16, #tpu.memory_space<vmem>>, %arg3: memref<128x128xbf16, #tpu.memory_space<vmem>>, %arg4: memref<1x128xf32, #tpu.memory_space<vmem>>, %arg5: memref<128x128xf32, #tpu.memory_space<vmem>>, %arg6: memref<128x128xf32, #tpu.memory_space<vmem>>) attributes {dimension_semantics = [#tpu.dimension_semantics<parallel>, #tpu.dimension_semantics<arbitrary>], iteration_bounds = array<i64: 1, 1>, scalar_prefetch = 0 : i64, scratch_operands = 1 : i64, tpu.core_type = #tpu.core_type<tc>, window_params = [{transform_indices = @transform_0, window_bounds = array<i64: 128, 128>}, {transform_indices = @transform_1, window_bounds = array<i64: 128, 128>}, {pipeline_mode = #tpu.pipeline_mode<synchronous>, transform_indices = @transform_2, window_bounds = array<i64: 1, 128>}, {transform_indices = @transform_3, window_bounds = array<i64: 128, 128>}]} {
    %c0_i32 = arith.constant 0 : i32
    %0 = arith.cmpi eq, %arg1, %c0_i32 : i32
    %1 = arith.extui %0 : i1 to i32
    %c0_i32_0 = arith.constant 0 : i32
    %2 = arith.cmpi ne, %1, %c0_i32_0 : i32
    scf.if %2 {
      %cst_10 = arith.constant 0.000000e+00 : f32
      %12 = vector.broadcast %cst_10 : f32 to vector<128x128xf32>
      %c0_11 = arith.constant 0 : index
      %c0_12 = arith.constant 0 : index
      %13 = vector.load %arg6[%c0_11, %c0_12] : memref<128x128xf32, #tpu.memory_space<vmem>>, vector<128x128xf32>
      tpu.vector_store %arg6[%c0_11, %c0_12], %12 {strides = array<i32>} : memref<128x128xf32, #tpu.memory_space<vmem>>, vector<128x128xf32>,
    } else {
    }
    %c0 = arith.constant 0 : index
    %c0_1 = arith.constant 0 : index
    %3 = vector.load %arg6[%c0, %c0_1] : memref<128x128xf32, #tpu.memory_space<vmem>>, vector<128x128xf32>
    %c0_2 = arith.constant 0 : index
    %c0_3 = arith.constant 0 : index
    %4 = vector.load %arg2[%c0_2, %c0_3] : memref<128x128xbf16, #tpu.memory_space<vmem>>, vector<128x128xbf16>
    %c0_4 = arith.constant 0 : index
    %c0_5 = arith.constant 0 : index
    %5 = vector.load %arg3[%c0_4, %c0_5] : memref<128x128xbf16, #tpu.memory_space<vmem>>, vector<128x128xbf16>
    %cst = arith.constant dense<0.000000e+00> : vector<128x128xf32>
    %6 = tpu.matmul %4, %5, %cst {dimension_numbers = #tpu.dot_dimension_numbers<[1], [0], [0], [1], [0, 0, 1, 1], [], []>} : vector<128x128xbf16>, vector<128x128xbf16>, vector<128x128xf32> -> vector<128x128xf32>
    %7 = arith.addf %3, %6 : vector<128x128xf32>
    %c0_6 = arith.constant 0 : index
    %c0_7 = arith.constant 0 : index
    %8 = vector.load %arg6[%c0_6, %c0_7] : memref<128x128xf32, #tpu.memory_space<vmem>>, vector<128x128xf32>
    tpu.vector_store %arg6[%c0_6, %c0_7], %7 {strides = array<i32>} : memref<128x128xf32, #tpu.memory_space<vmem>>, vector<128x128xf32>,
    %c0_i32_8 = arith.constant 0 : i32
    %9 = arith.cmpi eq, %arg1, %c0_i32_8 : i32
    %10 = arith.extui %9 : i1 to i32
    %c0_i32_9 = arith.constant 0 : i32
    %11 = arith.cmpi ne, %10, %c0_i32_9 : i32
    scf.if %11 {
      %c0_10 = arith.constant 0 : index
      %c0_11 = arith.constant 0 : index
      %12 = vector.load %arg6[%c0_10, %c0_11] : memref<128x128xf32, #tpu.memory_space<vmem>>, vector<128x128xf32>
      %c0_12 = arith.constant 0 : index
      %c0_13 = arith.constant 0 : index
      %13 = vector.load %arg4[%c0_12, %c0_13] : memref<1x128xf32, #tpu.memory_space<vmem>>, vector<1x128xf32>
      %14 = vector.broadcast %13 : vector<1x128xf32> to vector<128x128xf32>
      %15 = arith.addf %12, %14 : vector<128x128xf32>
      %c0_14 = arith.constant 0 : index
      %c0_15 = arith.constant 0 : index
      %16 = vector.load %arg5[%c0_14, %c0_15] : memref<128x128xf32, #tpu.memory_space<vmem>>, vector<128x128xf32>
      tpu.vector_store %arg5[%c0_14, %c0_15], %15 {strides = array<i32>} : memref<128x128xf32, #tpu.memory_space<vmem>>, vector<128x128xf32>,
    } else {
    }
    return
  }
  func.func @transform_0(%arg0: i32, %arg1: i32) -> (i32, i32) {
    %c0_i32 = arith.constant 0 : i32
    return %arg0, %arg1 : i32, i32
  }
  func.func @transform_1(%arg0: i32, %arg1: i32) -> (i32, i32) {
    %c0_i32 = arith.constant 0 : i32
    %c0_i32_0 = arith.constant 0 : i32
    return %arg1, %c0_i32 : i32, i32
  }
  func.func @transform_2(%arg0: i32, %arg1: i32) -> (i32, i32) {
    %c0_i32 = arith.constant 0 : i32
    %c0_i32_0 = arith.constant 0 : i32
    %c0_i32_1 = arith.constant 0 : i32
    return %c0_i32, %c0_i32_0 : i32, i32
  }
  func.func @transform_3(%arg0: i32, %arg1: i32) -> (i32, i32) {
    %c0_i32 = arith.constant 0 : i32
    %c0_i32_0 = arith.constant 0 : i32
    return %arg0, %c0_i32 : i32, i32
  }
}

</mosaic_0001>

<bundles_post_ra>
// kernel: gcn_bayes_forward.20
= control target key start
LH: loop header
LB: loop body
LE: loop exit
PB: predicated region body
PF: predicated region fallthrough
CT: control target
= control target key end

     0   :  { %v827_v1 = vmov 0   ;;  %s1043_s1 = inlined_call_operand.vmem [shape: bf16[128,384], index: 1, kind: input, shape index: {}]   ;;  %s1044_s0 = inlined_call_operand.vmem [shape: bf16[128,128], index: 0, kind: input, shape index: {}]   ;;  %s1045_s2 = inlined_call_operand.vmem [shape: bf16[128,384], index: 2, kind: output, shape index: {}]  }
   0x1   :  { %v787_v0 = vld [vmem:[%s1043_s1 + $0x4] ss:$12 sps:$4 sm:$0xff]   ;;  %268 = vmatprep.mubr.bf16.mxu0 %v827_v1  ;;  %v789_v2 = vld [vmem:[%s1043_s1] ss:$12 sps:$4 sm:$0xff]   ;;  %v790_v3 = vld [vmem:[%s1043_s1 + $0x1c] ss:$12 sps:$4 sm:$0xff]  }
   0x2   :  { %236 = vmatprep.subr.bf16.mxu0 %v787_v0  ;;  %v792_v4 = vld [vmem:[%s1043_s1 + $0x18] ss:$12 sps:$4 sm:$0xff]   ;;  %v793_v5 = vld [vmem:[%s1043_s1 + $0x34] ss:$12 sps:$4 sm:$0xff]   ;;  %v795_v6 = vld [vmem:[%s1043_s1 + $0x30] ss:$12 sps:$4 sm:$0xff]  }
   0x3   :  { %237 = vmatpush1.bf16.msra.mxu0 %v789_v2  ;;  %v796_v7 = vld [vmem:[%s1043_s1 + $0x4c] ss:$12 sps:$4 sm:$0xff]   ;;  %v798_v8 = vld [vmem:[%s1043_s1 + $0x48] ss:$12 sps:$4 sm:$0xff]   ;;  %v799_v9 = vld [vmem:[%s1043_s1 + $0x64] ss:$12 sps:$4 sm:$0xff]  }
   0x4   :  { %238 = vmatprep.subr.bf16.mxu0 %v790_v3  ;;  %v811_v10 = vld [vmem:[%s1043_s1 + $0x8] ss:$12 sps:$4 sm:$0xff]   ;;  %v812_v11 = vld [vmem:[%s1044_s0] sm:$0xff]   ;;  %v816_v17 = vld [vmem:[%s1043_s1 + $0x50] ss:$12 sps:$4 sm:$0xff]  }
   0x5   :  { %754 = vmatprep.subr.bf16.mxu1 %v811_v10  ;;  %v813_v12 = vld [vmem:[%s1043_s1 + $0x20] ss:$12 sps:$4 sm:$0xff]   ;;  %770 = vmatprep.mubr.bf16.mxu1 %v812_v11  ;;  %v814_v14 = vld [vmem:[%s1043_s1 + $0x38] ss:$12 sps:$4 sm:$0xff]   ;;  %v802_v15 = vld [vmem:[%s1043_s1 + $0x7c] ss:$12 sps:$4 sm:$0xff]  }
   0x6   :  { %v801_v13 = vld [vmem:[%s1043_s1 + $0x60] ss:$12 sps:$4 sm:$0xff]   ;;  %755 = vmatpush3.bf16.msra.mxu1 %v811_v10  ;;  %v804_v16 = vld [vmem:[%s1043_s1 + $0x78] ss:$12 sps:$4 sm:$0xff]   ;;  %v807_v19 = vld [vmem:[%s1043_s1 + $0x90] ss:$12 sps:$4 sm:$0xff]  }
   0x7   :  { %239 = vmatpush1.bf16.msra.mxu0 %v792_v4  ;;  %756 = vmatprep.subr.bf16.mxu1 %v813_v12  ;;  %v805_v18 = vld [vmem:[%s1043_s1 + $0x94] ss:$12 sps:$4 sm:$0xff]   ;;  %v808_v21 = vld [vmem:[%s1043_s1 + $0xac] ss:$12 sps:$4 sm:$0xff]   ;;  %v822_v25 = vld [vmem:[%s1043_s1 + $0xb0] ss:$12 sps:$4 sm:$0xff]  }
   0x8   :  { %240 = vmatprep.subr.bf16.mxu0 %v793_v5  ;;  %v817_v20 = vld [vmem:[%s1043_s1 + $0x68] ss:$12 sps:$4 sm:$0xff]   ;;  %v819_v23 = vld [vmem:[%s1043_s1 + $0x80] ss:$12 sps:$4 sm:$0xff]   ;;  %v820_v24 = vld [vmem:[%s1043_s1 + $0x98] ss:$12 sps:$4 sm:$0xff]  }
   0x9   :  { %v810_v22 = vld [vmem:[%s1043_s1 + $0xa8] ss:$12 sps:$4 sm:$0xff]   ;;  %v821_v28 = vld [vmem:[%s1044_s0 + $0x18] sm:$0xff]   ;;  %v823_v29 = vld [vmem:[%s1044_s0 + $0x20] sm:$0xff]  }
   0xa   :  { %757 = vmatpush3.bf16.msra.mxu1 %v813_v12  ;;  %v815_v26 = vld [vmem:[%s1044_s0 + $0x8] sm:$0xff]   ;;  %v818_v27 = vld [vmem:[%s1044_s0 + $0x10] sm:$0xff]   ;;  %v826_v32 = vld [vmem:[%s1044_s0 + $0x38] sm:$0xff]  }
   0xb   :  { %241 = vmatpush1.bf16.msra.mxu0 %v795_v6  ;;  %758 = vmatprep.subr.bf16.mxu1 %v814_v14  ;;  %v824_v30 = vld [vmem:[%s1044_s0 + $0x28] sm:$0xff]   ;;  %v825_v31 = vld [vmem:[%s1044_s0 + $0x30] sm:$0xff]  }
   0xc   :  { %242 = vmatprep.subr.bf16.mxu0 %v796_v7 }
   0xe   :  { %759 = vmatpush3.bf16.msra.mxu1 %v814_v14 }
   0xf   :  { %243 = vmatpush1.bf16.msra.mxu0 %v798_v8  ;;  %760 = vmatprep.subr.bf16.mxu1 %v816_v17 }
  0x10   :  { %244 = vmatprep.subr.bf16.mxu0 %v799_v9 }
  0x12   :  { %761 = vmatpush3.bf16.msra.mxu1 %v816_v17 }
  0x13   :  { %245 = vmatpush1.bf16.msra.mxu0 %v801_v13  ;;  %762 = vmatprep.subr.bf16.mxu1 %v817_v20 }
  0x14   :  { %246 = vmatprep.subr.bf16.mxu0 %v802_v15 }
  0x16   :  { %763 = vmatpush3.bf16.msra.mxu1 %v817_v20 }
  0x17   :  { %247 = vmatpush1.bf16.msra.mxu0 %v804_v16  ;;  %764 = vmatprep.subr.bf16.mxu1 %v819_v23 }
  0x18   :  { %248 = vmatprep.subr.bf16.mxu0 %v805_v18 }
  0x1a   :  { %765 = vmatpush3.bf16.msra.mxu1 %v819_v23 }
  0x1b   :  { %249 = vmatpush1.bf16.msra.mxu0 %v807_v19  ;;  %766 = vmatprep.subr.bf16.mxu1 %v820_v24 }
  0x1c   :  { %250 = vmatprep.subr.bf16.mxu0 %v808_v21 }
  0x1e   :  { %767 = vmatpush3.bf16.msra.mxu1 %v820_v24 }
  0x1f   :  { %251 = vmatpush1.bf16.msra.mxu0 %v810_v22  ;;  %768 = vmatprep.subr.bf16.mxu1 %v822_v25 }
  0x22   :  { %269 = vmatmul.mubr.bf16.vlgmr.msra.gmra.mrb[0].mxu0 %v812_v11  ;;  %769 = vmatpush3.bf16.msra.mxu1 %v822_v25 }
  0x23   :  { %278 = vmatprep.mubr.bf16.mxu0 %v827_v1 }
  0x25   :  { %771 = vmatmul.mubr.bf16.vlgmr.msra.gmra.mrb[0].mxu1 %v815_v26 }
  0x26   :  { %774 = vmatprep.mubr.bf16.mxu1 %v818_v27 }
  0x2a   :  { %279 = vmatmul.mubr.bf16.gmra.mrb[4].mxu0 %v815_v26 }
  0x2b   :  { %288 = vmatprep.mubr.bf16.mxu0 %v827_v1 }
  0x2d   :  { %775 = vmatmul.mubr.bf16.gmra.mrb[4].mxu1 %v821_v28 }
  0x2e   :  { %778 = vmatprep.mubr.bf16.mxu1 %v823_v29 }
  0x32   :  { %289 = vmatmul.mubr.bf16.gmra.mrb[8].mxu0 %v818_v27 }
  0x33   :  { %298 = vmatprep.mubr.bf16.mxu0 %v827_v1 }
  0x35   :  { %779 = vmatmul.mubr.bf16.gmra.mrb[8].mxu1 %v824_v30 }
  0x36   :  { %782 = vmatprep.mubr.bf16.mxu1 %v825_v31 }
  0x3a   :  { %299 = vmatmul.mubr.bf16.gmra.mrb[12].mxu0 %v821_v28 }
  0x3b   :  { %308 = vmatprep.mubr.bf16.mxu0 %v827_v1 }
  0x3d   :  { %783 = vmatmul.mubr.bf16.gmra.mrb[12].mxu1 %v826_v32 }
  0x42   :  { %309 = vmatmul.mubr.bf16.gmra.mrb[16].mxu0 %v823_v29 }
  0x43   :  { %318 = vmatprep.mubr.bf16.mxu0 %v827_v1 }
  0x4a   :  { %319 = vmatmul.mubr.bf16.gmra.mrb[20].mxu0 %v824_v30 }
  0x4b   :  { %328 = vmatprep.mubr.bf16.mxu0 %v827_v1 }
  0x52   :  { %329 = vmatmul.mubr.bf16.gmra.mrb[24].mxu0 %v825_v31 }
  0x53   :  { %338 = vmatprep.mubr.bf16.mxu0 %v827_v1 }
  0x5a   :  { %339 = vmatmul.mubr.bf16.gmra.mrb[28].mxu0 %v826_v32 }
  0xf5   :  { %v270_v33 = vpop.f32.mrb[0].mxu0 }
  0xf6   :  { %v272_v34 = vpop.f32.mrb[1].mxu0 }
  0xf7   :  { %v706_v35 = vpack.c.bf16 %v272_v34, %v270_v33  ;;  %v274_v36 = vpop.f32.mrb[2].mxu0 }
  0xf8   :  { %v276_v37 = vpop.f32.mrb[3].mxu0  ;;  %v772_v44 = vpop.f32.mrb[0].mxu1 }
  0xf9   :  { %606 = vst [vmem:[%s1045_s2] sm:$0xff] %v706_v35  ;;  %v708_v38 = vpack.c.bf16 %v276_v37, %v274_v36  ;;  %v711_v46 = vpack.c.bf16 %v772_v44, %v772_v44  ;;  %v383_v47 = vpop.f32.mrb[1].mxu1 }
  0xfa   :  { %v707_v48 = vpack.c.bf16 %v383_v47, %v383_v47  ;;  %v773_v49 = vpop.f32.mrb[2].mxu1 }
  0xfb   :  { %608 = vst [vmem:[%s1045_s2 + $0xc] sm:$0xff] %v708_v38  ;;  %611 = vst [vmem:[%s1045_s2 + $0x20] sm:$0xf] %v711_v46  ;;  %v713_v50 = vpack.c.bf16 %v773_v49, %v773_v49  ;;  %v386_v51 = vpop.f32.mrb[3].mxu1 }
  0xfc   :  { %607 = vst [vmem:[%s1045_s2 + $0x8] sm:$0xf] %v707_v48  ;;  %v709_v52 = vpack.c.bf16 %v386_v51, %v386_v51 }
  0xfd   :  { %v280_v39 = vpop.f32.mrb[4].mxu0  ;;  %613 = vst [vmem:[%s1045_s2 + $0x2c] sm:$0xf] %v713_v50 }
  0xfe   :  { %v282_v40 = vpop.f32.mrb[5].mxu0  ;;  %609 = vst [vmem:[%s1045_s2 + $0x14] sm:$0xf] %v709_v52 }
  0xff   :  { %v710_v41 = vpack.c.bf16 %v282_v40, %v280_v39  ;;  %v284_v42 = vpop.f32.mrb[6].mxu0 }
 0x100   :  { %v286_v43 = vpop.f32.mrb[7].mxu0  ;;  %v776_v58 = vpop.f32.mrb[4].mxu1 }
 0x101   :  { %610 = vst [vmem:[%s1045_s2 + $0x18] sm:$0xff] %v710_v41  ;;  %v712_v45 = vpack.c.bf16 %v286_v43, %v284_v42  ;;  %v719_v60 = vpack.c.bf16 %v776_v58, %v776_v58  ;;  %v399_v61 = vpop.f32.mrb[5].mxu1 }
 0x102   :  { %v715_v62 = vpack.c.bf16 %v399_v61, %v399_v61  ;;  %v777_v63 = vpop.f32.mrb[6].mxu1 }
 0x103   :  { %612 = vst [vmem:[%s1045_s2 + $0x24] sm:$0xff] %v712_v45  ;;  %619 = vst [vmem:[%s1045_s2 + $0x50] sm:$0xf] %v719_v60  ;;  %v721_v0 = vpack.c.bf16 %v777_v63, %v777_v63  ;;  %v402_v1 = vpop.f32.mrb[7].mxu1 }
 0x104   :  { %615 = vst [vmem:[%s1045_s2 + $0x38] sm:$0xf] %v715_v62  ;;  %v717_v2 = vpack.c.bf16 %v402_v1, %v402_v1 }
 0x105   :  { %v290_v53 = vpop.f32.mrb[8].mxu0  ;;  %621 = vst [vmem:[%s1045_s2 + $0x5c] sm:$0xf] %v721_v0 }
 0x106   :  { %v292_v54 = vpop.f32.mrb[9].mxu0  ;;  %617 = vst [vmem:[%s1045_s2 + $0x44] sm:$0xf] %v717_v2 }
 0x107   :  { %v714_v55 = vpack.c.bf16 %v292_v54, %v290_v53  ;;  %v294_v56 = vpop.f32.mrb[10].mxu0 }
 0x108   :  { %v296_v57 = vpop.f32.mrb[11].mxu0  ;;  %v780_v8 = vpop.f32.mrb[8].mxu1 }
 0x109   :  { %614 = vst [vmem:[%s1045_s2 + $0x30] sm:$0xff] %v714_v55  ;;  %v716_v59 = vpack.c.bf16 %v296_v57, %v294_v56  ;;  %v727_v10 = vpack.c.bf16 %v780_v8, %v780_v8  ;;  %v415_v11 = vpop.f32.mrb[9].mxu1 }
 0x10a   :  { %v723_v12 = vpack.c.bf16 %v415_v11, %v415_v11  ;;  %v781_v13 = vpop.f32.mrb[10].mxu1 }
 0x10b   :  { %616 = vst [vmem:[%s1045_s2 + $0x3c] sm:$0xff] %v716_v59  ;;  %627 = vst [vmem:[%s1045_s2 + $0x80] sm:$0xf] %v727_v10  ;;  %v729_v14 = vpack.c.bf16 %v781_v13, %v781_v13  ;;  %v418_v15 = vpop.f32.mrb[11].mxu1 }
 0x10c   :  { %623 = vst [vmem:[%s1045_s2 + $0x68] sm:$0xf] %v723_v12  ;;  %v725_v16 = vpack.c.bf16 %v418_v15, %v418_v15 }
 0x10d   :  { %v300_v3 = vpop.f32.mrb[12].mxu0  ;;  %629 = vst [vmem:[%s1045_s2 + $0x8c] sm:$0xf] %v729_v14 }
 0x10e   :  { %v302_v4 = vpop.f32.mrb[13].mxu0  ;;  %625 = vst [vmem:[%s1045_s2 + $0x74] sm:$0xf] %v725_v16 }
 0x10f   :  { %v718_v5 = vpack.c.bf16 %v302_v4, %v300_v3  ;;  %v304_v6 = vpop.f32.mrb[14].mxu0 }
 0x110   :  { %v306_v7 = vpop.f32.mrb[15].mxu0  ;;  %v784_v22 = vpop.f32.mrb[12].mxu1 }
 0x111   :  { %618 = vst [vmem:[%s1045_s2 + $0x48] sm:$0xff] %v718_v5  ;;  %v720_v9 = vpack.c.bf16 %v306_v7, %v304_v6  ;;  %v735_v24 = vpack.c.bf16 %v784_v22, %v784_v22  ;;  %v431_v25 = vpop.f32.mrb[13].mxu1 }
 0x112   :  { %v731_v26 = vpack.c.bf16 %v431_v25, %v431_v25  ;;  %v785_v27 = vpop.f32.mrb[14].mxu1 }
 0x113   :  { %620 = vst [vmem:[%s1045_s2 + $0x54] sm:$0xff] %v720_v9  ;;  %635 = vst [vmem:[%s1045_s2 + $0xb0] sm:$0xf] %v735_v24  ;;  %v737_v28 = vpack.c.bf16 %v785_v27, %v785_v27  ;;  %v434_v29 = vpop.f32.mrb[15].mxu1 }
 0x114   :  { %631 = vst [vmem:[%s1045_s2 + $0x98] sm:$0xf] %v731_v26  ;;  %v733_v30 = vpack.c.bf16 %v434_v29, %v434_v29 }
 0x115   :  { %v310_v17 = vpop.f32.mrb[16].mxu0  ;;  %637 = vst [vmem:[%s1045_s2 + $0xbc] sm:$0xf] %v737_v28 }
 0x116   :  { %v312_v18 = vpop.f32.mrb[17].mxu0  ;;  %633 = vst [vmem:[%s1045_s2 + $0xa4] sm:$0xf] %v733_v30 }
 0x117   :  { %v722_v19 = vpack.c.bf16 %v312_v18, %v310_v17  ;;  %v314_v20 = vpop.f32.mrb[18].mxu0 }
 0x118   :  { %v316_v21 = vpop.f32.mrb[19].mxu0 }
 0x119   :  { %622 = vst [vmem:[%s1045_s2 + $0x60] sm:$0xff] %v722_v19  ;;  %v724_v23 = vpack.c.bf16 %v316_v21, %v314_v20 }
 0x11b   :  { %624 = vst [vmem:[%s1045_s2 + $0x6c] sm:$0xff] %v724_v23 }
 0x11d   :  { %v320_v31 = vpop.f32.mrb[20].mxu0 }
 0x11e   :  { %v322_v32 = vpop.f32.mrb[21].mxu0 }
 0x11f   :  { %v726_v33 = vpack.c.bf16 %v322_v32, %v320_v31  ;;  %v324_v34 = vpop.f32.mrb[22].mxu0 }
 0x120   :  { %v326_v35 = vpop.f32.mrb[23].mxu0 }
 0x121   :  { %626 = vst [vmem:[%s1045_s2 + $0x78] sm:$0xff] %v726_v33  ;;  %v728_v36 = vpack.c.bf16 %v326_v35, %v324_v34 }
 0x123   :  { %628 = vst [vmem:[%s1045_s2 + $0x84] sm:$0xff] %v728_v36 }
 0x125   :  { %v330_v37 = vpop.f32.mrb[24].mxu0 }
 0x126   :  { %v332_v38 = vpop.f32.mrb[25].mxu0 }
 0x127   :  { %v730_v39 = vpack.c.bf16 %v332_v38, %v330_v37  ;;  %v334_v40 = vpop.f32.mrb[26].mxu0 }
 0x128   :  { %v336_v41 = vpop.f32.mrb[27].mxu0 }
 0x129   :  { %630 = vst [vmem:[%s1045_s2 + $0x90] sm:$0xff] %v730_v39  ;;  %v732_v42 = vpack.c.bf16 %v336_v41, %v334_v40 }
 0x12b   :  { %632 = vst [vmem:[%s1045_s2 + $0x9c] sm:$0xff] %v732_v42 }
 0x12d   :  { %v340_v43 = vpop.f32.mrb[28].mxu0 }
 0x12e   :  { %v342_v44 = vpop.f32.mrb[29].mxu0 }
 0x12f   :  { %v734_v45 = vpack.c.bf16 %v342_v44, %v340_v43  ;;  %v344_v46 = vpop.f32.mrb[30].mxu0 }
 0x130   :  { %v346_v47 = vpop.f32.mrb[31].mxu0 }
 0x131   :  { %634 = vst [vmem:[%s1045_s2 + $0xa8] sm:$0xff] %v734_v45  ;;  %v736_v48 = vpack.c.bf16 %v346_v47, %v344_v46 }
 0x133   :  { %636 = vst [vmem:[%s1045_s2 + $0xb4] sm:$0xff] %v736_v48 }

// kernel: gcn_bayes_forward.29
= control target key start
LH: loop header
LB: loop body
LE: loop exit
PB: predicated region body
PF: predicated region fallthrough
CT: control target
= control target key end

     0   :  { %s721_s1 = inlined_call_operand.vmem [shape: bf16[128,128], index: 1, kind: input, shape index: {}]   ;;  %s722_s0 = inlined_call_operand.vmem [shape: bf16[128,128], index: 0, kind: input, shape index: {}]   ;;  %s723_s2 = inlined_call_operand.vmem [shape: f32[1,128], index: 2, kind: input, shape index: {}]   ;;  %s724_s3 = inlined_call_operand.vmem [shape: bf16[128,128], index: 3, kind: output, shape index: {}]  }
   0x1   :  { %v610_v0 = vld [vmem:[%s721_s1] sm:$0xff]   ;;  %v611_v1 = vld [vmem:[%s721_s1 + $0x8] sm:$0xff]   ;;  %v612_v2 = vld [vmem:[%s721_s1 + $0x10] sm:$0xff]  }
   0x2   :  { %562 = vmatprep.subr.bf16.mxu0 %v610_v0  ;;  %594 = vmatprep.subr.bf16.mxu1 %v610_v0  ;;  %v613_v3 = vld [vmem:[%s721_s1 + $0x18] sm:$0xff]   ;;  %v618_v4 = vld [vmem:[%s722_s0] sm:$0xff]   ;;  %v615_v7 = vld [vmem:[%s721_s1 + $0x28] sm:$0xff]  }
   0x3   :  { %563 = vmatpush3.bf16.msra.mxu0 %v610_v0  ;;  %602 = vmatpush3.bf16.msra.mxu1 %v610_v0  ;;  %v619_v5 = vld [vmem:[%s722_s0 + $0x20] sm:$0xff]   ;;  %v616_v8 = vld [vmem:[%s721_s1 + $0x30] sm:$0xff]   ;;  %v617_v9 = vld [vmem:[%s721_s1 + $0x38] sm:$0xff]  }
   0x4   :  { %564 = vmatprep.subr.bf16.mxu0 %v611_v1  ;;  %595 = vmatprep.subr.bf16.mxu1 %v611_v1  ;;  %v614_v6 = vld [vmem:[%s721_s1 + $0x20] sm:$0xff]   ;;  %v620_v10 = vld [vmem:[%s722_s0 + $0x8] sm:$0xff]   ;;  %v622_v12 = vld [vmem:[%s722_s0 + $0x10] sm:$0xff]  }
   0x5   :  { %578 = vmatprep.mubr.bf16.mxu0 %v618_v4  ;;  %586 = vmatprep.mubr.bf16.mxu1 %v619_v5  ;;  %v621_v11 = vld [vmem:[%s722_s0 + $0x28] sm:$0xff]   ;;  %v623_v13 = vld [vmem:[%s722_s0 + $0x30] sm:$0xff]   ;;  %v624_v14 = vld [vmem:[%s722_s0 + $0x18] sm:$0xff]  }
   0x6   :  { %v625_v15 = vld [vmem:[%s722_s0 + $0x38] sm:$0xff]   ;;  %v466_v16 = vld [vmem:[%s723_s2] ss:$0 sm:$0xff] }
   0x7   :  { %565 = vmatpush3.bf16.msra.mxu0 %v611_v1  ;;  %603 = vmatpush3.bf16.msra.mxu1 %v611_v1 }
   0x8   :  { %566 = vmatprep.subr.bf16.mxu0 %v612_v2  ;;  %596 = vmatprep.subr.bf16.mxu1 %v612_v2 }
   0xb   :  { %567 = vmatpush3.bf16.msra.mxu0 %v612_v2  ;;  %604 = vmatpush3.bf16.msra.mxu1 %v612_v2 }
   0xc   :  { %568 = vmatprep.subr.bf16.mxu0 %v613_v3  ;;  %597 = vmatprep.subr.bf16.mxu1 %v613_v3 }
   0xf   :  { %569 = vmatpush3.bf16.msra.mxu0 %v613_v3  ;;  %605 = vmatpush3.bf16.msra.mxu1 %v613_v3 }
  0x10   :  { %570 = vmatprep.subr.bf16.mxu0 %v614_v6  ;;  %598 = vmatprep.subr.bf16.mxu1 %v614_v6 }
  0x13   :  { %571 = vmatpush3.bf16.msra.mxu0 %v614_v6  ;;  %606 = vmatpush3.bf16.msra.mxu1 %v614_v6 }
  0x14   :  { %572 = vmatprep.subr.bf16.mxu0 %v615_v7  ;;  %599 = vmatprep.subr.bf16.mxu1 %v615_v7 }
  0x17   :  { %573 = vmatpush3.bf16.msra.mxu0 %v615_v7  ;;  %607 = vmatpush3.bf16.msra.mxu1 %v615_v7 }
  0x18   :  { %574 = vmatprep.subr.bf16.mxu0 %v616_v8  ;;  %600 = vmatprep.subr.bf16.mxu1 %v616_v8 }
  0x1b   :  { %575 = vmatpush3.bf16.msra.mxu0 %v616_v8  ;;  %608 = vmatpush3.bf16.msra.mxu1 %v616_v8 }
  0x1c   :  { %576 = vmatprep.subr.bf16.mxu0 %v617_v9  ;;  %601 = vmatprep.subr.bf16.mxu1 %v617_v9 }
  0x1f   :  { %577 = vmatpush3.bf16.msra.mxu0 %v617_v9  ;;  %609 = vmatpush3.bf16.msra.mxu1 %v617_v9 }
  0x22   :  { %579 = vmatmul.mubr.bf16.vlgmr.msra.gmra.mrb[0].mxu0 %v620_v10  ;;  %587 = vmatmul.mubr.bf16.vlgmr.msra.gmra.mrb[0].mxu1 %v621_v11 }
  0x23   :  { %582 = vmatprep.mubr.bf16.mxu0 %v622_v12  ;;  %590 = vmatprep.mubr.bf16.mxu1 %v623_v13 }
  0x2a   :  { %583 = vmatmul.mubr.bf16.gmra.mrb[4].mxu0 %v624_v14  ;;  %591 = vmatmul.mubr.bf16.gmra.mrb[4].mxu1 %v625_v15 }
  0xf5   :  { %v580_v17 = vpop.f32.mrb[0].mxu0  ;;  %v588_v18 = vpop.f32.mrb[0].mxu1 }
  0xf6   :  { %v336_v19 = vadd.f32 %v580_v17, %v466_v16  ;;  %v344_v20 = vadd.f32 %v588_v18, %v466_v16  ;;  %v213_v21 = vpop.f32.mrb[1].mxu0  ;;  %v245_v22 = vpop.f32.mrb[1].mxu1 }
  0xf7   :  { %v334_v23 = vadd.f32 %v466_v16, %v213_v21  ;;  %v342_v24 = vadd.f32 %v466_v16, %v245_v22  ;;  %v581_v25 = vpop.f32.mrb[2].mxu0  ;;  %v589_v26 = vpop.f32.mrb[2].mxu1 }
  0xf8   :  { %v337_v27 = vadd.f32 %v581_v25, %v466_v16  ;;  %v345_v28 = vadd.f32 %v589_v26, %v466_v16  ;;  %v216_v29 = vpop.f32.mrb[3].mxu0  ;;  %v248_v30 = vpop.f32.mrb[3].mxu1  ;;  %v352_v33 = vmax.f32 %v336_v19, 0.0  ;;  %v360_v34 = vmax.f32 %v344_v20, 0.0 }
  0xf9   :  { %v335_v31 = vadd.f32 %v466_v16, %v216_v29  ;;  %v343_v32 = vadd.f32 %v466_v16, %v248_v30  ;;  %v350_v37 = vmax.f32 %v334_v23, 0.0  ;;  %v358_v38 = vmax.f32 %v342_v24, 0.0 }
  0xfa   :  { %v353_v35 = vmax.f32 %v337_v27, 0.0  ;;  %v361_v36 = vmax.f32 %v345_v28, 0.0 }
  0xfb   :  { %v351_v39 = vmax.f32 %v335_v31, 0.0  ;;  %v359_v40 = vmax.f32 %v343_v32, 0.0 }
  0xfc   :  { %v507_v41 = vpack.c.bf16 %v353_v35, %v352_v33  ;;  %v527_v42 = vpack.c.bf16 %v361_v36, %v360_v34 }
  0xfd   :  { %v502_v43 = vpack.c.bf16 %v351_v39, %v350_v37  ;;  %v522_v44 = vpack.c.bf16 %v359_v40, %v358_v38  ;;  %v584_v45 = vpop.f32.mrb[4].mxu0  ;;  %v592_v46 = vpop.f32.mrb[4].mxu1 }
  0xfe   :  { %539 = vst [vmem:[%s724_s3 + $0x8] sm:$0xff] %v507_v41   ;;  %543 = vst [vmem:[%s724_s3 + $0x28] sm:$0xff] %v527_v42   ;;  %v340_v47 = vadd.f32 %v584_v45, %v466_v16  ;;  %v348_v48 = vadd.f32 %v592_v46, %v466_v16  ;;  %v229_v49 = vpop.f32.mrb[5].mxu0  ;;  %v261_v50 = vpop.f32.mrb[5].mxu1 }
  0xff   :  { %503 = vst [vmem:[%s724_s3] sm:$0xff] %v502_v43   ;;  %542 = vst [vmem:[%s724_s3 + $0x20] sm:$0xff] %v522_v44   ;;  %v338_v51 = vadd.f32 %v466_v16, %v229_v49  ;;  %v346_v52 = vadd.f32 %v466_v16, %v261_v50  ;;  %v585_v53 = vpop.f32.mrb[6].mxu0  ;;  %v593_v54 = vpop.f32.mrb[6].mxu1 }
 0x100   :  { %v341_v55 = vadd.f32 %v585_v53, %v466_v16  ;;  %v349_v56 = vadd.f32 %v593_v54, %v466_v16  ;;  %v232_v57 = vpop.f32.mrb[7].mxu0  ;;  %v264_v58 = vpop.f32.mrb[7].mxu1  ;;  %v356_v61 = vmax.f32 %v340_v47, 0.0  ;;  %v364_v62 = vmax.f32 %v348_v48, 0.0 }
 0x101   :  { %v339_v59 = vadd.f32 %v466_v16, %v232_v57  ;;  %v347_v60 = vadd.f32 %v466_v16, %v264_v58  ;;  %v354_v1 = vmax.f32 %v338_v51, 0.0  ;;  %v362_v2 = vmax.f32 %v346_v52, 0.0 }
 0x102   :  { %v357_v63 = vmax.f32 %v341_v55, 0.0  ;;  %v365_v0 = vmax.f32 %v349_v56, 0.0 }
 0x103   :  { %v355_v3 = vmax.f32 %v339_v59, 0.0  ;;  %v363_v4 = vmax.f32 %v347_v60, 0.0 }
 0x104   :  { %v517_v5 = vpack.c.bf16 %v357_v63, %v356_v61  ;;  %v537_v6 = vpack.c.bf16 %v365_v0, %v364_v62 }
 0x105   :  { %v512_v7 = vpack.c.bf16 %v355_v3, %v354_v1  ;;  %v532_v8 = vpack.c.bf16 %v363_v4, %v362_v2 }
 0x106   :  { %541 = vst [vmem:[%s724_s3 + $0x18] sm:$0xff] %v517_v5   ;;  %545 = vst [vmem:[%s724_s3 + $0x38] sm:$0xff] %v537_v6  }
 0x107   :  { %540 = vst [vmem:[%s724_s3 + $0x10] sm:$0xff] %v512_v7   ;;  %544 = vst [vmem:[%s724_s3 + $0x30] sm:$0xff] %v532_v8  }

// kernel: gcn_bayes_forward.21
= control target key start
LH: loop header
LB: loop body
LE: loop exit
PB: predicated region body
PF: predicated region fallthrough
CT: control target
= control target key end

     0   :  { %v1190_v1 = vmov 0   ;;  %v698_v33 = vlaneseq  ;;  %s1468_s1 = inlined_call_operand.vmem [shape: bf16[128,384], index: 1, kind: input, shape index: {}]   ;;  %s1469_s0 = inlined_call_operand.vmem [shape: bf16[128,128], index: 0, kind: input, shape index: {}]   ;;  %s1470_s2 = inlined_call_operand.vmem [shape: f32[1,384], index: 2, kind: input, shape index: {}]   ;;  %s1471_s3 = inlined_call_operand.vmem [shape: bf16[128,384], index: 3, kind: output, shape index: {}]  }
   0x1   :  { %v1150_v0 = vld [vmem:[%s1468_s1 + $0x4] ss:$12 sps:$4 sm:$0xff]   ;;  %371 = vmatprep.mubr.bf16.mxu0 %v1190_v1  ;;  %v1152_v2 = vld [vmem:[%s1468_s1] ss:$12 sps:$4 sm:$0xff]   ;;  %v1153_v3 = vld [vmem:[%s1468_s1 + $0x1c] ss:$12 sps:$4 sm:$0xff]  }
   0x2   :  { %339 = vmatprep.subr.bf16.mxu0 %v1150_v0  ;;  %v1155_v4 = vld [vmem:[%s1468_s1 + $0x18] ss:$12 sps:$4 sm:$0xff]   ;;  %v1156_v5 = vld [vmem:[%s1468_s1 + $0x34] ss:$12 sps:$4 sm:$0xff]   ;;  %v1158_v6 = vld [vmem:[%s1468_s1 + $0x30] ss:$12 sps:$4 sm:$0xff]  }
   0x3   :  { %340 = vmatpush1.bf16.msra.mxu0 %v1152_v2  ;;  %v1159_v7 = vld [vmem:[%s1468_s1 + $0x4c] ss:$12 sps:$4 sm:$0xff]   ;;  %v1161_v8 = vld [vmem:[%s1468_s1 + $0x48] ss:$12 sps:$4 sm:$0xff]   ;;  %v1162_v9 = vld [vmem:[%s1468_s1 + $0x64] ss:$12 sps:$4 sm:$0xff]  }
   0x4   :  { %341 = vmatprep.subr.bf16.mxu0 %v1153_v3  ;;  %v1174_v10 = vld [vmem:[%s1468_s1 + $0x8] ss:$12 sps:$4 sm:$0xff]   ;;  %v1175_v11 = vld [vmem:[%s1469_s0] sm:$0xff]   ;;  %v1179_v17 = vld [vmem:[%s1468_s1 + $0x50] ss:$12 sps:$4 sm:$0xff]   ;;  %v699_v34 = vshrl.u32 %v698_v33, 7 }
   0x5   :  { %1117 = vmatprep.subr.bf16.mxu1 %v1174_v10  ;;  %v1176_v12 = vld [vmem:[%s1468_s1 + $0x20] ss:$12 sps:$4 sm:$0xff]   ;;  %1133 = vmatprep.mubr.bf16.mxu1 %v1175_v11  ;;  %v1177_v14 = vld [vmem:[%s1468_s1 + $0x38] ss:$12 sps:$4 sm:$0xff]   ;;  %v1165_v15 = vld [vmem:[%s1468_s1 + $0x7c] ss:$12 sps:$4 sm:$0xff]  }
   0x6   :  { %v1164_v13 = vld [vmem:[%s1468_s1 + $0x60] ss:$12 sps:$4 sm:$0xff]   ;;  %1118 = vmatpush3.bf16.msra.mxu1 %v1174_v10  ;;  %v1167_v16 = vld [vmem:[%s1468_s1 + $0x78] ss:$12 sps:$4 sm:$0xff]   ;;  %v1170_v19 = vld [vmem:[%s1468_s1 + $0x90] ss:$12 sps:$4 sm:$0xff]  }
   0x7   :  { %342 = vmatpush1.bf16.msra.mxu0 %v1155_v4  ;;  %1119 = vmatprep.subr.bf16.mxu1 %v1176_v12  ;;  %v1168_v18 = vld [vmem:[%s1468_s1 + $0x94] ss:$12 sps:$4 sm:$0xff]   ;;  %v1171_v21 = vld [vmem:[%s1468_s1 + $0xac] ss:$12 sps:$4 sm:$0xff]   ;;  %v1185_v25 = vld [vmem:[%s1468_s1 + $0xb0] ss:$12 sps:$4 sm:$0xff]  }
   0x8   :  { %343 = vmatprep.subr.bf16.mxu0 %v1156_v5  ;;  %v1180_v20 = vld [vmem:[%s1468_s1 + $0x68] ss:$12 sps:$4 sm:$0xff]   ;;  %v1182_v23 = vld [vmem:[%s1468_s1 + $0x80] ss:$12 sps:$4 sm:$0xff]   ;;  %v1183_v24 = vld [vmem:[%s1468_s1 + $0x98] ss:$12 sps:$4 sm:$0xff]  }
   0x9   :  { %v1173_v22 = vld [vmem:[%s1468_s1 + $0xa8] ss:$12 sps:$4 sm:$0xff]   ;;  %v1184_v28 = vld [vmem:[%s1469_s0 + $0x18] sm:$0xff]   ;;  %v1186_v29 = vld [vmem:[%s1469_s0 + $0x20] sm:$0xff]   ;;  %v700_v35 = vsub.s32 0, %v699_v34  ;;  %v704_v37 = vsub.s32 1, %v699_v34 }
   0xa   :  { %1120 = vmatpush3.bf16.msra.mxu1 %v1176_v12  ;;  %v1178_v26 = vld [vmem:[%s1469_s0 + $0x8] sm:$0xff]   ;;  %v1181_v27 = vld [vmem:[%s1469_s0 + $0x10] sm:$0xff]   ;;  %v1189_v32 = vld [vmem:[%s1469_s0 + $0x38] sm:$0xff]   ;;  %v708_v50 = vsub.s32 2, %v699_v34 }
   0xb   :  { %344 = vmatpush1.bf16.msra.mxu0 %v1158_v6  ;;  %1121 = vmatprep.subr.bf16.mxu1 %v1177_v14  ;;  %v1187_v30 = vld [vmem:[%s1469_s0 + $0x28] sm:$0xff]   ;;  %v1188_v31 = vld [vmem:[%s1469_s0 + $0x30] sm:$0xff]   ;;  %v696_v36 = vld [vmem:[%s1470_s2] sm:$0x7] }
   0xc   :  { %345 = vmatprep.subr.bf16.mxu0 %v1159_v7  ;;  %v1318_v38 = vrot.slane %v696_v36, %v700_v35  ;;  %v1320_v39 = vrot.slane %v696_v36, %v704_v37  ;;  %v1329_v56 = vrot.slane %v696_v36, %v708_v50 }
   0xe   :  { %1122 = vmatpush3.bf16.msra.mxu1 %v1177_v14 }
   0xf   :  { %346 = vmatpush1.bf16.msra.mxu0 %v1161_v8  ;;  %1123 = vmatprep.subr.bf16.mxu1 %v1179_v17 }
  0x10   :  { %347 = vmatprep.subr.bf16.mxu0 %v1162_v9 }
  0x12   :  { %1124 = vmatpush3.bf16.msra.mxu1 %v1179_v17 }
  0x13   :  { %348 = vmatpush1.bf16.msra.mxu0 %v1164_v13  ;;  %1125 = vmatprep.subr.bf16.mxu1 %v1180_v20 }
  0x14   :  { %349 = vmatprep.subr.bf16.mxu0 %v1165_v15 }
  0x16   :  { %1126 = vmatpush3.bf16.msra.mxu1 %v1180_v20 }
  0x17   :  { %350 = vmatpush1.bf16.msra.mxu0 %v1167_v16  ;;  %1127 = vmatprep.subr.bf16.mxu1 %v1182_v23 }
  0x18   :  { %351 = vmatprep.subr.bf16.mxu0 %v1168_v18 }
  0x1a   :  { %1128 = vmatpush3.bf16.msra.mxu1 %v1182_v23 }
  0x1b   :  { %352 = vmatpush1.bf16.msra.mxu0 %v1170_v19  ;;  %1129 = vmatprep.subr.bf16.mxu1 %v1183_v24 }
  0x1c   :  { %353 = vmatprep.subr.bf16.mxu0 %v1171_v21 }
  0x1e   :  { %1130 = vmatpush3.bf16.msra.mxu1 %v1183_v24 }
  0x1f   :  { %354 = vmatpush1.bf16.msra.mxu0 %v1173_v22  ;;  %1131 = vmatprep.subr.bf16.mxu1 %v1185_v25 }
  0x22   :  { %372 = vmatmul.mubr.bf16.vlgmr.msra.gmra.mrb[0].mxu0 %v1175_v11  ;;  %1132 = vmatpush3.bf16.msra.mxu1 %v1185_v25 }
  0x23   :  { %381 = vmatprep.mubr.bf16.mxu0 %v1190_v1 }
  0x25   :  { %1134 = vmatmul.mubr.bf16.vlgmr.msra.gmra.mrb[0].mxu1 %v1178_v26 }
  0x26   :  { %1137 = vmatprep.mubr.bf16.mxu1 %v1181_v27 }
  0x2a   :  { %382 = vmatmul.mubr.bf16.gmra.mrb[4].mxu0 %v1178_v26 }
  0x2b   :  { %391 = vmatprep.mubr.bf16.mxu0 %v1190_v1 }
  0x2d   :  { %1138 = vmatmul.mubr.bf16.gmra.mrb[4].mxu1 %v1184_v28 }
  0x2e   :  { %1141 = vmatprep.mubr.bf16.mxu1 %v1186_v29 }
  0x32   :  { %392 = vmatmul.mubr.bf16.gmra.mrb[8].mxu0 %v1181_v27 }
  0x33   :  { %401 = vmatprep.mubr.bf16.mxu0 %v1190_v1 }
  0x35   :  { %1142 = vmatmul.mubr.bf16.gmra.mrb[8].mxu1 %v1187_v30 }
  0x36   :  { %1145 = vmatprep.mubr.bf16.mxu1 %v1188_v31 }
  0x3a   :  { %402 = vmatmul.mubr.bf16.gmra.mrb[12].mxu0 %v1184_v28 }
  0x3b   :  { %411 = vmatprep.mubr.bf16.mxu0 %v1190_v1 }
  0x3d   :  { %1146 = vmatmul.mubr.bf16.gmra.mrb[12].mxu1 %v1189_v32 }
  0x42   :  { %412 = vmatmul.mubr.bf16.gmra.mrb[16].mxu0 %v1186_v29 }
  0x43   :  { %421 = vmatprep.mubr.bf16.mxu0 %v1190_v1 }
  0x4a   :  { %422 = vmatmul.mubr.bf16.gmra.mrb[20].mxu0 %v1187_v30 }
  0x4b   :  { %431 = vmatprep.mubr.bf16.mxu0 %v1190_v1 }
  0x52   :  { %432 = vmatmul.mubr.bf16.gmra.mrb[24].mxu0 %v1188_v31 }
  0x53   :  { %441 = vmatprep.mubr.bf16.mxu0 %v1190_v1 }
  0x5a   :  { %442 = vmatmul.mubr.bf16.gmra.mrb[28].mxu0 %v1189_v32 }
  0xf5   :  { %v373_v40 = vpop.f32.mrb[0].mxu0 }
  0xf6   :  { %v713_v41 = vadd.f32 %v1318_v38, %v373_v40  ;;  %v375_v42 = vpop.f32.mrb[1].mxu0 }
  0xf7   :  { %v714_v43 = vadd.f32 %v1320_v39, %v375_v42  ;;  %v377_v44 = vpop.f32.mrb[2].mxu0 }
  0xf8   :  { %v761_v45 = vmax.f32 %v713_v41, 0.0  ;;  %v716_v46 = vadd.f32 %v1318_v38, %v377_v44  ;;  %v379_v47 = vpop.f32.mrb[3].mxu0  ;;  %v1135_v0 = vpop.f32.mrb[0].mxu1 }
  0xf9   :  { %v762_v48 = vmax.f32 %v714_v43, 0.0  ;;  %v717_v49 = vadd.f32 %v1320_v39, %v379_v47  ;;  %v721_v3 = vadd.f32 %v1135_v0, %v1329_v56  ;;  %v486_v4 = vpop.f32.mrb[1].mxu1 }
  0xfa   :  { %v764_v51 = vmax.f32 %v716_v46, 0.0  ;;  %v715_v6 = vadd.f32 %v1329_v56, %v486_v4  ;;  %v1136_v7 = vpop.f32.mrb[2].mxu1 }
  0xfb   :  { %v1069_v52 = vpack.c.bf16 %v762_v48, %v761_v45  ;;  %v765_v53 = vmax.f32 %v717_v49, 0.0  ;;  %v769_v10 = vmax.f32 %v721_v3, 0.0  ;;  %v724_v11 = vadd.f32 %v1136_v7, %v1329_v56  ;;  %v489_v12 = vpop.f32.mrb[3].mxu1 }
  0xfc   :  { %v763_v13 = vmax.f32 %v715_v6, 0.0  ;;  %v718_v14 = vadd.f32 %v1329_v56, %v489_v12 }
  0xfd   :  { %969 = vst [vmem:[%s1471_s3] sm:$0xff] %v1069_v52  ;;  %v1071_v54 = vpack.c.bf16 %v765_v53, %v764_v51  ;;  %v383_v55 = vpop.f32.mrb[4].mxu0  ;;  %v1074_v17 = vpack.c.bf16 %v769_v10, %v769_v10  ;;  %v772_v18 = vmax.f32 %v724_v11, 0.0 }
  0xfe   :  { %v719_v57 = vadd.f32 %v1318_v38, %v383_v55  ;;  %v385_v58 = vpop.f32.mrb[5].mxu0  ;;  %v1070_v21 = vpack.c.bf16 %v763_v13, %v763_v13  ;;  %v766_v22 = vmax.f32 %v718_v14, 0.0 }
  0xff   :  { %971 = vst [vmem:[%s1471_s3 + $0xc] sm:$0xff] %v1071_v54  ;;  %v720_v59 = vadd.f32 %v1320_v39, %v385_v58  ;;  %v387_v60 = vpop.f32.mrb[6].mxu0  ;;  %974 = vst [vmem:[%s1471_s3 + $0x20] sm:$0xf] %v1074_v17  ;;  %v1076_v25 = vpack.c.bf16 %v772_v18, %v772_v18 }
 0x100   :  { %v767_v61 = vmax.f32 %v719_v57, 0.0  ;;  %v722_v62 = vadd.f32 %v1318_v38, %v387_v60  ;;  %v389_v63 = vpop.f32.mrb[7].mxu0  ;;  %970 = vst [vmem:[%s1471_s3 + $0x8] sm:$0xf] %v1070_v21  ;;  %v1072_v29 = vpack.c.bf16 %v766_v22, %v766_v22  ;;  %v1139_v30 = vpop.f32.mrb[4].mxu1 }
 0x101   :  { %v768_v1 = vmax.f32 %v720_v59, 0.0  ;;  %v723_v2 = vadd.f32 %v1320_v39, %v389_v63  ;;  %976 = vst [vmem:[%s1471_s3 + $0x2c] sm:$0xf] %v1076_v25  ;;  %v733_v33 = vadd.f32 %v1139_v30, %v1329_v56  ;;  %v502_v34 = vpop.f32.mrb[5].mxu1 }
 0x102   :  { %v770_v5 = vmax.f32 %v722_v62, 0.0  ;;  %972 = vst [vmem:[%s1471_s3 + $0x14] sm:$0xf] %v1072_v29  ;;  %v727_v36 = vadd.f32 %v1329_v56, %v502_v34  ;;  %v1140_v37 = vpop.f32.mrb[6].mxu1 }
 0x103   :  { %v1073_v8 = vpack.c.bf16 %v768_v1, %v767_v61  ;;  %v771_v9 = vmax.f32 %v723_v2, 0.0  ;;  %v781_v42 = vmax.f32 %v733_v33, 0.0  ;;  %v736_v43 = vadd.f32 %v1140_v37, %v1329_v56  ;;  %v505_v44 = vpop.f32.mrb[7].mxu1 }
 0x104   :  { %v775_v45 = vmax.f32 %v727_v36, 0.0  ;;  %v730_v46 = vadd.f32 %v1329_v56, %v505_v44 }
 0x105   :  { %973 = vst [vmem:[%s1471_s3 + $0x18] sm:$0xff] %v1073_v8  ;;  %v1075_v15 = vpack.c.bf16 %v771_v9, %v770_v5  ;;  %v393_v16 = vpop.f32.mrb[8].mxu0  ;;  %v1082_v49 = vpack.c.bf16 %v781_v42, %v781_v42  ;;  %v784_v50 = vmax.f32 %v736_v43, 0.0 }
 0x106   :  { %v725_v19 = vadd.f32 %v1318_v38, %v393_v16  ;;  %v395_v20 = vpop.f32.mrb[9].mxu0  ;;  %v1078_v53 = vpack.c.bf16 %v775_v45, %v775_v45  ;;  %v778_v54 = vmax.f32 %v730_v46, 0.0 }
 0x107   :  { %975 = vst [vmem:[%s1471_s3 + $0x24] sm:$0xff] %v1075_v15  ;;  %v726_v23 = vadd.f32 %v1320_v39, %v395_v20  ;;  %v397_v24 = vpop.f32.mrb[10].mxu0  ;;  %982 = vst [vmem:[%s1471_s3 + $0x50] sm:$0xf] %v1082_v49  ;;  %v1084_v58 = vpack.c.bf16 %v784_v50, %v784_v50 }
 0x108   :  { %v773_v26 = vmax.f32 %v725_v19, 0.0  ;;  %v728_v27 = vadd.f32 %v1318_v38, %v397_v24  ;;  %v399_v28 = vpop.f32.mrb[11].mxu0  ;;  %978 = vst [vmem:[%s1471_s3 + $0x38] sm:$0xf] %v1078_v53  ;;  %v1080_v62 = vpack.c.bf16 %v778_v54, %v778_v54  ;;  %v1143_v63 = vpop.f32.mrb[8].mxu1 }
 0x109   :  { %v774_v31 = vmax.f32 %v726_v23, 0.0  ;;  %v729_v32 = vadd.f32 %v1320_v39, %v399_v28  ;;  %984 = vst [vmem:[%s1471_s3 + $0x5c] sm:$0xf] %v1084_v58  ;;  %v745_v2 = vadd.f32 %v1143_v63, %v1329_v56  ;;  %v518_v3 = vpop.f32.mrb[9].mxu1 }
 0x10a   :  { %v776_v35 = vmax.f32 %v728_v27, 0.0  ;;  %980 = vst [vmem:[%s1471_s3 + $0x44] sm:$0xf] %v1080_v62  ;;  %v739_v5 = vadd.f32 %v1329_v56, %v518_v3  ;;  %v1144_v6 = vpop.f32.mrb[10].mxu1 }
 0x10b   :  { %v1077_v40 = vpack.c.bf16 %v774_v31, %v773_v26  ;;  %v777_v41 = vmax.f32 %v729_v32, 0.0  ;;  %v793_v9 = vmax.f32 %v745_v2, 0.0  ;;  %v748_v10 = vadd.f32 %v1144_v6, %v1329_v56  ;;  %v521_v11 = vpop.f32.mrb[11].mxu1 }
 0x10c   :  { %v787_v12 = vmax.f32 %v739_v5, 0.0  ;;  %v742_v13 = vadd.f32 %v1329_v56, %v521_v11 }
 0x10d   :  { %977 = vst [vmem:[%s1471_s3 + $0x30] sm:$0xff] %v1077_v40  ;;  %v1079_v47 = vpack.c.bf16 %v777_v41, %v776_v35  ;;  %v403_v48 = vpop.f32.mrb[12].mxu0  ;;  %v1090_v16 = vpack.c.bf16 %v793_v9, %v793_v9  ;;  %v796_v17 = vmax.f32 %v748_v10, 0.0 }
 0x10e   :  { %v731_v51 = vadd.f32 %v1318_v38, %v403_v48  ;;  %v405_v52 = vpop.f32.mrb[13].mxu0  ;;  %v1086_v20 = vpack.c.bf16 %v787_v12, %v787_v12  ;;  %v790_v21 = vmax.f32 %v742_v13, 0.0 }
 0x10f   :  { %979 = vst [vmem:[%s1471_s3 + $0x3c] sm:$0xff] %v1079_v47  ;;  %v732_v55 = vadd.f32 %v1320_v39, %v405_v52  ;;  %v407_v57 = vpop.f32.mrb[14].mxu0  ;;  %990 = vst [vmem:[%s1471_s3 + $0x80] sm:$0xf] %v1090_v16  ;;  %v1092_v24 = vpack.c.bf16 %v796_v17, %v796_v17 }
 0x110   :  { %v779_v59 = vmax.f32 %v731_v51, 0.0  ;;  %v734_v60 = vadd.f32 %v1318_v38, %v407_v57  ;;  %v409_v61 = vpop.f32.mrb[15].mxu0  ;;  %986 = vst [vmem:[%s1471_s3 + $0x68] sm:$0xf] %v1086_v20  ;;  %v1088_v28 = vpack.c.bf16 %v790_v21, %v790_v21  ;;  %v1147_v29 = vpop.f32.mrb[12].mxu1 }
 0x111   :  { %v780_v0 = vmax.f32 %v732_v55, 0.0  ;;  %v735_v1 = vadd.f32 %v1320_v39, %v409_v61  ;;  %992 = vst [vmem:[%s1471_s3 + $0x8c] sm:$0xf] %v1092_v24  ;;  %v757_v32 = vadd.f32 %v1147_v29, %v1329_v56  ;;  %v534_v33 = vpop.f32.mrb[13].mxu1 }
 0x112   :  { %v782_v4 = vmax.f32 %v734_v60, 0.0  ;;  %988 = vst [vmem:[%s1471_s3 + $0x74] sm:$0xf] %v1088_v28  ;;  %v751_v35 = vadd.f32 %v1329_v56, %v534_v33  ;;  %v1148_v36 = vpop.f32.mrb[14].mxu1 }
 0x113   :  { %v1081_v7 = vpack.c.bf16 %v780_v0, %v779_v59  ;;  %v783_v8 = vmax.f32 %v735_v1, 0.0  ;;  %v805_v41 = vmax.f32 %v757_v32, 0.0  ;;  %v760_v42 = vadd.f32 %v1148_v36, %v1329_v56  ;;  %v537_v43 = vpop.f32.mrb[15].mxu1 }
 0x114   :  { %v799_v44 = vmax.f32 %v751_v35, 0.0  ;;  %v754_v45 = vadd.f32 %v1329_v56, %v537_v43 }
 0x115   :  { %981 = vst [vmem:[%s1471_s3 + $0x48] sm:$0xff] %v1081_v7  ;;  %v1083_v14 = vpack.c.bf16 %v783_v8, %v782_v4  ;;  %v413_v15 = vpop.f32.mrb[16].mxu0  ;;  %v1098_v48 = vpack.c.bf16 %v805_v41, %v805_v41  ;;  %v808_v49 = vmax.f32 %v760_v42, 0.0 }
 0x116   :  { %v737_v18 = vadd.f32 %v1318_v38, %v413_v15  ;;  %v415_v19 = vpop.f32.mrb[17].mxu0  ;;  %v1094_v52 = vpack.c.bf16 %v799_v44, %v799_v44  ;;  %v802_v53 = vmax.f32 %v754_v45, 0.0 }
 0x117   :  { %983 = vst [vmem:[%s1471_s3 + $0x54] sm:$0xff] %v1083_v14  ;;  %v738_v22 = vadd.f32 %v1320_v39, %v415_v19  ;;  %v417_v23 = vpop.f32.mrb[18].mxu0  ;;  %998 = vst [vmem:[%s1471_s3 + $0xb0] sm:$0xf] %v1098_v48  ;;  %v1100_v55 = vpack.c.bf16 %v808_v49, %v808_v49 }
 0x118   :  { %v785_v25 = vmax.f32 %v737_v18, 0.0  ;;  %v740_v26 = vadd.f32 %v1318_v38, %v417_v23  ;;  %v419_v27 = vpop.f32.mrb[19].mxu0  ;;  %994 = vst [vmem:[%s1471_s3 + $0x98] sm:$0xf] %v1094_v52  ;;  %v1096_v60 = vpack.c.bf16 %v802_v53, %v802_v53 }
 0x119   :  { %v786_v30 = vmax.f32 %v738_v22, 0.0  ;;  %v741_v31 = vadd.f32 %v1320_v39, %v419_v27  ;;  %1000 = vst [vmem:[%s1471_s3 + $0xbc] sm:$0xf] %v1100_v55 }
 0x11a   :  { %v788_v34 = vmax.f32 %v740_v26, 0.0  ;;  %996 = vst [vmem:[%s1471_s3 + $0xa4] sm:$0xf] %v1096_v60 }
 0x11b   :  { %v1085_v37 = vpack.c.bf16 %v786_v30, %v785_v25  ;;  %v789_v40 = vmax.f32 %v741_v31, 0.0 }
 0x11d   :  { %985 = vst [vmem:[%s1471_s3 + $0x60] sm:$0xff] %v1085_v37  ;;  %v1087_v46 = vpack.c.bf16 %v789_v40, %v788_v34  ;;  %v423_v47 = vpop.f32.mrb[20].mxu0 }
 0x11e   :  { %v743_v50 = vadd.f32 %v1318_v38, %v423_v47  ;;  %v425_v51 = vpop.f32.mrb[21].mxu0 }
 0x11f   :  { %987 = vst [vmem:[%s1471_s3 + $0x6c] sm:$0xff] %v1087_v46  ;;  %v744_v54 = vadd.f32 %v1320_v39, %v425_v51  ;;  %v427_v56 = vpop.f32.mrb[22].mxu0 }
 0x120   :  { %v791_v57 = vmax.f32 %v743_v50, 0.0  ;;  %v746_v58 = vadd.f32 %v1318_v38, %v427_v56  ;;  %v429_v59 = vpop.f32.mrb[23].mxu0 }
 0x121   :  { %v792_v61 = vmax.f32 %v744_v54, 0.0  ;;  %v747_v62 = vadd.f32 %v1320_v39, %v429_v59 }
 0x122   :  { %v794_v63 = vmax.f32 %v746_v58, 0.0 }
 0x123   :  { %v1089_v0 = vpack.c.bf16 %v792_v61, %v791_v57  ;;  %v795_v1 = vmax.f32 %v747_v62, 0.0 }
 0x125   :  { %989 = vst [vmem:[%s1471_s3 + $0x78] sm:$0xff] %v1089_v0  ;;  %v1091_v2 = vpack.c.bf16 %v795_v1, %v794_v63  ;;  %v433_v3 = vpop.f32.mrb[24].mxu0 }
 0x126   :  { %v749_v4 = vadd.f32 %v1318_v38, %v433_v3  ;;  %v435_v5 = vpop.f32.mrb[25].mxu0 }
 0x127   :  { %991 = vst [vmem:[%s1471_s3 + $0x84] sm:$0xff] %v1091_v2  ;;  %v750_v6 = vadd.f32 %v1320_v39, %v435_v5  ;;  %v437_v7 = vpop.f32.mrb[26].mxu0 }
 0x128   :  { %v797_v8 = vmax.f32 %v749_v4, 0.0  ;;  %v752_v9 = vadd.f32 %v1318_v38, %v437_v7  ;;  %v439_v10 = vpop.f32.mrb[27].mxu0 }
 0x129   :  { %v798_v11 = vmax.f32 %v750_v6, 0.0  ;;  %v753_v12 = vadd.f32 %v1320_v39, %v439_v10 }
 0x12a   :  { %v800_v13 = vmax.f32 %v752_v9, 0.0 }
 0x12b   :  { %v1093_v14 = vpack.c.bf16 %v798_v11, %v797_v8  ;;  %v801_v15 = vmax.f32 %v753_v12, 0.0 }
 0x12d   :  { %993 = vst [vmem:[%s1471_s3 + $0x90] sm:$0xff] %v1093_v14  ;;  %v1095_v16 = vpack.c.bf16 %v801_v15, %v800_v13  ;;  %v443_v17 = vpop.f32.mrb[28].mxu0 }
 0x12e   :  { %v755_v18 = vadd.f32 %v1318_v38, %v443_v17  ;;  %v445_v19 = vpop.f32.mrb[29].mxu0 }
 0x12f   :  { %995 = vst [vmem:[%s1471_s3 + $0x9c] sm:$0xff] %v1095_v16  ;;  %v756_v20 = vadd.f32 %v1320_v39, %v445_v19  ;;  %v447_v21 = vpop.f32.mrb[30].mxu0 }
 0x130   :  { %v803_v22 = vmax.f32 %v755_v18, 0.0  ;;  %v758_v23 = vadd.f32 %v1318_v38, %v447_v21  ;;  %v449_v24 = vpop.f32.mrb[31].mxu0 }
 0x131   :  { %v804_v25 = vmax.f32 %v756_v20, 0.0  ;;  %v759_v26 = vadd.f32 %v1320_v39, %v449_v24 }
 0x132   :  { %v806_v27 = vmax.f32 %v758_v23, 0.0 }
 0x133   :  { %v1097_v28 = vpack.c.bf16 %v804_v25, %v803_v22  ;;  %v807_v29 = vmax.f32 %v759_v26, 0.0 }
 0x135   :  { %997 = vst [vmem:[%s1471_s3 + $0xa8] sm:$0xff] %v1097_v28  ;;  %v1099_v30 = vpack.c.bf16 %v807_v29, %v806_v27 }
 0x137   :  { %999 = vst [vmem:[%s1471_s3 + $0xb4] sm:$0xff] %v1099_v30 }

// kernel: gcn_bayes_forward.28
= control target key start
LH: loop header
LB: loop body
LE: loop exit
PB: predicated region body
PF: predicated region fallthrough
CT: control target
= control target key end

     0   :  { %s1120_s1 = inlined_call_operand.vmem [shape: bf16[384,128], index: 1, kind: input, shape index: {}]   ;;  %s1121_s0 = inlined_call_operand.vmem [shape: bf16[128,384], index: 0, kind: input, shape index: {}]   ;;  %s1122_s2 = inlined_call_operand.vmem [shape: bf16[128,128], index: 2, kind: output, shape index: {}]  }
   0x1   :  { %v881_v0 = vld [vmem:[%s1120_s1 + $0x40] sm:$0xff]   ;;  %v884_v3 = vld [vmem:[%s1120_s1 + $0x48] sm:$0xff]   ;;  %v887_v6 = vld [vmem:[%s1120_s1 + $0x50] sm:$0xff]  }
   0x2   :  { %v882_v1 = vld [vmem:[%s1120_s1] sm:$0xff]   ;;  %769 = vmatprep.subr.bf16.mxu0 %v881_v0  ;;  %v885_v4 = vld [vmem:[%s1120_s1 + $0x8] sm:$0xff]   ;;  %v888_v7 = vld [vmem:[%s1120_s1 + $0x10] sm:$0xff]  }
   0x3   :  { %v883_v2 = vld [vmem:[%s1120_s1 + $0x80] sm:$0xff]   ;;  %770 = vmatpush3.bf16.msra.mxu0 %v882_v1  ;;  %v886_v5 = vld [vmem:[%s1120_s1 + $0x88] sm:$0xff]   ;;  %v889_v8 = vld [vmem:[%s1120_s1 + $0x90] sm:$0xff]  }
   0x4   :  { %849 = vmatprep.subr.bf16.mxu1 %v883_v2  ;;  %771 = vmatprep.subr.bf16.mxu0 %v884_v3  ;;  %v890_v9 = vld [vmem:[%s1120_s1 + $0x58] sm:$0xff]   ;;  %v893_v12 = vld [vmem:[%s1120_s1 + $0x60] sm:$0xff]   ;;  %v896_v15 = vld [vmem:[%s1120_s1 + $0x68] sm:$0xff]  }
   0x5   :  { %850 = vmatpush3.bf16.msra.mxu1 %v883_v2  ;;  %v891_v10 = vld [vmem:[%s1120_s1 + $0x18] sm:$0xff]   ;;  %v895_v13 = vld [vmem:[%s1120_s1 + $0xa0] sm:$0xff]   ;;  %v898_v16 = vld [vmem:[%s1120_s1 + $0xa8] sm:$0xff]  }
   0x6   :  { %851 = vmatprep.subr.bf16.mxu1 %v886_v5  ;;  %v892_v11 = vld [vmem:[%s1120_s1 + $0x98] sm:$0xff]   ;;  %v894_v14 = vld [vmem:[%s1120_s1 + $0x20] sm:$0xff]   ;;  %v897_v17 = vld [vmem:[%s1120_s1 + $0x28] sm:$0xff]  }
   0x7   :  { %772 = vmatpush3.bf16.msra.mxu0 %v885_v4  ;;  %v899_v18 = vld [vmem:[%s1120_s1 + $0x70] sm:$0xff]   ;;  %v902_v21 = vld [vmem:[%s1120_s1 + $0x78] sm:$0xff]   ;;  %v905_v26 = vld [vmem:[%s1121_s0] ss:$12 sps:$4 sm:$0xff]  }
   0x8   :  { %773 = vmatprep.subr.bf16.mxu0 %v887_v6  ;;  %v900_v19 = vld [vmem:[%s1120_s1 + $0x30] sm:$0xff]   ;;  %v904_v22 = vld [vmem:[%s1120_s1 + $0xb8] sm:$0xff]   ;;  %v909_v28 = vld [vmem:[%s1121_s0 + $0x20] ss:$12 sps:$4 sm:$0xff]  }
   0x9   :  { %852 = vmatpush3.bf16.msra.mxu1 %v886_v5  ;;  %v901_v20 = vld [vmem:[%s1120_s1 + $0xb0] sm:$0xff]   ;;  %v903_v25 = vld [vmem:[%s1120_s1 + $0x38] sm:$0xff]   ;;  %v925_v36 = vld [vmem:[%s1121_s0 + $0x80] ss:$12 sps:$4 sm:$0xff]  }
   0xa   :  { %853 = vmatprep.subr.bf16.mxu1 %v889_v8  ;;  %v907_v23 = vld [vmem:[%s1121_s0 + $0x4] ss:$12 sps:$4 sm:$0xff]   ;;  %v908_v24 = vld [vmem:[%s1121_s0 + $0x8] ss:$12 sps:$4 sm:$0xff]   ;;  %v918_v35 = vld [vmem:[%s1121_s0 + $0x4c] ss:$12 sps:$4 sm:$0xff]  }
   0xb   :  { %774 = vmatpush3.bf16.msra.mxu0 %v888_v7  ;;  %396 = vmatprep.mubr.bf16.mxu0 %v907_v23  ;;  %v910_v27 = vld [vmem:[%s1121_s0 + $0x1c] ss:$12 sps:$4 sm:$0xff]   ;;  %v916_v29 = vld [vmem:[%s1121_s0 + $0x38] ss:$12 sps:$4 sm:$0xff]   ;;  %v913_v31 = vld [vmem:[%s1121_s0 + $0x34] ss:$12 sps:$4 sm:$0xff]  }
   0xc   :  { %775 = vmatprep.subr.bf16.mxu0 %v890_v9  ;;  %865 = vmatprep.mubr.bf16.mxu1 %v908_v24  ;;  %v912_v30 = vld [vmem:[%s1121_s0 + $0x18] ss:$12 sps:$4 sm:$0xff]   ;;  %v917_v32 = vld [vmem:[%s1121_s0 + $0x50] ss:$12 sps:$4 sm:$0xff]   ;;  %v924_v33 = vld [vmem:[%s1121_s0 + $0x68] ss:$12 sps:$4 sm:$0xff]  }
   0xd   :  { %854 = vmatpush3.bf16.msra.mxu1 %v889_v8  ;;  %v915_v34 = vld [vmem:[%s1121_s0 + $0x30] ss:$12 sps:$4 sm:$0xff]   ;;  %v932_v37 = vld [vmem:[%s1121_s0 + $0x98] ss:$12 sps:$4 sm:$0xff]   ;;  %v920_v38 = vld [vmem:[%s1121_s0 + $0x48] ss:$12 sps:$4 sm:$0xff]  }
   0xe   :  { %855 = vmatprep.subr.bf16.mxu1 %v892_v11  ;;  %v921_v39 = vld [vmem:[%s1121_s0 + $0x64] ss:$12 sps:$4 sm:$0xff]   ;;  %v923_v41 = vld [vmem:[%s1121_s0 + $0x60] ss:$12 sps:$4 sm:$0xff]   ;;  %v926_v42 = vld [vmem:[%s1121_s0 + $0x7c] ss:$12 sps:$4 sm:$0xff]  }
   0xf   :  { %776 = vmatpush3.bf16.msra.mxu0 %v891_v10  ;;  %v933_v40 = vld [vmem:[%s1121_s0 + $0xb0] ss:$12 sps:$4 sm:$0xff]   ;;  %v928_v43 = vld [vmem:[%s1121_s0 + $0x78] ss:$12 sps:$4 sm:$0xff]   ;;  %v929_v44 = vld [vmem:[%s1121_s0 + $0x94] ss:$12 sps:$4 sm:$0xff]  }
  0x10   :  { %777 = vmatprep.subr.bf16.mxu0 %v893_v12  ;;  %v931_v45 = vld [vmem:[%s1121_s0 + $0x90] ss:$12 sps:$4 sm:$0xff]   ;;  %v934_v46 = vld [vmem:[%s1121_s0 + $0xac] ss:$12 sps:$4 sm:$0xff]   ;;  %v936_v47 = vld [vmem:[%s1121_s0 + $0xa8] ss:$12 sps:$4 sm:$0xff]  }
  0x11   :  { %856 = vmatpush3.bf16.msra.mxu1 %v892_v11 }
  0x12   :  { %857 = vmatprep.subr.bf16.mxu1 %v895_v13 }
  0x13   :  { %778 = vmatpush3.bf16.msra.mxu0 %v894_v14 }
  0x14   :  { %779 = vmatprep.subr.bf16.mxu0 %v896_v15 }
  0x15   :  { %858 = vmatpush3.bf16.msra.mxu1 %v895_v13 }
  0x16   :  { %859 = vmatprep.subr.bf16.mxu1 %v898_v16 }
  0x17   :  { %780 = vmatpush3.bf16.msra.mxu0 %v897_v17 }
  0x18   :  { %781 = vmatprep.subr.bf16.mxu0 %v899_v18 }
  0x19   :  { %860 = vmatpush3.bf16.msra.mxu1 %v898_v16 }
  0x1a   :  { %861 = vmatprep.subr.bf16.mxu1 %v901_v20 }
  0x1b   :  { %782 = vmatpush3.bf16.msra.mxu0 %v900_v19 }
  0x1c   :  { %783 = vmatprep.subr.bf16.mxu0 %v902_v21 }
  0x1d   :  { %862 = vmatpush3.bf16.msra.mxu1 %v901_v20 }
  0x1e   :  { %863 = vmatprep.subr.bf16.mxu1 %v904_v22 }
  0x1f   :  { %784 = vmatpush3.bf16.msra.mxu0 %v903_v25 }
  0x21   :  { %864 = vmatpush3.bf16.msra.mxu1 %v904_v22 }
  0x22   :  { %397 = vmatmul.mubr.bf16.vlgmr.msra.gmra.mrb[0].mxu0 %v905_v26 }
  0x23   :  { %404 = vmatprep.mubr.bf16.mxu0 %v910_v27 }
  0x24   :  { %866 = vmatmul.mubr.bf16.vlgmr.msra.gmra.mrb[0].mxu1 %v909_v28 }
  0x25   :  { %869 = vmatprep.mubr.bf16.mxu1 %v916_v29 }
  0x2a   :  { %405 = vmatmul.mubr.bf16.gmra.mrb[4].mxu0 %v912_v30 }
  0x2b   :  { %412 = vmatprep.mubr.bf16.mxu0 %v913_v31 }
  0x2c   :  { %870 = vmatmul.mubr.bf16.gmra.mrb[4].mxu1 %v917_v32 }
  0x2d   :  { %873 = vmatprep.mubr.bf16.mxu1 %v924_v33 }
  0x32   :  { %413 = vmatmul.mubr.bf16.gmra.mrb[8].mxu0 %v915_v34 }
  0x33   :  { %420 = vmatprep.mubr.bf16.mxu0 %v918_v35 }
  0x34   :  { %874 = vmatmul.mubr.bf16.gmra.mrb[8].mxu1 %v925_v36 }
  0x35   :  { %877 = vmatprep.mubr.bf16.mxu1 %v932_v37 }
  0x3a   :  { %421 = vmatmul.mubr.bf16.gmra.mrb[12].mxu0 %v920_v38 }
  0x3b   :  { %428 = vmatprep.mubr.bf16.mxu0 %v921_v39 }
  0x3c   :  { %878 = vmatmul.mubr.bf16.gmra.mrb[12].mxu1 %v933_v40 }
  0x42   :  { %429 = vmatmul.mubr.bf16.gmra.mrb[16].mxu0 %v923_v41 }
  0x43   :  { %436 = vmatprep.mubr.bf16.mxu0 %v926_v42 }
  0x4a   :  { %437 = vmatmul.mubr.bf16.gmra.mrb[20].mxu0 %v928_v43 }
  0x4b   :  { %444 = vmatprep.mubr.bf16.mxu0 %v929_v44 }
  0x52   :  { %445 = vmatmul.mubr.bf16.gmra.mrb[24].mxu0 %v931_v45 }
  0x53   :  { %452 = vmatprep.mubr.bf16.mxu0 %v934_v46 }
  0x5a   :  { %453 = vmatmul.mubr.bf16.gmra.mrb[28].mxu0 %v936_v47 }
  0xf5   :  { %v785_v48 = vpop.f32.mrb[0].mxu0 }
  0xf6   :  { %v786_v49 = vpop.f32.mrb[1].mxu0 }
  0xf7   :  { %v787_v50 = vadd.f32 %v786_v49, %v785_v48  ;;  %v788_v51 = vpop.f32.mrb[2].mxu0  ;;  %v867_v52 = vpop.f32.mrb[0].mxu1 }
  0xf8   :  { %v789_v53 = vpop.f32.mrb[3].mxu0  ;;  %v495_v54 = vpop.f32.mrb[1].mxu1 }
  0xf9   :  { %v790_v55 = vadd.f32 %v789_v53, %v788_v51  ;;  %v496_v56 = vadd.f32 %v787_v50, %v495_v54  ;;  %v868_v57 = vpop.f32.mrb[2].mxu1 }
  0xfa   :  { %v498_v58 = vpop.f32.mrb[3].mxu1 }
  0xfb   :  { %v499_v59 = vadd.f32 %v790_v55, %v498_v58 }
  0xfd   :  { %v725_v60 = vpack.c.bf16 %v499_v59, %v496_v56  ;;  %v791_v61 = vpop.f32.mrb[4].mxu0 }
  0xfe   :  { %v792_v62 = vpop.f32.mrb[5].mxu0 }
  0xff   :  { %726 = vst [vmem:[%s1122_s2] sm:$0xff] %v725_v60   ;;  %v793_v63 = vadd.f32 %v792_v62, %v791_v61  ;;  %v794_v0 = vpop.f32.mrb[6].mxu0  ;;  %v871_v1 = vpop.f32.mrb[4].mxu1 }
 0x100   :  { %v795_v2 = vpop.f32.mrb[7].mxu0  ;;  %v511_v3 = vpop.f32.mrb[5].mxu1 }
 0x101   :  { %v504_v4 = vadd.f32 %v867_v52, %v793_v63  ;;  %v796_v5 = vadd.f32 %v795_v2, %v794_v0  ;;  %v872_v6 = vpop.f32.mrb[6].mxu1 }
 0x102   :  { %v514_v7 = vpop.f32.mrb[7].mxu1 }
 0x103   :  { %v507_v8 = vadd.f32 %v868_v57, %v796_v5 }
 0x105   :  { %v730_v9 = vpack.c.bf16 %v507_v8, %v504_v4  ;;  %v797_v10 = vpop.f32.mrb[8].mxu0 }
 0x106   :  { %v798_v11 = vpop.f32.mrb[9].mxu0 }
 0x107   :  { %762 = vst [vmem:[%s1122_s2 + $0x8] sm:$0xff] %v730_v9   ;;  %v799_v12 = vadd.f32 %v798_v11, %v797_v10  ;;  %v800_v13 = vpop.f32.mrb[10].mxu0  ;;  %v875_v14 = vpop.f32.mrb[8].mxu1 }
 0x108   :  { %v801_v15 = vpop.f32.mrb[11].mxu0  ;;  %v527_v16 = vpop.f32.mrb[9].mxu1 }
 0x109   :  { %v802_v17 = vadd.f32 %v801_v15, %v800_v13  ;;  %v512_v18 = vadd.f32 %v799_v12, %v511_v3  ;;  %v876_v19 = vpop.f32.mrb[10].mxu1 }
 0x10a   :  { %v530_v20 = vpop.f32.mrb[11].mxu1 }
 0x10b   :  { %v515_v21 = vadd.f32 %v802_v17, %v514_v7 }
 0x10d   :  { %v735_v22 = vpack.c.bf16 %v515_v21, %v512_v18  ;;  %v803_v23 = vpop.f32.mrb[12].mxu0 }
 0x10e   :  { %v804_v24 = vpop.f32.mrb[13].mxu0 }
 0x10f   :  { %763 = vst [vmem:[%s1122_s2 + $0x10] sm:$0xff] %v735_v22   ;;  %v805_v25 = vadd.f32 %v804_v24, %v803_v23  ;;  %v806_v26 = vpop.f32.mrb[14].mxu0  ;;  %v879_v27 = vpop.f32.mrb[12].mxu1 }
 0x110   :  { %v807_v28 = vpop.f32.mrb[15].mxu0  ;;  %v543_v29 = vpop.f32.mrb[13].mxu1 }
 0x111   :  { %v520_v30 = vadd.f32 %v871_v1, %v805_v25  ;;  %v808_v31 = vadd.f32 %v807_v28, %v806_v26  ;;  %v880_v32 = vpop.f32.mrb[14].mxu1 }
 0x112   :  { %v546_v33 = vpop.f32.mrb[15].mxu1 }
 0x113   :  { %v523_v34 = vadd.f32 %v872_v6, %v808_v31 }
 0x115   :  { %v740_v35 = vpack.c.bf16 %v523_v34, %v520_v30  ;;  %v809_v36 = vpop.f32.mrb[16].mxu0 }
 0x116   :  { %v810_v37 = vpop.f32.mrb[17].mxu0 }
 0x117   :  { %764 = vst [vmem:[%s1122_s2 + $0x18] sm:$0xff] %v740_v35   ;;  %v811_v38 = vadd.f32 %v810_v37, %v809_v36  ;;  %v812_v39 = vpop.f32.mrb[18].mxu0 }
 0x118   :  { %v813_v40 = vpop.f32.mrb[19].mxu0 }
 0x119   :  { %v814_v41 = vadd.f32 %v813_v40, %v812_v39  ;;  %v528_v42 = vadd.f32 %v811_v38, %v527_v16 }
 0x11b   :  { %v531_v43 = vadd.f32 %v814_v41, %v530_v20 }
 0x11d   :  { %v745_v44 = vpack.c.bf16 %v531_v43, %v528_v42  ;;  %v815_v45 = vpop.f32.mrb[20].mxu0 }
 0x11e   :  { %v816_v46 = vpop.f32.mrb[21].mxu0 }
 0x11f   :  { %765 = vst [vmem:[%s1122_s2 + $0x20] sm:$0xff] %v745_v44   ;;  %v817_v47 = vadd.f32 %v816_v46, %v815_v45  ;;  %v818_v48 = vpop.f32.mrb[22].mxu0 }
 0x120   :  { %v819_v49 = vpop.f32.mrb[23].mxu0 }
 0x121   :  { %v536_v50 = vadd.f32 %v875_v14, %v817_v47  ;;  %v820_v51 = vadd.f32 %v819_v49, %v818_v48 }
 0x123   :  { %v539_v52 = vadd.f32 %v876_v19, %v820_v51 }
 0x125   :  { %v750_v53 = vpack.c.bf16 %v539_v52, %v536_v50  ;;  %v821_v54 = vpop.f32.mrb[24].mxu0 }
 0x126   :  { %v822_v55 = vpop.f32.mrb[25].mxu0 }
 0x127   :  { %766 = vst [vmem:[%s1122_s2 + $0x28] sm:$0xff] %v750_v53   ;;  %v823_v56 = vadd.f32 %v822_v55, %v821_v54  ;;  %v824_v57 = vpop.f32.mrb[26].mxu0 }
 0x128   :  { %v825_v58 = vpop.f32.mrb[27].mxu0 }
 0x129   :  { %v826_v59 = vadd.f32 %v825_v58, %v824_v57  ;;  %v544_v60 = vadd.f32 %v823_v56, %v543_v29 }
 0x12b   :  { %v547_v61 = vadd.f32 %v826_v59, %v546_v33 }
 0x12d   :  { %v755_v62 = vpack.c.bf16 %v547_v61, %v544_v60  ;;  %v827_v63 = vpop.f32.mrb[28].mxu0 }
 0x12e   :  { %v828_v0 = vpop.f32.mrb[29].mxu0 }
 0x12f   :  { %767 = vst [vmem:[%s1122_s2 + $0x30] sm:$0xff] %v755_v62   ;;  %v829_v1 = vadd.f32 %v828_v0, %v827_v63  ;;  %v830_v2 = vpop.f32.mrb[30].mxu0 }
 0x130   :  { %v831_v3 = vpop.f32.mrb[31].mxu0 }
 0x131   :  { %v552_v4 = vadd.f32 %v879_v27, %v829_v1  ;;  %v832_v5 = vadd.f32 %v831_v3, %v830_v2 }
 0x133   :  { %v555_v6 = vadd.f32 %v880_v32, %v832_v5 }
 0x135   :  { %v760_v7 = vpack.c.bf16 %v555_v6, %v552_v4 }
 0x137   :  { %768 = vst [vmem:[%s1122_s2 + $0x38] sm:$0xff] %v760_v7  }

// kernel: gcn_bayes_forward.22
= control target key start
LH: loop header
LB: loop body
LE: loop exit
PB: predicated region body
PF: predicated region fallthrough
CT: control target
= control target key end

     0   :  { %v1717_v1 = vmov 0   ;;  %s2280_s1 = inlined_call_operand.vmem [shape: bf16[384,384], index: 1, kind: input, shape index: {}]   ;;  %s2281_s0 = inlined_call_operand.vmem [shape: bf16[128,384], index: 0, kind: input, shape index: {}]   ;;  %s2282_s2 = inlined_call_operand.vmem [shape: bf16[128,384], index: 2, kind: output, shape index: {}]  }
   0x1   :  { %v1589_v0 = vld [vmem:[%s2280_s1 + $0x4] ss:$12 sps:$4 sm:$0xff]   ;;  %837 = vmatprep.mubr.bf16.mxu1 %v1717_v1  ;;  %v1593_v3 = vld [vmem:[%s2280_s1] ss:$12 sps:$4 sm:$0xff]   ;;  %v1595_v5 = vld [vmem:[%s2280_s1 + $0x1c] ss:$12 sps:$4 sm:$0xff]  }
   0x2   :  { %v1740_v2 = vld [vmem:[%s2280_s1 + $0x184] ss:$12 sps:$4 sm:$0xff]   ;;  %652 = vmatprep.subr.bf16.mxu0 %v1589_v0  ;;  %v1748_v4 = vld [vmem:[%s2280_s1 + $0x180] ss:$12 sps:$4 sm:$0xff]   ;;  %v1758_v6 = vld [vmem:[%s2280_s1 + $0x19c] ss:$12 sps:$4 sm:$0xff]  }
   0x3   :  { %1540 = vmatprep.subr.bf16.mxu1 %v1740_v2  ;;  %653 = vmatpush1.bf16.msra.mxu0 %v1593_v3  ;;  %v1599_v7 = vld [vmem:[%s2280_s1 + $0x18] ss:$12 sps:$4 sm:$0xff]   ;;  %v1601_v9 = vld [vmem:[%s2280_s1 + $0x34] ss:$12 sps:$4 sm:$0xff]   ;;  %v1605_v11 = vld [vmem:[%s2280_s1 + $0x30] ss:$12 sps:$4 sm:$0xff]  }
   0x4   :  { %1548 = vmatpush1.bf16.msra.mxu1 %v1748_v4  ;;  %654 = vmatprep.subr.bf16.mxu0 %v1595_v5  ;;  %v1766_v8 = vld [vmem:[%s2280_s1 + $0x198] ss:$12 sps:$4 sm:$0xff]   ;;  %v1775_v10 = vld [vmem:[%s2280_s1 + $0x1b4] ss:$12 sps:$4 sm:$0xff]   ;;  %v1783_v12 = vld [vmem:[%s2280_s1 + $0x1b0] ss:$12 sps:$4 sm:$0xff]  }
   0x5   :  { %1541 = vmatprep.subr.bf16.mxu1 %v1758_v6  ;;  %v1607_v13 = vld [vmem:[%s2280_s1 + $0x4c] ss:$12 sps:$4 sm:$0xff]   ;;  %v1611_v15 = vld [vmem:[%s2280_s1 + $0x48] ss:$12 sps:$4 sm:$0xff]   ;;  %v1613_v17 = vld [vmem:[%s2280_s1 + $0x64] ss:$12 sps:$4 sm:$0xff]  }
   0x6   :  { %v1793_v14 = vld [vmem:[%s2280_s1 + $0x1cc] ss:$12 sps:$4 sm:$0xff]   ;;  %v1802_v16 = vld [vmem:[%s2280_s1 + $0x1c8] ss:$12 sps:$4 sm:$0xff]   ;;  %v1811_v18 = vld [vmem:[%s2280_s1 + $0x1e4] ss:$12 sps:$4 sm:$0xff]  }
   0x7   :  { %655 = vmatpush1.bf16.msra.mxu0 %v1599_v7  ;;  %v1617_v19 = vld [vmem:[%s2280_s1 + $0x60] ss:$12 sps:$4 sm:$0xff]   ;;  %v1619_v21 = vld [vmem:[%s2280_s1 + $0x7c] ss:$12 sps:$4 sm:$0xff]   ;;  %v1623_v23 = vld [vmem:[%s2280_s1 + $0x78] ss:$12 sps:$4 sm:$0xff]  }
   0x8   :  { %1549 = vmatpush1.bf16.msra.mxu1 %v1766_v8  ;;  %656 = vmatprep.subr.bf16.mxu0 %v1601_v9  ;;  %v1819_v20 = vld [vmem:[%s2280_s1 + $0x1e0] ss:$12 sps:$4 sm:$0xff]   ;;  %v1829_v22 = vld [vmem:[%s2280_s1 + $0x1fc] ss:$12 sps:$4 sm:$0xff]   ;;  %v1838_v24 = vld [vmem:[%s2280_s1 + $0x1f8] ss:$12 sps:$4 sm:$0xff]  }
   0x9   :  { %1542 = vmatprep.subr.bf16.mxu1 %v1775_v10  ;;  %v1625_v25 = vld [vmem:[%s2280_s1 + $0x94] ss:$12 sps:$4 sm:$0xff]   ;;  %v1629_v27 = vld [vmem:[%s2280_s1 + $0x90] ss:$12 sps:$4 sm:$0xff]   ;;  %v1631_v29 = vld [vmem:[%s2280_s1 + $0xac] ss:$12 sps:$4 sm:$0xff]  }
   0xa   :  { %v1847_v26 = vld [vmem:[%s2280_s1 + $0x214] ss:$12 sps:$4 sm:$0xff]   ;;  %v1856_v28 = vld [vmem:[%s2280_s1 + $0x210] ss:$12 sps:$4 sm:$0xff]   ;;  %v1865_v30 = vld [vmem:[%s2280_s1 + $0x22c] ss:$12 sps:$4 sm:$0xff]  }
   0xb   :  { %657 = vmatpush1.bf16.msra.mxu0 %v1605_v11  ;;  %v1635_v31 = vld [vmem:[%s2280_s1 + $0xa8] ss:$12 sps:$4 sm:$0xff]   ;;  %v1637_v33 = vld [vmem:[%s2280_s1 + $0xc4] ss:$12 sps:$4 sm:$0xff]   ;;  %v1641_v36 = vld [vmem:[%s2280_s1 + $0xc0] ss:$12 sps:$4 sm:$0xff]  }
   0xc   :  { %1550 = vmatpush1.bf16.msra.mxu1 %v1783_v12  ;;  %658 = vmatprep.subr.bf16.mxu0 %v1607_v13  ;;  %v1873_v32 = vld [vmem:[%s2280_s1 + $0x228] ss:$12 sps:$4 sm:$0xff]   ;;  %v1645_v39 = vld [vmem:[%s2280_s1 + $0xe0] ss:$12 sps:$4 sm:$0xff]   ;;  %v1646_v40 = vld [vmem:[%s2280_s1 + $0xd8] ss:$12 sps:$4 sm:$0xff]  }
   0xd   :  { %1543 = vmatprep.subr.bf16.mxu1 %v1793_v14  ;;  %v1883_v34 = vld [vmem:[%s2281_s0 + $0x68] ss:$12 sps:$4 sm:$0xff]   ;;  %v1647_v41 = vld [vmem:[%s2280_s1 + $0x20] ss:$12 sps:$4 sm:$0xff]   ;;  %v1651_v43 = vld [vmem:[%s2280_s1 + $0xf8] ss:$12 sps:$4 sm:$0xff]  }
   0xe   :  { %v1640_v35 = vld [vmem:[%s2280_s1 + $0xc8] ss:$12 sps:$4 sm:$0xff]   ;;  %v1918_v44 = vld [vmem:[%s2281_s0 + $0x80] ss:$12 sps:$4 sm:$0xff]   ;;  %v1652_v45 = vld [vmem:[%s2280_s1 + $0xf0] ss:$12 sps:$4 sm:$0xff]  }
   0xf   :  { %659 = vmatpush1.bf16.msra.mxu0 %v1611_v15  ;;  %v1642_v37 = vld [vmem:[%s2280_s1 + $0x8] ss:$12 sps:$4 sm:$0xff]   ;;  %v1653_v46 = vld [vmem:[%s2280_s1 + $0x38] ss:$12 sps:$4 sm:$0xff]   ;;  %v1656_v48 = vld [vmem:[%s2280_s1 + $0x110] ss:$12 sps:$4 sm:$0xff]  }
  0x10   :  { %1551 = vmatpush1.bf16.msra.mxu1 %v1802_v16  ;;  %660 = vmatprep.subr.bf16.mxu0 %v1613_v17  ;;  %v1643_v38 = vld [vmem:[%s2280_s1 + $0xdc] ss:$12 sps:$4 sm:$0xff]   ;;  %v1648_v42 = vld [vmem:[%s2280_s1 + $0xf4] ss:$12 sps:$4 sm:$0xff]   ;;  %v1654_v47 = vld [vmem:[%s2280_s1 + $0x10c] ss:$12 sps:$4 sm:$0xff]  }
  0x11   :  { %1544 = vmatprep.subr.bf16.mxu1 %v1811_v18  ;;  %v1657_v49 = vld [vmem:[%s2280_s1 + $0x108] ss:$12 sps:$4 sm:$0xff]   ;;  %v1658_v50 = vld [vmem:[%s2280_s1 + $0x50] ss:$12 sps:$4 sm:$0xff]   ;;  %v1949_v53 = vld [vmem:[%s2281_s0 + $0x98] ss:$12 sps:$4 sm:$0xff]  }
  0x12   :  { %v1659_v51 = vld [vmem:[%s2280_s1 + $0x124] ss:$12 sps:$4 sm:$0xff]   ;;  %v1662_v52 = vld [vmem:[%s2280_s1 + $0x128] ss:$12 sps:$4 sm:$0xff]   ;;  %v1663_v54 = vld [vmem:[%s2280_s1 + $0x120] ss:$12 sps:$4 sm:$0xff]  }
  0x13   :  { %661 = vmatpush1.bf16.msra.mxu0 %v1617_v19  ;;  %v1664_v55 = vld [vmem:[%s2280_s1 + $0x68] ss:$12 sps:$4 sm:$0xff]   ;;  %v1667_v57 = vld [vmem:[%s2280_s1 + $0x140] ss:$12 sps:$4 sm:$0xff]   ;;  %v1668_v58 = vld [vmem:[%s2280_s1 + $0x138] ss:$12 sps:$4 sm:$0xff]  }
  0x14   :  { %1552 = vmatpush1.bf16.msra.mxu1 %v1819_v20  ;;  %662 = vmatprep.subr.bf16.mxu0 %v1619_v21  ;;  %v1665_v56 = vld [vmem:[%s2280_s1 + $0x13c] ss:$12 sps:$4 sm:$0xff]   ;;  %v1669_v59 = vld [vmem:[%s2280_s1 + $0x80] ss:$12 sps:$4 sm:$0xff]   ;;  %v1673_v61 = vld [vmem:[%s2280_s1 + $0x158] ss:$12 sps:$4 sm:$0xff]  }
  0x15   :  { %1545 = vmatprep.subr.bf16.mxu1 %v1829_v22  ;;  %v1670_v60 = vld [vmem:[%s2280_s1 + $0x154] ss:$12 sps:$4 sm:$0xff]   ;;  %v1683_v62 = vld [vmem:[%s2281_s0 + $0x4] ss:$12 sps:$4 sm:$0xff]   ;;  %v1676_v5 = vld [vmem:[%s2280_s1 + $0x16c] ss:$12 sps:$4 sm:$0xff]  }
  0x16   :  { %v1983_v63 = vld [vmem:[%s2281_s0 + $0xb0] ss:$12 sps:$4 sm:$0xff]   ;;  %684 = vmatprep.mubr.bf16.mxu0 %v1683_v62  ;;  %v1675_v3 = vld [vmem:[%s2280_s1 + $0x98] ss:$12 sps:$4 sm:$0xff]   ;;  %v1679_v9 = vld [vmem:[%s2280_s1 + $0x168] ss:$12 sps:$4 sm:$0xff]  }
  0x17   :  { %663 = vmatpush1.bf16.msra.mxu0 %v1623_v23  ;;  %v1674_v0 = vld [vmem:[%s2280_s1 + $0x150] ss:$12 sps:$4 sm:$0xff]   ;;  %v1684_v13 = vld [vmem:[%s2280_s1 + $0x188] ss:$12 sps:$4 sm:$0xff]   ;;  %v1681_v15 = vld [vmem:[%s2281_s0] ss:$12 sps:$4 sm:$0xff]  }
  0x18   :  { %1553 = vmatpush1.bf16.msra.mxu1 %v1838_v24  ;;  %664 = vmatprep.subr.bf16.mxu0 %v1625_v25  ;;  %v1678_v7 = vld [vmem:[%s2280_s1 + $0x170] ss:$12 sps:$4 sm:$0xff]   ;;  %v1688_v19 = vld [vmem:[%s2280_s1 + $0x1a0] ss:$12 sps:$4 sm:$0xff]   ;;  %v1692_v21 = vld [vmem:[%s2280_s1 + $0x1b8] ss:$12 sps:$4 sm:$0xff]  }
  0x19   :  { %1546 = vmatprep.subr.bf16.mxu1 %v1847_v26  ;;  %v1680_v11 = vld [vmem:[%s2280_s1 + $0xb0] ss:$12 sps:$4 sm:$0xff]   ;;  %v1703_v25 = vld [vmem:[%s2281_s0 + $0x78] ss:$12 sps:$4 sm:$0xff]  }
  0x1a   :  { %v1685_v17 = vld [vmem:[%s2281_s0 + $0x1c] ss:$12 sps:$4 sm:$0xff]  }
  0x1b   :  { %665 = vmatpush1.bf16.msra.mxu0 %v1629_v27  ;;  %v1696_v23 = vld [vmem:[%s2280_s1 + $0x1d0] ss:$12 sps:$4 sm:$0xff]  }
  0x1c   :  { %1554 = vmatpush1.bf16.msra.mxu1 %v1856_v28  ;;  %666 = vmatprep.subr.bf16.mxu0 %v1631_v29  ;;  %v1707_v27 = vld [vmem:[%s2281_s0 + $0x90] ss:$12 sps:$4 sm:$0xff]   ;;  %v1711_v29 = vld [vmem:[%s2281_s0 + $0xa8] ss:$12 sps:$4 sm:$0xff]  }
  0x1d   :  { %1547 = vmatprep.subr.bf16.mxu1 %v1865_v30 }
  0x1f   :  { %667 = vmatpush1.bf16.msra.mxu0 %v1635_v31  ;;  %v1714_v31 = vld [vmem:[%s2281_s0 + $0x20] ss:$12 sps:$4 sm:$0xff]  }
  0x20   :  { %1555 = vmatpush1.bf16.msra.mxu1 %v1873_v32  ;;  %668 = vmatprep.subr.bf16.mxu0 %v1637_v33  ;;  %v1716_v33 = vld [vmem:[%s2281_s0 + $0x50] ss:$12 sps:$4 sm:$0xff]  }
  0x21   :  { %1428 = vmatprep.subr.bf16.mxu1 %v1640_v35 }
  0x23   :  { %838 = vmatmul.mubr.bf16.vlgmr.msra.gmra.mrb[0].mxu1 %v1883_v34  ;;  %669 = vmatpush1.bf16.msra.mxu0 %v1641_v36 }
  0x24   :  { %1429 = vmatpush3.bf16.msra.mxu1 %v1642_v37  ;;  %670 = vmatprep.subr.bf16.mxu0 %v1643_v38 }
  0x25   :  { %1430 = vmatprep.subr.bf16.mxu1 %v1645_v39  ;;  %847 = vmatprep.mubr.bf16.mxu1 %v1717_v1 }
  0x27   :  { %671 = vmatpush1.bf16.msra.mxu0 %v1646_v40 }
  0x28   :  { %1431 = vmatpush3.bf16.msra.mxu1 %v1647_v41  ;;  %672 = vmatprep.subr.bf16.mxu0 %v1648_v42 }
  0x29   :  { %1432 = vmatprep.subr.bf16.mxu1 %v1651_v43 }
  0x2b   :  { %848 = vmatmul.mubr.bf16.gmra.mrb[4].mxu1 %v1918_v44  ;;  %673 = vmatpush1.bf16.msra.mxu0 %v1652_v45 }
  0x2c   :  { %1433 = vmatpush3.bf16.msra.mxu1 %v1653_v46  ;;  %674 = vmatprep.subr.bf16.mxu0 %v1654_v47 }
  0x2d   :  { %1434 = vmatprep.subr.bf16.mxu1 %v1656_v48  ;;  %857 = vmatprep.mubr.bf16.mxu1 %v1717_v1 }
  0x2f   :  { %675 = vmatpush1.bf16.msra.mxu0 %v1657_v49 }
  0x30   :  { %1435 = vmatpush3.bf16.msra.mxu1 %v1658_v50  ;;  %676 = vmatprep.subr.bf16.mxu0 %v1659_v51 }
  0x31   :  { %1436 = vmatprep.subr.bf16.mxu1 %v1662_v52 }
  0x33   :  { %858 = vmatmul.mubr.bf16.gmra.mrb[8].mxu1 %v1949_v53  ;;  %677 = vmatpush1.bf16.msra.mxu0 %v1663_v54 }
  0x34   :  { %1437 = vmatpush3.bf16.msra.mxu1 %v1664_v55  ;;  %678 = vmatprep.subr.bf16.mxu0 %v1665_v56 }
  0x35   :  { %1438 = vmatprep.subr.bf16.mxu1 %v1667_v57  ;;  %867 = vmatprep.mubr.bf16.mxu1 %v1717_v1 }
  0x37   :  { %679 = vmatpush1.bf16.msra.mxu0 %v1668_v58 }
  0x38   :  { %1439 = vmatpush3.bf16.msra.mxu1 %v1669_v59  ;;  %680 = vmatprep.subr.bf16.mxu0 %v1670_v60 }
  0x39   :  { %1440 = vmatprep.subr.bf16.mxu1 %v1673_v61 }
  0x3b   :  { %868 = vmatmul.mubr.bf16.gmra.mrb[12].mxu1 %v1983_v63  ;;  %681 = vmatpush1.bf16.msra.mxu0 %v1674_v0 }
  0x3c   :  { %1441 = vmatpush3.bf16.msra.mxu1 %v1675_v3  ;;  %682 = vmatprep.subr.bf16.mxu0 %v1676_v5 }
  0x3d   :  { %1442 = vmatprep.subr.bf16.mxu1 %v1678_v7  ;;  %910 = vmatprep.mubr.bf16.mxu1 %v1683_v62 }
  0x3f   :  { %683 = vmatpush1.bf16.msra.mxu0 %v1679_v9 }
  0x40   :  { %1443 = vmatpush3.bf16.msra.mxu1 %v1680_v11  ;;  %765 = vmatprep.subr.bf16.mxu0 %v1740_v2  ;;  %v1687_v2 = vld [vmem:[%s2281_s0 + $0x18] ss:$12 sps:$4 sm:$0xff]  }
  0x41   :  { %1508 = vmatprep.subr.bf16.mxu1 %v1684_v13 }
  0x42   :  { %685 = vmatmul.mubr.bf16.vlgmr.msra.gmra.mrb[0].mxu0 %v1681_v15 }
  0x43   :  { %911 = vmatmul.mubr.bf16.vlgmr.msra.gmra.mrb[16].mxu1 %v1681_v15  ;;  %766 = vmatpush1.bf16.msra.mxu0 %v1748_v4  ;;  %v1689_v4 = vld [vmem:[%s2281_s0 + $0x34] ss:$12 sps:$4 sm:$0xff]  }
  0x44   :  { %1509 = vmatpush3.bf16.msra.mxu1 %v1684_v13  ;;  %694 = vmatprep.mubr.bf16.mxu0 %v1685_v17 }
  0x45   :  { %918 = vmatprep.mubr.bf16.mxu1 %v1685_v17  ;;  %1510 = vmatprep.subr.bf16.mxu1 %v1688_v19 }
  0x46   :  { %767 = vmatprep.subr.bf16.mxu0 %v1758_v6  ;;  %v1700_v6 = vld [vmem:[%s2280_s1 + $0x1e8] ss:$12 sps:$4 sm:$0xff]  }
  0x47   :  { %768 = vmatpush1.bf16.msra.mxu0 %v1766_v8  ;;  %v1691_v8 = vld [vmem:[%s2281_s0 + $0x30] ss:$12 sps:$4 sm:$0xff]  }
  0x48   :  { %1511 = vmatpush3.bf16.msra.mxu1 %v1688_v19  ;;  %769 = vmatprep.subr.bf16.mxu0 %v1775_v10  ;;  %v1693_v10 = vld [vmem:[%s2281_s0 + $0x4c] ss:$12 sps:$4 sm:$0xff]  }
  0x49   :  { %1512 = vmatprep.subr.bf16.mxu1 %v1692_v21 }
  0x4a   :  { %695 = vmatmul.mubr.bf16.gmra.mrb[4].mxu0 %v1687_v2 }
  0x4b   :  { %919 = vmatmul.mubr.bf16.gmra.mrb[20].mxu1 %v1687_v2  ;;  %704 = vmatprep.mubr.bf16.mxu0 %v1689_v4 }
  0x4c   :  { %926 = vmatprep.mubr.bf16.mxu1 %v1689_v4  ;;  %1513 = vmatpush3.bf16.msra.mxu1 %v1692_v21 }
  0x4d   :  { %770 = vmatpush1.bf16.msra.mxu0 %v1783_v12  ;;  %1514 = vmatprep.subr.bf16.mxu1 %v1696_v23  ;;  %v1704_v12 = vld [vmem:[%s2280_s1 + $0x200] ss:$12 sps:$4 sm:$0xff]  }
  0x4e   :  { %771 = vmatprep.subr.bf16.mxu0 %v1793_v14  ;;  %v1708_v14 = vld [vmem:[%s2280_s1 + $0x218] ss:$12 sps:$4 sm:$0xff]  }
  0x50   :  { %1515 = vmatpush3.bf16.msra.mxu1 %v1696_v23 }
  0x51   :  { %772 = vmatpush1.bf16.msra.mxu0 %v1802_v16  ;;  %1516 = vmatprep.subr.bf16.mxu1 %v1700_v6  ;;  %v1695_v16 = vld [vmem:[%s2281_s0 + $0x48] ss:$12 sps:$4 sm:$0xff]  }
  0x52   :  { %773 = vmatprep.subr.bf16.mxu0 %v1811_v18  ;;  %705 = vmatmul.mubr.bf16.gmra.mrb[8].mxu0 %v1691_v8  ;;  %v1697_v18 = vld [vmem:[%s2281_s0 + $0x64] ss:$12 sps:$4 sm:$0xff]  }
  0x53   :  { %927 = vmatmul.mubr.bf16.gmra.mrb[24].mxu1 %v1691_v8  ;;  %714 = vmatprep.mubr.bf16.mxu0 %v1693_v10 }
  0x54   :  { %934 = vmatprep.mubr.bf16.mxu1 %v1693_v10  ;;  %1517 = vmatpush3.bf16.msra.mxu1 %v1700_v6 }
  0x55   :  { %774 = vmatpush1.bf16.msra.mxu0 %v1819_v20  ;;  %1518 = vmatprep.subr.bf16.mxu1 %v1704_v12  ;;  %v1712_v20 = vld [vmem:[%s2280_s1 + $0x230] ss:$12 sps:$4 sm:$0xff]  }
  0x56   :  { %775 = vmatprep.subr.bf16.mxu0 %v1829_v22  ;;  %v1699_v22 = vld [vmem:[%s2281_s0 + $0x60] ss:$12 sps:$4 sm:$0xff]  }
  0x58   :  { %1519 = vmatpush3.bf16.msra.mxu1 %v1704_v12 }
  0x59   :  { %776 = vmatpush1.bf16.msra.mxu0 %v1838_v24  ;;  %1520 = vmatprep.subr.bf16.mxu1 %v1708_v14  ;;  %v1701_v24 = vld [vmem:[%s2281_s0 + $0x7c] ss:$12 sps:$4 sm:$0xff]  }
  0x5a   :  { %777 = vmatprep.subr.bf16.mxu0 %v1847_v26  ;;  %715 = vmatmul.mubr.bf16.gmra.mrb[12].mxu0 %v1695_v16  ;;  %v1705_v26 = vld [vmem:[%s2281_s0 + $0x94] ss:$12 sps:$4 sm:$0xff]  }
  0x5b   :  { %935 = vmatmul.mubr.bf16.gmra.mrb[28].mxu1 %v1695_v16  ;;  %724 = vmatprep.mubr.bf16.mxu0 %v1697_v18 }
  0x5c   :  { %942 = vmatprep.mubr.bf16.mxu1 %v1697_v18  ;;  %1521 = vmatpush3.bf16.msra.mxu1 %v1708_v14 }
  0x5d   :  { %778 = vmatpush1.bf16.msra.mxu0 %v1856_v28  ;;  %1522 = vmatprep.subr.bf16.mxu1 %v1712_v20  ;;  %v1709_v28 = vld [vmem:[%s2281_s0 + $0xac] ss:$12 sps:$4 sm:$0xff]  }
  0x5e   :  { %779 = vmatprep.subr.bf16.mxu0 %v1865_v30  ;;  %v1713_v30 = vld [vmem:[%s2281_s0 + $0x8] ss:$12 sps:$4 sm:$0xff]  }
  0x60   :  { %1523 = vmatpush3.bf16.msra.mxu1 %v1712_v20 }
  0x61   :  { %780 = vmatpush1.bf16.msra.mxu0 %v1873_v32  ;;  %v1715_v32 = vld [vmem:[%s2281_s0 + $0x38] ss:$12 sps:$4 sm:$0xff]  }
  0x62   :  { %725 = vmatmul.mubr.bf16.gmra.mrb[16].mxu0 %v1699_v22 }
  0x63   :  { %943 = vmatmul.mubr.bf16.gmra.mrb[32].mxu1 %v1699_v22  ;;  %734 = vmatprep.mubr.bf16.mxu0 %v1701_v24 }
  0x64   :  { %950 = vmatprep.mubr.bf16.mxu1 %v1701_v24 }
  0x6a   :  { %735 = vmatmul.mubr.bf16.gmra.mrb[20].mxu0 %v1703_v25 }
  0x6b   :  { %951 = vmatmul.mubr.bf16.gmra.mrb[36].mxu1 %v1703_v25  ;;  %744 = vmatprep.mubr.bf16.mxu0 %v1705_v26 }
  0x6c   :  { %958 = vmatprep.mubr.bf16.mxu1 %v1705_v26 }
  0x72   :  { %745 = vmatmul.mubr.bf16.gmra.mrb[24].mxu0 %v1707_v27 }
  0x73   :  { %959 = vmatmul.mubr.bf16.gmra.mrb[40].mxu1 %v1707_v27  ;;  %754 = vmatprep.mubr.bf16.mxu0 %v1709_v28 }
  0x74   :  { %966 = vmatprep.mubr.bf16.mxu1 %v1709_v28 }
  0x7a   :  { %755 = vmatmul.mubr.bf16.gmra.mrb[28].mxu0 %v1711_v29 }
  0x7b   :  { %967 = vmatmul.mubr.bf16.gmra.mrb[44].mxu1 %v1711_v29  ;;  %797 = vmatprep.mubr.bf16.mxu0 %v1717_v1 }
  0x7c   :  { %1524 = vmatprep.mubr.bf16.mxu1 %v1713_v30 }
  0x82   :  { %798 = vmatmul.mubr.bf16.vlgmr.msra.gmra.mrb[0].mxu0 %v1713_v30 }
  0x83   :  { %1525 = vmatmul.mubr.bf16.vlgmr.msra.gmra.mrb[48].mxu1 %v1714_v31  ;;  %807 = vmatprep.mubr.bf16.mxu0 %v1717_v1 }
  0x84   :  { %1528 = vmatprep.mubr.bf16.mxu1 %v1715_v32 }
  0x8a   :  { %808 = vmatmul.mubr.bf16.gmra.mrb[4].mxu0 %v1714_v31 }
  0x8b   :  { %1529 = vmatmul.mubr.bf16.gmra.mrb[52].mxu1 %v1716_v33  ;;  %817 = vmatprep.mubr.bf16.mxu0 %v1717_v1 }
  0x8c   :  { %1532 = vmatprep.mubr.bf16.mxu1 %v1883_v34 }
  0x92   :  { %818 = vmatmul.mubr.bf16.gmra.mrb[8].mxu0 %v1715_v32 }
  0x93   :  { %1533 = vmatmul.mubr.bf16.gmra.mrb[56].mxu1 %v1918_v44  ;;  %827 = vmatprep.mubr.bf16.mxu0 %v1717_v1 }
  0x94   :  { %1536 = vmatprep.mubr.bf16.mxu1 %v1949_v53 }
  0x9a   :  { %828 = vmatmul.mubr.bf16.gmra.mrb[12].mxu0 %v1716_v33 }
  0x9b   :  { %1537 = vmatmul.mubr.bf16.gmra.mrb[60].mxu1 %v1983_v63 }
  0xf6   :  { %v839_v35 = vpop.f32.mrb[0].mxu1 }
  0xf7   :  { %v841_v36 = vpop.f32.mrb[1].mxu1 }
  0xf8   :  { %v843_v37 = vpop.f32.mrb[2].mxu1 }
  0xf9   :  { %v845_v38 = vpop.f32.mrb[3].mxu1 }
  0xfe   :  { %v849_v39 = vpop.f32.mrb[4].mxu1 }
  0xff   :  { %v851_v40 = vpop.f32.mrb[5].mxu1 }
 0x100   :  { %v853_v41 = vpop.f32.mrb[6].mxu1 }
 0x101   :  { %v2109_v42 = vpop.f32.mrb[7].mxu1 }
 0x106   :  { %v2111_v34 = vpop.f32.mrb[8].mxu1 }
 0x107   :  { %v2113_v43 = vpop.f32.mrb[9].mxu1 }
 0x108   :  { %v2115_v44 = vpop.f32.mrb[10].mxu1 }
 0x109   :  { %v2117_v1 = vpop.f32.mrb[11].mxu1 }
 0x10e   :  { %v2119_v45 = vpop.f32.mrb[12].mxu1 }
 0x10f   :  { %v2121_v46 = vpop.f32.mrb[13].mxu1 }
 0x110   :  { %v2123_v47 = vpop.f32.mrb[14].mxu1 }
 0x111   :  { %v2125_v48 = vpop.f32.mrb[15].mxu1 }
 0x116   :  { %v1444_v49 = vpop.f32.mrb[16].mxu1 }
 0x117   :  { %v1445_v50 = vpop.f32.mrb[17].mxu1 }
 0x118   :  { %v2127_v51 = vadd.f32 %v1445_v50, %v1444_v49  ;;  %v1447_v52 = vpop.f32.mrb[18].mxu1 }
 0x119   :  { %v1448_v53 = vpop.f32.mrb[19].mxu1 }
 0x11a   :  { %v2129_v54 = vadd.f32 %v1448_v53, %v1447_v52 }
 0x11e   :  { %v1450_v55 = vpop.f32.mrb[20].mxu1 }
 0x11f   :  { %v1451_v56 = vpop.f32.mrb[21].mxu1 }
 0x120   :  { %v2131_v57 = vadd.f32 %v1451_v56, %v1450_v55  ;;  %v1453_v58 = vpop.f32.mrb[22].mxu1 }
 0x121   :  { %v1454_v59 = vpop.f32.mrb[23].mxu1 }
 0x122   :  { %v2133_v60 = vadd.f32 %v1454_v59, %v1453_v58 }
 0x126   :  { %v1456_v61 = vpop.f32.mrb[24].mxu1 }
 0x127   :  { %v1457_v62 = vpop.f32.mrb[25].mxu1 }
 0x128   :  { %v2135_v63 = vadd.f32 %v1457_v62, %v1456_v61  ;;  %v1459_v0 = vpop.f32.mrb[26].mxu1 }
 0x129   :  { %v1460_v3 = vpop.f32.mrb[27].mxu1 }
 0x12a   :  { %v2137_v5 = vadd.f32 %v1460_v3, %v1459_v0 }
 0x12e   :  { %v1462_v7 = vpop.f32.mrb[28].mxu1 }
 0x12f   :  { %v1463_v9 = vpop.f32.mrb[29].mxu1 }
 0x130   :  { %v2139_v11 = vadd.f32 %v1463_v9, %v1462_v7  ;;  %v1465_v13 = vpop.f32.mrb[30].mxu1 }
 0x131   :  { %v1466_v15 = vpop.f32.mrb[31].mxu1 }
 0x132   :  { %v2141_v17 = vadd.f32 %v1466_v15, %v1465_v13 }
 0x135   :  { %v726_v19 = vpop.f32.mrb[16].mxu0 }
 0x136   :  { %v1468_v21 = vpop.f32.mrb[32].mxu1  ;;  %v840_v2 = vadd.f32 %v839_v35, %v726_v19  ;;  %v728_v4 = vpop.f32.mrb[17].mxu0 }
 0x137   :  { %v1469_v23 = vpop.f32.mrb[33].mxu1  ;;  %v842_v6 = vadd.f32 %v841_v36, %v728_v4  ;;  %v730_v10 = vpop.f32.mrb[18].mxu0 }
 0x138   :  { %v2143_v8 = vadd.f32 %v1469_v23, %v1468_v21  ;;  %v1471_v12 = vpop.f32.mrb[34].mxu1  ;;  %v844_v14 = vadd.f32 %v843_v37, %v730_v10  ;;  %v732_v16 = vpop.f32.mrb[19].mxu0 }
 0x139   :  { %v1472_v18 = vpop.f32.mrb[35].mxu1  ;;  %v1412_v20 = vpack.c.bf16 %v842_v6, %v840_v2  ;;  %v846_v22 = vadd.f32 %v845_v38, %v732_v16 }
 0x13a   :  { %v2145_v24 = vadd.f32 %v1472_v18, %v1471_v12 }
 0x13b   :  { %1248 = vst [vmem:[%s2282_s2 + $0x60] sm:$0xff] %v1412_v20  ;;  %v1414_v25 = vpack.c.bf16 %v846_v22, %v844_v14 }
 0x13d   :  { %1250 = vst [vmem:[%s2282_s2 + $0x6c] sm:$0xff] %v1414_v25  ;;  %v736_v26 = vpop.f32.mrb[20].mxu0 }
 0x13e   :  { %v1474_v27 = vpop.f32.mrb[36].mxu1  ;;  %v850_v28 = vadd.f32 %v849_v39, %v736_v26  ;;  %v738_v29 = vpop.f32.mrb[21].mxu0 }
 0x13f   :  { %v1475_v30 = vpop.f32.mrb[37].mxu1  ;;  %v852_v31 = vadd.f32 %v851_v40, %v738_v29  ;;  %v740_v33 = vpop.f32.mrb[22].mxu0 }
 0x140   :  { %v2153_v32 = vadd.f32 %v1475_v30, %v1474_v27  ;;  %v1477_v35 = vpop.f32.mrb[38].mxu1  ;;  %v854_v36 = vadd.f32 %v853_v41, %v740_v33  ;;  %v742_v37 = vpop.f32.mrb[23].mxu0 }
 0x141   :  { %v1478_v38 = vpop.f32.mrb[39].mxu1  ;;  %v1416_v49 = vpack.c.bf16 %v852_v31, %v850_v28  ;;  %v856_v50 = vadd.f32 %v2109_v42, %v742_v37 }
 0x142   :  { %v2156_v52 = vadd.f32 %v1478_v38, %v1477_v35 }
 0x143   :  { %1252 = vst [vmem:[%s2282_s2 + $0x78] sm:$0xff] %v1416_v49  ;;  %v1418_v39 = vpack.c.bf16 %v856_v50, %v854_v36 }
 0x145   :  { %1254 = vst [vmem:[%s2282_s2 + $0x84] sm:$0xff] %v1418_v39  ;;  %v746_v40 = vpop.f32.mrb[24].mxu0 }
 0x146   :  { %v1480_v53 = vpop.f32.mrb[40].mxu1  ;;  %v860_v41 = vadd.f32 %v2111_v34, %v746_v40  ;;  %v748_v55 = vpop.f32.mrb[25].mxu0 }
 0x147   :  { %v1481_v56 = vpop.f32.mrb[41].mxu1  ;;  %v862_v58 = vadd.f32 %v2113_v43, %v748_v55  ;;  %v750_v59 = vpop.f32.mrb[26].mxu0 }
 0x148   :  { %v2166_v42 = vadd.f32 %v1481_v56, %v1480_v53  ;;  %v1483_v61 = vpop.f32.mrb[42].mxu1  ;;  %v864_v62 = vadd.f32 %v2115_v44, %v750_v59  ;;  %v752_v0 = vpop.f32.mrb[27].mxu0 }
 0x149   :  { %v1484_v3 = vpop.f32.mrb[43].mxu1  ;;  %v1420_v7 = vpack.c.bf16 %v862_v58, %v860_v41  ;;  %v866_v9 = vadd.f32 %v2117_v1, %v752_v0 }
 0x14a   :  { %v2170_v13 = vadd.f32 %v1484_v3, %v1483_v61 }
 0x14b   :  { %1256 = vst [vmem:[%s2282_s2 + $0x90] sm:$0xff] %v1420_v7  ;;  %v1422_v34 = vpack.c.bf16 %v866_v9, %v864_v62 }
 0x14d   :  { %1258 = vst [vmem:[%s2282_s2 + $0x9c] sm:$0xff] %v1422_v34  ;;  %v756_v43 = vpop.f32.mrb[28].mxu0 }
 0x14e   :  { %v1486_v15 = vpop.f32.mrb[44].mxu1  ;;  %v870_v44 = vadd.f32 %v2119_v45, %v756_v43  ;;  %v758_v19 = vpop.f32.mrb[29].mxu0 }
 0x14f   :  { %v1487_v21 = vpop.f32.mrb[45].mxu1  ;;  %v872_v2 = vadd.f32 %v2121_v46, %v758_v19  ;;  %v760_v4 = vpop.f32.mrb[30].mxu0 }
 0x150   :  { %v2180_v1 = vadd.f32 %v1487_v21, %v1486_v15  ;;  %v1489_v23 = vpop.f32.mrb[46].mxu1  ;;  %v874_v6 = vadd.f32 %v2123_v47, %v760_v4  ;;  %v762_v10 = vpop.f32.mrb[31].mxu0 }
 0x151   :  { %v1490_v12 = vpop.f32.mrb[47].mxu1  ;;  %v1424_v14 = vpack.c.bf16 %v872_v2, %v870_v44  ;;  %v876_v16 = vadd.f32 %v2125_v48, %v762_v10 }
 0x152   :  { %v2184_v18 = vadd.f32 %v1490_v12, %v1489_v23 }
 0x153   :  { %1260 = vst [vmem:[%s2282_s2 + $0xa8] sm:$0xff] %v1424_v14  ;;  %v1426_v45 = vpack.c.bf16 %v876_v16, %v874_v6 }
 0x155   :  { %1262 = vst [vmem:[%s2282_s2 + $0xb4] sm:$0xff] %v1426_v45  ;;  %v799_v46 = vpop.f32.mrb[0].mxu0 }
 0x156   :  { %v1526_v20 = vpop.f32.mrb[48].mxu1  ;;  %v801_v22 = vpop.f32.mrb[1].mxu0 }
 0x157   :  { %v1018_v47 = vadd.f32 %v1526_v20, %v2131_v57  ;;  %v1009_v25 = vpop.f32.mrb[49].mxu1  ;;  %v1396_v26 = vpack.c.bf16 %v801_v22, %v799_v46  ;;  %v803_v27 = vpop.f32.mrb[2].mxu0 }
 0x158   :  { %v1010_v48 = vadd.f32 %v2127_v51, %v1009_v25  ;;  %v1527_v28 = vpop.f32.mrb[50].mxu1  ;;  %v805_v31 = vpop.f32.mrb[3].mxu0 }
 0x159   :  { %v1401_v29 = vpack.c.bf16 %v1018_v47, %v1018_v47  ;;  %v1021_v30 = vadd.f32 %v1527_v28, %v2133_v60  ;;  %v1012_v33 = vpop.f32.mrb[51].mxu1  ;;  %1232 = vst [vmem:[%s2282_s2] sm:$0xff] %v1396_v26  ;;  %v1398_v36 = vpack.c.bf16 %v805_v31, %v803_v27 }
 0x15a   :  { %v1397_v35 = vpack.c.bf16 %v1010_v48, %v1010_v48  ;;  %v1013_v57 = vadd.f32 %v2129_v54, %v1012_v33 }
 0x15b   :  { %1237 = vst [vmem:[%s2282_s2 + $0x20] sm:$0xf] %v1401_v29  ;;  %v1403_v51 = vpack.c.bf16 %v1021_v30, %v1021_v30  ;;  %1234 = vst [vmem:[%s2282_s2 + $0xc] sm:$0xff] %v1398_v36 }
 0x15c   :  { %1233 = vst [vmem:[%s2282_s2 + $0x8] sm:$0xf] %v1397_v35  ;;  %v1399_v60 = vpack.c.bf16 %v1013_v57, %v1013_v57 }
 0x15d   :  { %1239 = vst [vmem:[%s2282_s2 + $0x2c] sm:$0xf] %v1403_v51  ;;  %v809_v54 = vpop.f32.mrb[4].mxu0 }
 0x15e   :  { %1235 = vst [vmem:[%s2282_s2 + $0x14] sm:$0xf] %v1399_v60  ;;  %v1530_v37 = vpop.f32.mrb[52].mxu1  ;;  %v811_v49 = vpop.f32.mrb[5].mxu0 }
 0x15f   :  { %v1034_v38 = vadd.f32 %v1530_v37, %v2139_v11  ;;  %v1025_v50 = vpop.f32.mrb[53].mxu1  ;;  %v1400_v39 = vpack.c.bf16 %v811_v49, %v809_v54  ;;  %v813_v53 = vpop.f32.mrb[6].mxu0 }
 0x160   :  { %v1026_v40 = vadd.f32 %v2135_v63, %v1025_v50  ;;  %v1531_v41 = vpop.f32.mrb[54].mxu1  ;;  %v815_v58 = vpop.f32.mrb[7].mxu0 }
 0x161   :  { %v1409_v55 = vpack.c.bf16 %v1034_v38, %v1034_v38  ;;  %v1037_v56 = vadd.f32 %v1531_v41, %v2141_v17  ;;  %v1028_v59 = vpop.f32.mrb[55].mxu1  ;;  %1236 = vst [vmem:[%s2282_s2 + $0x18] sm:$0xff] %v1400_v39  ;;  %v1402_v62 = vpack.c.bf16 %v815_v58, %v813_v53 }
 0x162   :  { %v1405_v61 = vpack.c.bf16 %v1026_v40, %v1026_v40  ;;  %v1029_v11 = vadd.f32 %v2137_v5, %v1028_v59 }
 0x163   :  { %1245 = vst [vmem:[%s2282_s2 + $0x50] sm:$0xf] %v1409_v55  ;;  %v1411_v63 = vpack.c.bf16 %v1037_v56, %v1037_v56  ;;  %1238 = vst [vmem:[%s2282_s2 + $0x24] sm:$0xff] %v1402_v62 }
 0x164   :  { %1241 = vst [vmem:[%s2282_s2 + $0x38] sm:$0xf] %v1405_v61  ;;  %v1407_v17 = vpack.c.bf16 %v1029_v11, %v1029_v11 }
 0x165   :  { %1247 = vst [vmem:[%s2282_s2 + $0x5c] sm:$0xf] %v1411_v63  ;;  %v819_v5 = vpop.f32.mrb[8].mxu0 }
 0x166   :  { %1243 = vst [vmem:[%s2282_s2 + $0x44] sm:$0xf] %v1407_v17  ;;  %v1534_v0 = vpop.f32.mrb[56].mxu1  ;;  %v821_v7 = vpop.f32.mrb[9].mxu0 }
 0x167   :  { %v1050_v3 = vadd.f32 %v1534_v0, %v2153_v32  ;;  %v1041_v9 = vpop.f32.mrb[57].mxu1  ;;  %v1404_v34 = vpack.c.bf16 %v821_v7, %v819_v5  ;;  %v823_v15 = vpop.f32.mrb[10].mxu0 }
 0x168   :  { %v1042_v43 = vadd.f32 %v2143_v8, %v1041_v9  ;;  %v1535_v44 = vpop.f32.mrb[58].mxu1  ;;  %v825_v2 = vpop.f32.mrb[11].mxu0 }
 0x169   :  { %v1417_v19 = vpack.c.bf16 %v1050_v3, %v1050_v3  ;;  %v1053_v21 = vadd.f32 %v1535_v44, %v2156_v52  ;;  %v1044_v4 = vpop.f32.mrb[59].mxu1  ;;  %1240 = vst [vmem:[%s2282_s2 + $0x30] sm:$0xff] %v1404_v34  ;;  %v1406_v6 = vpack.c.bf16 %v825_v2, %v823_v15 }
 0x16a   :  { %v1413_v23 = vpack.c.bf16 %v1042_v43, %v1042_v43  ;;  %v1045_v32 = vadd.f32 %v2145_v24, %v1044_v4 }
 0x16b   :  { %1253 = vst [vmem:[%s2282_s2 + $0x80] sm:$0xf] %v1417_v19  ;;  %v1419_v8 = vpack.c.bf16 %v1053_v21, %v1053_v21  ;;  %1242 = vst [vmem:[%s2282_s2 + $0x3c] sm:$0xff] %v1406_v6 }
 0x16c   :  { %1249 = vst [vmem:[%s2282_s2 + $0x68] sm:$0xf] %v1413_v23  ;;  %v1415_v52 = vpack.c.bf16 %v1045_v32, %v1045_v32 }
 0x16d   :  { %1255 = vst [vmem:[%s2282_s2 + $0x8c] sm:$0xf] %v1419_v8  ;;  %v829_v24 = vpop.f32.mrb[12].mxu0 }
 0x16e   :  { %1251 = vst [vmem:[%s2282_s2 + $0x74] sm:$0xf] %v1415_v52  ;;  %v1538_v10 = vpop.f32.mrb[60].mxu1  ;;  %v831_v14 = vpop.f32.mrb[13].mxu0 }
 0x16f   :  { %v1066_v12 = vadd.f32 %v1538_v10, %v2180_v1  ;;  %v1057_v16 = vpop.f32.mrb[61].mxu1  ;;  %v1408_v45 = vpack.c.bf16 %v831_v14, %v829_v24  ;;  %v833_v20 = vpop.f32.mrb[14].mxu0 }
 0x170   :  { %v1058_v46 = vadd.f32 %v2166_v42, %v1057_v16  ;;  %v1539_v47 = vpop.f32.mrb[62].mxu1  ;;  %v835_v26 = vpop.f32.mrb[15].mxu0 }
 0x171   :  { %v1425_v22 = vpack.c.bf16 %v1066_v12, %v1066_v12  ;;  %v1069_v25 = vadd.f32 %v1539_v47, %v2184_v18  ;;  %v1060_v48 = vpop.f32.mrb[63].mxu1  ;;  %1244 = vst [vmem:[%s2282_s2 + $0x48] sm:$0xff] %v1408_v45  ;;  %v1410_v28 = vpack.c.bf16 %v835_v26, %v833_v20 }
 0x172   :  { %v1421_v27 = vpack.c.bf16 %v1058_v46, %v1058_v46  ;;  %v1061_v1 = vadd.f32 %v2170_v13, %v1060_v48 }
 0x173   :  { %1261 = vst [vmem:[%s2282_s2 + $0xb0] sm:$0xf] %v1425_v22  ;;  %v1427_v42 = vpack.c.bf16 %v1069_v25, %v1069_v25  ;;  %1246 = vst [vmem:[%s2282_s2 + $0x54] sm:$0xff] %v1410_v28 }
 0x174   :  { %1257 = vst [vmem:[%s2282_s2 + $0x98] sm:$0xf] %v1421_v27  ;;  %v1423_v18 = vpack.c.bf16 %v1061_v1, %v1061_v1 }
 0x175   :  { %1263 = vst [vmem:[%s2282_s2 + $0xbc] sm:$0xf] %v1427_v42 }
 0x176   :  { %1259 = vst [vmem:[%s2282_s2 + $0xa4] sm:$0xf] %v1423_v18 }

// kernel: gcn_bayes_forward.36
= control target key start
LH: loop header
LB: loop body
LE: loop exit
PB: predicated region body
PF: predicated region fallthrough
CT: control target
= control target key end

     0   :  { %v696_v1 = vmov 0   ;;  %v54_v25 = vlaneseq  ;;  %s942_s2 = inlined_call_operand.vmem [shape: bf16[128,256], index: 2, kind: input, shape index: {}]   ;;  %s943_s0 = inlined_call_operand.vmem [shape: bf16[128,128], index: 0, kind: input, shape index: {}]   ;;  %s944_s3 = inlined_call_operand.vmem [shape: f32[1,256], index: 3, kind: input, shape index: {}]   ;;  %s945_s1 = inlined_call_operand.vmem [shape: bf16[128,128], index: 1, kind: input, shape index: {}]   ;;  %s946_s5 = inlined_call_operand.vmem [shape: f32[128,128], index: 5, kind: output, shape index: {1}]   ;;  %s947_s4 = inlined_call_operand.vmem [shape: bf16[128,128], index: 4, kind: output, shape index: {0}]  }
   0x1   :  { %v664_v0 = vld [vmem:[%s942_s2 + $0x4] ss:$8 sps:$4 sm:$0xff]   ;;  %224 = vmatprep.mubr.bf16.mxu0 %v696_v1  ;;  %264 = vmatprep.mubr.bf16.mxu1 %v696_v1  ;;  %v666_v2 = vld [vmem:[%s942_s2] ss:$8 sps:$4 sm:$0xff]   ;;  %v667_v3 = vld [vmem:[%s942_s2 + $0x14] ss:$8 sps:$4 sm:$0xff]  }
   0x2   :  { %192 = vmatprep.subr.bf16.mxu0 %v664_v0  ;;  %647 = vmatprep.subr.bf16.mxu1 %v664_v0  ;;  %v669_v4 = vld [vmem:[%s942_s2 + $0x10] ss:$8 sps:$4 sm:$0xff]   ;;  %v670_v5 = vld [vmem:[%s942_s2 + $0x24] ss:$8 sps:$4 sm:$0xff]   ;;  %v672_v6 = vld [vmem:[%s942_s2 + $0x20] ss:$8 sps:$4 sm:$0xff]  }
   0x3   :  { %193 = vmatpush1.bf16.msra.mxu0 %v666_v2  ;;  %655 = vmatpush1.bf16.msra.mxu1 %v666_v2  ;;  %v673_v7 = vld [vmem:[%s942_s2 + $0x34] ss:$8 sps:$4 sm:$0xff]   ;;  %v675_v8 = vld [vmem:[%s942_s2 + $0x30] ss:$8 sps:$4 sm:$0xff]   ;;  %v676_v9 = vld [vmem:[%s942_s2 + $0x44] ss:$8 sps:$4 sm:$0xff]  }
   0x4   :  { %194 = vmatprep.subr.bf16.mxu0 %v667_v3  ;;  %648 = vmatprep.subr.bf16.mxu1 %v667_v3  ;;  %v678_v10 = vld [vmem:[%s942_s2 + $0x40] ss:$8 sps:$4 sm:$0xff]   ;;  %v679_v11 = vld [vmem:[%s942_s2 + $0x54] ss:$8 sps:$4 sm:$0xff]   ;;  %v681_v12 = vld [vmem:[%s942_s2 + $0x50] ss:$8 sps:$4 sm:$0xff]  }
   0x5   :  { %v682_v13 = vld [vmem:[%s942_s2 + $0x64] ss:$8 sps:$4 sm:$0xff]   ;;  %v684_v14 = vld [vmem:[%s942_s2 + $0x60] ss:$8 sps:$4 sm:$0xff]   ;;  %v685_v15 = vld [vmem:[%s942_s2 + $0x74] ss:$8 sps:$4 sm:$0xff]  }
   0x6   :  { %v687_v16 = vld [vmem:[%s942_s2 + $0x70] ss:$8 sps:$4 sm:$0xff]   ;;  %v688_v17 = vld [vmem:[%s943_s0] sm:$0xff]   ;;  %v690_v19 = vld [vmem:[%s943_s0 + $0x8] sm:$0xff]   ;;  %v55_v26 = vshrl.u32 %v54_v25, 7 }
   0x7   :  { %195 = vmatpush1.bf16.msra.mxu0 %v669_v4  ;;  %656 = vmatpush1.bf16.msra.mxu1 %v669_v4  ;;  %v689_v18 = vld [vmem:[%s943_s0 + $0x20] sm:$0xff]   ;;  %v691_v20 = vld [vmem:[%s943_s0 + $0x28] sm:$0xff]   ;;  %v692_v21 = vld [vmem:[%s943_s0 + $0x10] sm:$0xff]  }
   0x8   :  { %196 = vmatprep.subr.bf16.mxu0 %v670_v5  ;;  %649 = vmatprep.subr.bf16.mxu1 %v670_v5  ;;  %v693_v22 = vld [vmem:[%s943_s0 + $0x30] sm:$0xff]   ;;  %v694_v23 = vld [vmem:[%s943_s0 + $0x18] sm:$0xff]   ;;  %v56_v27 = vsub.s32 0, %v55_v26  ;;  %v52_v28 = vld [vmem:[%s944_s3] sm:$0x3]  ;;  %v60_v29 = vsub.s32 1, %v55_v26 }
   0x9   :  { %v695_v24 = vld [vmem:[%s943_s0 + $0x38] sm:$0xff]   ;;  %v562_v31 = vld [vmem:[%s945_s1] sm:$0xff]   ;;  %v633_v60 = vld [vmem:[%s945_s1 + $0x8] sm:$0xff]  }
   0xa   :  { %v810_v30 = vrot.slane %v52_v28, %v56_v27  ;;  %v636_v32 = vld [vmem:[%s945_s1 + $0x20] sm:$0xff]   ;;  %v818_v33 = vrot.slane %v52_v28, %v60_v29  ;;  %v563_v37 = vunpack.c.l.bf16 %v562_v31  ;;  %v564_v45 = vunpack.c.h.bf16 %v562_v31  ;;  %v637_v61 = vld [vmem:[%s945_s1 + $0x28] sm:$0xff]  }
   0xb   :  { %197 = vmatpush1.bf16.msra.mxu0 %v672_v6  ;;  %657 = vmatpush1.bf16.msra.mxu1 %v672_v6  ;;  %v579_v39 = vunpack.c.l.bf16 %v636_v32  ;;  %v580_v47 = vunpack.c.h.bf16 %v636_v32 }
   0xc   :  { %198 = vmatprep.subr.bf16.mxu0 %v673_v7  ;;  %650 = vmatprep.subr.bf16.mxu1 %v673_v7 }
   0xf   :  { %199 = vmatpush1.bf16.msra.mxu0 %v675_v8  ;;  %658 = vmatpush1.bf16.msra.mxu1 %v675_v8 }
  0x10   :  { %200 = vmatprep.subr.bf16.mxu0 %v676_v9  ;;  %651 = vmatprep.subr.bf16.mxu1 %v676_v9  ;;  %v567_v9 = vunpack.c.l.bf16 %v633_v60 }
  0x13   :  { %201 = vmatpush1.bf16.msra.mxu0 %v678_v10  ;;  %659 = vmatpush1.bf16.msra.mxu1 %v678_v10 }
  0x14   :  { %202 = vmatprep.subr.bf16.mxu0 %v679_v11  ;;  %652 = vmatprep.subr.bf16.mxu1 %v679_v11  ;;  %v583_v11 = vunpack.c.l.bf16 %v637_v61 }
  0x17   :  { %203 = vmatpush1.bf16.msra.mxu0 %v681_v12  ;;  %660 = vmatpush1.bf16.msra.mxu1 %v681_v12 }
  0x18   :  { %204 = vmatprep.subr.bf16.mxu0 %v682_v13  ;;  %653 = vmatprep.subr.bf16.mxu1 %v682_v13 }
  0x1b   :  { %205 = vmatpush1.bf16.msra.mxu0 %v684_v14  ;;  %661 = vmatpush1.bf16.msra.mxu1 %v684_v14 }
  0x1c   :  { %206 = vmatprep.subr.bf16.mxu0 %v685_v15  ;;  %654 = vmatprep.subr.bf16.mxu1 %v685_v15 }
  0x1f   :  { %207 = vmatpush1.bf16.msra.mxu0 %v687_v16  ;;  %662 = vmatpush1.bf16.msra.mxu1 %v687_v16 }
  0x22   :  { %225 = vmatmul.mubr.bf16.vlgmr.msra.gmra.mrb[0].mxu0 %v688_v17  ;;  %265 = vmatmul.mubr.bf16.vlgmr.msra.gmra.mrb[0].mxu1 %v689_v18 }
  0x23   :  { %234 = vmatprep.mubr.bf16.mxu0 %v696_v1  ;;  %274 = vmatprep.mubr.bf16.mxu1 %v696_v1 }
  0x2a   :  { %235 = vmatmul.mubr.bf16.gmra.mrb[4].mxu0 %v690_v19  ;;  %275 = vmatmul.mubr.bf16.gmra.mrb[4].mxu1 %v691_v20 }
  0x2b   :  { %244 = vmatprep.mubr.bf16.mxu0 %v696_v1  ;;  %284 = vmatprep.mubr.bf16.mxu1 %v696_v1 }
  0x32   :  { %245 = vmatmul.mubr.bf16.gmra.mrb[8].mxu0 %v692_v21  ;;  %285 = vmatmul.mubr.bf16.gmra.mrb[8].mxu1 %v693_v22  ;;  %v568_v21 = vunpack.c.h.bf16 %v633_v60 }
  0x33   :  { %254 = vmatprep.mubr.bf16.mxu0 %v696_v1  ;;  %294 = vmatprep.mubr.bf16.mxu1 %v696_v1 }
  0x3a   :  { %255 = vmatmul.mubr.bf16.gmra.mrb[12].mxu0 %v694_v23  ;;  %295 = vmatmul.mubr.bf16.gmra.mrb[12].mxu1 %v695_v24  ;;  %v584_v23 = vunpack.c.h.bf16 %v637_v61 }
  0xf5   :  { %v226_v34 = vpop.f32.mrb[0].mxu0  ;;  %v266_v35 = vpop.f32.mrb[0].mxu1 }
  0xf6   :  { %v227_v36 = vadd.f32 %v226_v34, %v810_v30  ;;  %v267_v38 = vadd.f32 %v266_v35, %v810_v30  ;;  %v228_v40 = vpop.f32.mrb[1].mxu0  ;;  %v268_v41 = vpop.f32.mrb[1].mxu1 }
  0xf7   :  { %v229_v42 = vadd.f32 %v228_v40, %v818_v33  ;;  %v269_v43 = vadd.f32 %v268_v41, %v818_v33  ;;  %v230_v44 = vpop.f32.mrb[2].mxu0  ;;  %v270_v46 = vpop.f32.mrb[2].mxu1 }
  0xf8   :  { %v305_v48 = vmax.f32 %v227_v36, 0.0  ;;  %v321_v49 = vmax.f32 %v267_v38, 0.0  ;;  %v231_v50 = vadd.f32 %v230_v44, %v810_v30  ;;  %v271_v51 = vadd.f32 %v270_v46, %v810_v30  ;;  %v232_v52 = vpop.f32.mrb[3].mxu0  ;;  %v272_v53 = vpop.f32.mrb[3].mxu1  ;;  %v634_v38 = vld [vmem:[%s945_s1 + $0x10] sm:$0xff]  }
  0xf9   :  { %v306_v54 = vmax.f32 %v229_v42, 0.0  ;;  %v322_v55 = vmax.f32 %v269_v43, 0.0  ;;  %v233_v56 = vadd.f32 %v232_v52, %v818_v33  ;;  %v273_v57 = vadd.f32 %v272_v53, %v818_v33 }
  0xfa   :  { %v307_v58 = vmax.f32 %v231_v50, 0.0  ;;  %v323_v59 = vmax.f32 %v271_v51, 0.0  ;;  %v369_v2 = vadd.f32 %v563_v37, %v305_v48  ;;  %v377_v3 = vadd.f32 %v579_v39, %v321_v49 }
  0xfb   :  { %v465_v62 = vadd.f32 %v563_v37, %v306_v54  ;;  %v473_v63 = vadd.f32 %v579_v39, %v322_v55  ;;  %v308_v0 = vmax.f32 %v233_v56, 0.0  ;;  %v324_v1 = vmax.f32 %v273_v57, 0.0  ;;  %v638_v39 = vld [vmem:[%s945_s1 + $0x30] sm:$0xff]  }
  0xfc   :  { %v370_v4 = vadd.f32 %v564_v45, %v307_v58  ;;  %v378_v5 = vadd.f32 %v580_v47, %v323_v59  ;;  %v571_v51 = vunpack.c.l.bf16 %v634_v38  ;;  %v587_v53 = vunpack.c.l.bf16 %v638_v39 }
  0xfd   :  { %481 = vst [vmem:[%s946_s5] sm:$0xff] %v465_v62  ;;  %489 = vst [vmem:[%s946_s5 + $0x40] sm:$0xff] %v473_v63  ;;  %v466_v6 = vadd.f32 %v564_v45, %v308_v0  ;;  %v474_v7 = vadd.f32 %v580_v47, %v324_v1  ;;  %v236_v8 = vpop.f32.mrb[4].mxu0  ;;  %v276_v10 = vpop.f32.mrb[4].mxu1  ;;  %v572_v63 = vunpack.c.h.bf16 %v634_v38  ;;  %v588_v1 = vunpack.c.h.bf16 %v638_v39 }
  0xfe   :  { %v596_v12 = vpack.c.bf16 %v370_v4, %v369_v2  ;;  %v616_v13 = vpack.c.bf16 %v378_v5, %v377_v3  ;;  %v237_v14 = vadd.f32 %v236_v8, %v810_v30  ;;  %v277_v15 = vadd.f32 %v276_v10, %v810_v30  ;;  %v238_v16 = vpop.f32.mrb[5].mxu0  ;;  %v278_v17 = vpop.f32.mrb[5].mxu1 }
  0xff   :  { %482 = vst [vmem:[%s946_s5 + $0x8] sm:$0xff] %v466_v6  ;;  %490 = vst [vmem:[%s946_s5 + $0x48] sm:$0xff] %v474_v7  ;;  %v239_v18 = vadd.f32 %v238_v16, %v818_v33  ;;  %v279_v19 = vadd.f32 %v278_v17, %v818_v33  ;;  %v240_v20 = vpop.f32.mrb[6].mxu0  ;;  %v280_v22 = vpop.f32.mrb[6].mxu1 }
 0x100   :  { %597 = vst [vmem:[%s947_s4] sm:$0xff] %v596_v12   ;;  %643 = vst [vmem:[%s947_s4 + $0x20] sm:$0xff] %v616_v13   ;;  %v309_v24 = vmax.f32 %v237_v14, 0.0  ;;  %v325_v25 = vmax.f32 %v277_v15, 0.0  ;;  %v241_v26 = vadd.f32 %v240_v20, %v810_v30  ;;  %v281_v27 = vadd.f32 %v280_v22, %v810_v30  ;;  %v242_v28 = vpop.f32.mrb[7].mxu0  ;;  %v282_v29 = vpop.f32.mrb[7].mxu1  ;;  %v635_v14 = vld [vmem:[%s945_s1 + $0x18] sm:$0xff]  }
 0x101   :  { %v310_v31 = vmax.f32 %v239_v18, 0.0  ;;  %v326_v32 = vmax.f32 %v279_v19, 0.0  ;;  %v243_v34 = vadd.f32 %v242_v28, %v818_v33  ;;  %v283_v35 = vadd.f32 %v282_v29, %v818_v33  ;;  %v639_v15 = vld [vmem:[%s945_s1 + $0x38] sm:$0xff]  }
 0x102   :  { %v311_v36 = vmax.f32 %v241_v26, 0.0  ;;  %v327_v37 = vmax.f32 %v281_v27, 0.0  ;;  %v371_v44 = vadd.f32 %v567_v9, %v309_v24  ;;  %v379_v45 = vadd.f32 %v583_v11, %v325_v25 }
 0x103   :  { %v467_v40 = vadd.f32 %v567_v9, %v310_v31  ;;  %v475_v41 = vadd.f32 %v583_v11, %v326_v32  ;;  %v312_v42 = vmax.f32 %v243_v34, 0.0  ;;  %v328_v43 = vmax.f32 %v283_v35, 0.0 }
 0x104   :  { %v372_v46 = vadd.f32 %v568_v21, %v311_v36  ;;  %v380_v47 = vadd.f32 %v584_v23, %v327_v37  ;;  %v575_v27 = vunpack.c.l.bf16 %v635_v14  ;;  %v591_v29 = vunpack.c.l.bf16 %v639_v15 }
 0x105   :  { %483 = vst [vmem:[%s946_s5 + $0x10] sm:$0xff] %v467_v40  ;;  %491 = vst [vmem:[%s946_s5 + $0x50] sm:$0xff] %v475_v41  ;;  %v468_v48 = vadd.f32 %v568_v21, %v312_v42  ;;  %v476_v49 = vadd.f32 %v584_v23, %v328_v43  ;;  %v246_v50 = vpop.f32.mrb[8].mxu0  ;;  %v286_v52 = vpop.f32.mrb[8].mxu1  ;;  %v576_v41 = vunpack.c.h.bf16 %v635_v14  ;;  %v592_v43 = vunpack.c.h.bf16 %v639_v15 }
 0x106   :  { %v601_v54 = vpack.c.bf16 %v372_v46, %v371_v44  ;;  %v621_v55 = vpack.c.bf16 %v380_v47, %v379_v45  ;;  %v247_v56 = vadd.f32 %v246_v50, %v810_v30  ;;  %v287_v57 = vadd.f32 %v286_v52, %v810_v30  ;;  %v248_v58 = vpop.f32.mrb[9].mxu0  ;;  %v288_v59 = vpop.f32.mrb[9].mxu1 }
 0x107   :  { %484 = vst [vmem:[%s946_s5 + $0x18] sm:$0xff] %v468_v48  ;;  %492 = vst [vmem:[%s946_s5 + $0x58] sm:$0xff] %v476_v49  ;;  %v249_v60 = vadd.f32 %v248_v58, %v818_v33  ;;  %v289_v61 = vadd.f32 %v288_v59, %v818_v33  ;;  %v250_v62 = vpop.f32.mrb[10].mxu0  ;;  %v290_v0 = vpop.f32.mrb[10].mxu1 }
 0x108   :  { %640 = vst [vmem:[%s947_s4 + $0x8] sm:$0xff] %v601_v54   ;;  %644 = vst [vmem:[%s947_s4 + $0x28] sm:$0xff] %v621_v55   ;;  %v313_v2 = vmax.f32 %v247_v56, 0.0  ;;  %v329_v3 = vmax.f32 %v287_v57, 0.0  ;;  %v251_v4 = vadd.f32 %v250_v62, %v810_v30  ;;  %v291_v5 = vadd.f32 %v290_v0, %v810_v30  ;;  %v252_v6 = vpop.f32.mrb[11].mxu0  ;;  %v292_v7 = vpop.f32.mrb[11].mxu1 }
 0x109   :  { %v314_v8 = vmax.f32 %v249_v60, 0.0  ;;  %v330_v9 = vmax.f32 %v289_v61, 0.0  ;;  %v253_v10 = vadd.f32 %v252_v6, %v818_v33  ;;  %v293_v11 = vadd.f32 %v292_v7, %v818_v33 }
 0x10a   :  { %v315_v12 = vmax.f32 %v251_v4, 0.0  ;;  %v331_v13 = vmax.f32 %v291_v5, 0.0  ;;  %v373_v20 = vadd.f32 %v571_v51, %v313_v2  ;;  %v381_v21 = vadd.f32 %v587_v53, %v329_v3 }
 0x10b   :  { %v469_v16 = vadd.f32 %v571_v51, %v314_v8  ;;  %v477_v17 = vadd.f32 %v587_v53, %v330_v9  ;;  %v316_v18 = vmax.f32 %v253_v10, 0.0  ;;  %v332_v19 = vmax.f32 %v293_v11, 0.0 }
 0x10c   :  { %v374_v22 = vadd.f32 %v572_v63, %v315_v12  ;;  %v382_v23 = vadd.f32 %v588_v1, %v331_v13 }
 0x10d   :  { %485 = vst [vmem:[%s946_s5 + $0x20] sm:$0xff] %v469_v16  ;;  %493 = vst [vmem:[%s946_s5 + $0x60] sm:$0xff] %v477_v17  ;;  %v470_v24 = vadd.f32 %v572_v63, %v316_v18  ;;  %v478_v25 = vadd.f32 %v588_v1, %v332_v19  ;;  %v256_v26 = vpop.f32.mrb[12].mxu0  ;;  %v296_v28 = vpop.f32.mrb[12].mxu1 }
 0x10e   :  { %v606_v31 = vpack.c.bf16 %v374_v22, %v373_v20  ;;  %v626_v32 = vpack.c.bf16 %v382_v23, %v381_v21  ;;  %v257_v34 = vadd.f32 %v256_v26, %v810_v30  ;;  %v297_v35 = vadd.f32 %v296_v28, %v810_v30  ;;  %v258_v36 = vpop.f32.mrb[13].mxu0  ;;  %v298_v37 = vpop.f32.mrb[13].mxu1 }
 0x10f   :  { %486 = vst [vmem:[%s946_s5 + $0x28] sm:$0xff] %v470_v24  ;;  %494 = vst [vmem:[%s946_s5 + $0x68] sm:$0xff] %v478_v25  ;;  %v259_v38 = vadd.f32 %v258_v36, %v818_v33  ;;  %v299_v39 = vadd.f32 %v298_v37, %v818_v33  ;;  %v260_v40 = vpop.f32.mrb[14].mxu0  ;;  %v300_v42 = vpop.f32.mrb[14].mxu1 }
 0x110   :  { %641 = vst [vmem:[%s947_s4 + $0x10] sm:$0xff] %v606_v31   ;;  %645 = vst [vmem:[%s947_s4 + $0x30] sm:$0xff] %v626_v32   ;;  %v317_v44 = vmax.f32 %v257_v34, 0.0  ;;  %v333_v45 = vmax.f32 %v297_v35, 0.0  ;;  %v261_v46 = vadd.f32 %v260_v40, %v810_v30  ;;  %v301_v47 = vadd.f32 %v300_v42, %v810_v30  ;;  %v262_v48 = vpop.f32.mrb[15].mxu0  ;;  %v302_v49 = vpop.f32.mrb[15].mxu1 }
 0x111   :  { %v318_v50 = vmax.f32 %v259_v38, 0.0  ;;  %v334_v51 = vmax.f32 %v299_v39, 0.0  ;;  %v263_v52 = vadd.f32 %v262_v48, %v818_v33  ;;  %v303_v53 = vadd.f32 %v302_v49, %v818_v33 }
 0x112   :  { %v319_v54 = vmax.f32 %v261_v46, 0.0  ;;  %v335_v55 = vmax.f32 %v301_v47, 0.0  ;;  %v375_v60 = vadd.f32 %v575_v27, %v317_v44  ;;  %v383_v61 = vadd.f32 %v591_v29, %v333_v45 }
 0x113   :  { %v471_v56 = vadd.f32 %v575_v27, %v318_v50  ;;  %v479_v57 = vadd.f32 %v591_v29, %v334_v51  ;;  %v320_v58 = vmax.f32 %v263_v52, 0.0  ;;  %v336_v59 = vmax.f32 %v303_v53, 0.0 }
 0x114   :  { %v376_v62 = vadd.f32 %v576_v41, %v319_v54  ;;  %v384_v63 = vadd.f32 %v592_v43, %v335_v55 }
 0x115   :  { %487 = vst [vmem:[%s946_s5 + $0x30] sm:$0xff] %v471_v56  ;;  %495 = vst [vmem:[%s946_s5 + $0x70] sm:$0xff] %v479_v57  ;;  %v472_v30 = vadd.f32 %v576_v41, %v320_v58  ;;  %v480_v33 = vadd.f32 %v592_v43, %v336_v59 }
 0x116   :  { %v611_v0 = vpack.c.bf16 %v376_v62, %v375_v60  ;;  %v631_v1 = vpack.c.bf16 %v384_v63, %v383_v61 }
 0x117   :  { %488 = vst [vmem:[%s946_s5 + $0x38] sm:$0xff] %v472_v30  ;;  %496 = vst [vmem:[%s946_s5 + $0x78] sm:$0xff] %v480_v33 }
 0x118   :  { %642 = vst [vmem:[%s947_s4 + $0x18] sm:$0xff] %v611_v0   ;;  %646 = vst [vmem:[%s947_s4 + $0x38] sm:$0xff] %v631_v1  }

// kernel: gcn_bayes_forward.30
= control target key start
LH: loop header
LB: loop body
LE: loop exit
PB: predicated region body
PF: predicated region fallthrough
CT: control target
= control target key end

     0   :  { %s583_s1 = inlined_call_operand.vmem [shape: bf16[128,128], index: 1, kind: input, shape index: {}]   ;;  %s584_s0 = inlined_call_operand.vmem [shape: bf16[128,128], index: 0, kind: input, shape index: {}]   ;;  %s585_s2 = inlined_call_operand.vmem [shape: bf16[128,128], index: 2, kind: output, shape index: {}]  }
   0x1   :  { %v480_v0 = vld [vmem:[%s583_s1] sm:$0xff]   ;;  %v481_v1 = vld [vmem:[%s583_s1 + $0x8] sm:$0xff]   ;;  %v482_v2 = vld [vmem:[%s583_s1 + $0x10] sm:$0xff]  }
   0x2   :  { %432 = vmatprep.subr.bf16.mxu0 %v480_v0  ;;  %464 = vmatprep.subr.bf16.mxu1 %v480_v0  ;;  %v483_v3 = vld [vmem:[%s583_s1 + $0x18] sm:$0xff]   ;;  %v488_v4 = vld [vmem:[%s584_s0] sm:$0xff]   ;;  %v485_v7 = vld [vmem:[%s583_s1 + $0x28] sm:$0xff]  }
   0x3   :  { %433 = vmatpush3.bf16.msra.mxu0 %v480_v0  ;;  %472 = vmatpush3.bf16.msra.mxu1 %v480_v0  ;;  %v489_v5 = vld [vmem:[%s584_s0 + $0x20] sm:$0xff]   ;;  %v486_v8 = vld [vmem:[%s583_s1 + $0x30] sm:$0xff]   ;;  %v487_v9 = vld [vmem:[%s583_s1 + $0x38] sm:$0xff]  }
   0x4   :  { %434 = vmatprep.subr.bf16.mxu0 %v481_v1  ;;  %465 = vmatprep.subr.bf16.mxu1 %v481_v1  ;;  %v484_v6 = vld [vmem:[%s583_s1 + $0x20] sm:$0xff]   ;;  %v490_v10 = vld [vmem:[%s584_s0 + $0x8] sm:$0xff]   ;;  %v492_v12 = vld [vmem:[%s584_s0 + $0x10] sm:$0xff]  }
   0x5   :  { %448 = vmatprep.mubr.bf16.mxu0 %v488_v4  ;;  %456 = vmatprep.mubr.bf16.mxu1 %v489_v5  ;;  %v491_v11 = vld [vmem:[%s584_s0 + $0x28] sm:$0xff]   ;;  %v493_v13 = vld [vmem:[%s584_s0 + $0x30] sm:$0xff]   ;;  %v494_v14 = vld [vmem:[%s584_s0 + $0x18] sm:$0xff]  }
   0x6   :  { %v495_v15 = vld [vmem:[%s584_s0 + $0x38] sm:$0xff]  }
   0x7   :  { %435 = vmatpush3.bf16.msra.mxu0 %v481_v1  ;;  %473 = vmatpush3.bf16.msra.mxu1 %v481_v1 }
   0x8   :  { %436 = vmatprep.subr.bf16.mxu0 %v482_v2  ;;  %466 = vmatprep.subr.bf16.mxu1 %v482_v2 }
   0xb   :  { %437 = vmatpush3.bf16.msra.mxu0 %v482_v2  ;;  %474 = vmatpush3.bf16.msra.mxu1 %v482_v2 }
   0xc   :  { %438 = vmatprep.subr.bf16.mxu0 %v483_v3  ;;  %467 = vmatprep.subr.bf16.mxu1 %v483_v3 }
   0xf   :  { %439 = vmatpush3.bf16.msra.mxu0 %v483_v3  ;;  %475 = vmatpush3.bf16.msra.mxu1 %v483_v3 }
  0x10   :  { %440 = vmatprep.subr.bf16.mxu0 %v484_v6  ;;  %468 = vmatprep.subr.bf16.mxu1 %v484_v6 }
  0x13   :  { %441 = vmatpush3.bf16.msra.mxu0 %v484_v6  ;;  %476 = vmatpush3.bf16.msra.mxu1 %v484_v6 }
  0x14   :  { %442 = vmatprep.subr.bf16.mxu0 %v485_v7  ;;  %469 = vmatprep.subr.bf16.mxu1 %v485_v7 }
  0x17   :  { %443 = vmatpush3.bf16.msra.mxu0 %v485_v7  ;;  %477 = vmatpush3.bf16.msra.mxu1 %v485_v7 }
  0x18   :  { %444 = vmatprep.subr.bf16.mxu0 %v486_v8  ;;  %470 = vmatprep.subr.bf16.mxu1 %v486_v8 }
  0x1b   :  { %445 = vmatpush3.bf16.msra.mxu0 %v486_v8  ;;  %478 = vmatpush3.bf16.msra.mxu1 %v486_v8 }
  0x1c   :  { %446 = vmatprep.subr.bf16.mxu0 %v487_v9  ;;  %471 = vmatprep.subr.bf16.mxu1 %v487_v9 }
  0x1f   :  { %447 = vmatpush3.bf16.msra.mxu0 %v487_v9  ;;  %479 = vmatpush3.bf16.msra.mxu1 %v487_v9 }
  0x22   :  { %449 = vmatmul.mubr.bf16.vlgmr.msra.gmra.mrb[0].mxu0 %v490_v10  ;;  %457 = vmatmul.mubr.bf16.vlgmr.msra.gmra.mrb[0].mxu1 %v491_v11 }
  0x23   :  { %452 = vmatprep.mubr.bf16.mxu0 %v492_v12  ;;  %460 = vmatprep.mubr.bf16.mxu1 %v493_v13 }
  0x2a   :  { %453 = vmatmul.mubr.bf16.gmra.mrb[4].mxu0 %v494_v14  ;;  %461 = vmatmul.mubr.bf16.gmra.mrb[4].mxu1 %v495_v15 }
  0xf5   :  { %v450_v16 = vpop.f32.mrb[0].mxu0  ;;  %v458_v17 = vpop.f32.mrb[0].mxu1 }
  0xf6   :  { %v174_v18 = vpop.f32.mrb[1].mxu0  ;;  %v206_v19 = vpop.f32.mrb[1].mxu1 }
  0xf7   :  { %v451_v20 = vpop.f32.mrb[2].mxu0  ;;  %v459_v21 = vpop.f32.mrb[2].mxu1 }
  0xf8   :  { %v377_v22 = vpack.c.bf16 %v451_v20, %v450_v16  ;;  %v397_v23 = vpack.c.bf16 %v459_v21, %v458_v17  ;;  %v177_v24 = vpop.f32.mrb[3].mxu0  ;;  %v209_v25 = vpop.f32.mrb[3].mxu1 }
  0xf9   :  { %v372_v26 = vpack.c.bf16 %v177_v24, %v174_v18  ;;  %v392_v27 = vpack.c.bf16 %v209_v25, %v206_v19 }
  0xfa   :  { %409 = vst [vmem:[%s585_s2 + $0x8] sm:$0xff] %v377_v22   ;;  %413 = vst [vmem:[%s585_s2 + $0x28] sm:$0xff] %v397_v23  }
  0xfb   :  { %373 = vst [vmem:[%s585_s2] sm:$0xff] %v372_v26   ;;  %412 = vst [vmem:[%s585_s2 + $0x20] sm:$0xff] %v392_v27  }
  0xfd   :  { %v454_v28 = vpop.f32.mrb[4].mxu0  ;;  %v462_v29 = vpop.f32.mrb[4].mxu1 }
  0xfe   :  { %v190_v30 = vpop.f32.mrb[5].mxu0  ;;  %v222_v31 = vpop.f32.mrb[5].mxu1 }
  0xff   :  { %v455_v32 = vpop.f32.mrb[6].mxu0  ;;  %v463_v33 = vpop.f32.mrb[6].mxu1 }
 0x100   :  { %v387_v34 = vpack.c.bf16 %v455_v32, %v454_v28  ;;  %v407_v35 = vpack.c.bf16 %v463_v33, %v462_v29  ;;  %v193_v36 = vpop.f32.mrb[7].mxu0  ;;  %v225_v37 = vpop.f32.mrb[7].mxu1 }
 0x101   :  { %v382_v38 = vpack.c.bf16 %v193_v36, %v190_v30  ;;  %v402_v39 = vpack.c.bf16 %v225_v37, %v222_v31 }
 0x102   :  { %411 = vst [vmem:[%s585_s2 + $0x18] sm:$0xff] %v387_v34   ;;  %415 = vst [vmem:[%s585_s2 + $0x38] sm:$0xff] %v407_v35  }
 0x103   :  { %410 = vst [vmem:[%s585_s2 + $0x10] sm:$0xff] %v382_v38   ;;  %414 = vst [vmem:[%s585_s2 + $0x30] sm:$0xff] %v402_v39  }

// kernel: gcn_bayes_forward.37
= control target key start
LH: loop header
LB: loop body
LE: loop exit
PB: predicated region body
PF: predicated region fallthrough
CT: control target
= control target key end

     0   :  { %s493_s0 = inlined_call_operand.vmem [shape: f32[32,128], index: 0, kind: input, shape index: {}]   ;;  %s494_s1 = inlined_call_operand.vmem [shape: f32[32,128], index: 1, kind: input, shape index: {}]   ;;  %s495_s2 = inlined_call_operand.vmem [shape: f32[64,128], index: 2, kind: input, shape index: {}]   ;;  %s496_s3 = inlined_call_operand.vmem [shape: f32[64,128], index: 3, kind: input, shape index: {}]   ;;  %s497_s4 = inlined_call_operand.hbm [shape: f32[1,1], index: 4, kind: output, shape index: {}]  }
   0x1   :  { %v40_v0 = vld [vmem:[%s495_s2 + $0x10] sm:$0xff]  ;;  %v38_v2 = vld [vmem:[%s495_s2] sm:$0xff]  ;;  %v41_v5 = vld [vmem:[%s495_s2 + $0x18] sm:$0xff] }
   0x2   :  { %v48_v1 = vld [vmem:[%s496_s3 + $0x10] sm:$0xff]  ;;  %v46_v4 = vld [vmem:[%s496_s3] sm:$0xff]  ;;  %v49_v6 = vld [vmem:[%s496_s3 + $0x18] sm:$0xff] }
   0x3   :  { %v56_v3 = vmul.f32 %v48_v1, %v40_v0  ;;  %v54_v7 = vmul.f32 %v46_v4, %v38_v2  ;;  %v39_v8 = vld [vmem:[%s495_s2 + $0x8] sm:$0xff]  ;;  %v57_v10 = vmul.f32 %v49_v6, %v41_v5  ;;  %v42_v14 = vld [vmem:[%s495_s2 + $0x20] sm:$0xff] }
   0x4   :  { %v47_v9 = vld [vmem:[%s496_s3 + $0x8] sm:$0xff]  ;;  %v50_v15 = vld [vmem:[%s496_s3 + $0x20] sm:$0xff] }
   0x5   :  { %66 = vadd.xlane.f32.xlu1 %v56_v3  ;;  %62 = vadd.xlane.f32.xlu0 %v54_v7  ;;  %v55_v11 = vmul.f32 %v47_v9, %v39_v8  ;;  %v43_v12 = vld [vmem:[%s495_s2 + $0x28] sm:$0xff]  ;;  %v58_v17 = vmul.f32 %v50_v15, %v42_v14 }
   0x6   :  { %v51_v13 = vld [vmem:[%s496_s3 + $0x28] sm:$0xff] }
   0x7   :  { %v59_v16 = vmul.f32 %v51_v13, %v43_v12  ;;  %v19_v18 = vld [vmem:[%s493_s0 + $0x8] sm:$0xff] }
   0x8   :  { %v23_v19 = vld [vmem:[%s494_s1 + $0x8] sm:$0xff] }
   0x9   :  { %68 = vadd.xlane.f32.xlu1 %v57_v10  ;;  %64 = vadd.xlane.f32.xlu0 %v55_v11 }
   0xa   :  { %9 = vsyncpa [#allocation3], 0  ;;  %v18_v20 = vld [vmem:[%s493_s0] sm:$0xff]  ;;  %v27_v22 = vmul.f32 %v23_v19, %v19_v18  ;;  %v20_v24 = vld [vmem:[%s493_s0 + $0x10] sm:$0xff]  ;;  %vm206_vm0 = vcmask 7168   ;;  %vm254_vm1 = vcmask 0  }
   0xb   :  { %v22_v21 = vld [vmem:[%s494_s1] sm:$0xff]  ;;  %v24_v25 = vld [vmem:[%s494_s1 + $0x10] sm:$0xff]  ;;  %v21_v30 = vld [vmem:[%s493_s0 + $0x18] sm:$0xff] }
   0xc   :  { %v26_v23 = vmul.f32 %v22_v21, %v18_v20  ;;  %v44_v26 = vld [vmem:[%s495_s2 + $0x30] sm:$0xff]  ;;  %v28_v28 = vmul.f32 %v24_v25, %v20_v24  ;;  %v25_v31 = vld [vmem:[%s494_s1 + $0x18] sm:$0xff] }
   0xd   :  { %72 = vadd.xlane.f32.xlu1 %v59_v16  ;;  %70 = vadd.xlane.f32.xlu0 %v58_v17  ;;  %v52_v27 = vld [vmem:[%s496_s3 + $0x30] sm:$0xff]  ;;  %v45_v32 = vld [vmem:[%s495_s2 + $0x38] sm:$0xff]  ;;  %v29_v34 = vmul.f32 %v25_v31, %v21_v30  ;;  %s371_s2 = smov [#allocation2]  }
   0xe   :  { %v60_v29 = vmul.f32 %v52_v27, %v44_v26  ;;  %v53_v33 = vld [vmem:[%s496_s3 + $0x38] sm:$0xff]  ;;  %s262_s3 = sshll.u32 %s371_s2, 4  ;;  %s263_s3 = int_to_ptr.vmem [resolvable:$true] %s262_s3 }
   0xf   :  { %v61_v35 = vmul.f32 %v53_v33, %v45_v32  ;;  %s347_s11 = scalar_lea.vmem %s263_s3, 16  ;;  %s351_s12 = scalar_lea.vmem %s263_s3, 32 }
  0x10   :  { %p348_p0 = scmp.ne.s32.totalorder %s263_s3, %s347_s11  ;;  %p352_p1 = scmp.lt.s32.totalorder %s263_s3, %s263_s3 }
  0x11   :  { %32 = vadd.xlane.f32.xlu1 %v27_v22  ;;  %30 = vadd.xlane.f32.xlu0 %v26_v23  ;;  %p353_p2 = scmp.lt.s32.totalorder %s351_s12, %s347_s11 }
  0x13   :  { %p354_p3 = por %p353_p2, %p352_p1 }
  0x15   :  { %34 = vadd.xlane.f32.xlu1 %v28_v28  ;;  %74 = vadd.xlane.f32.xlu0 %v60_v29  ;;  %p355_p4 = pnand %p354_p3, %p348_p0 }
  0x19   :  { %36 = vadd.xlane.f32.xlu1 %v29_v34  ;;  %76 = vadd.xlane.f32.xlu0 %v61_v35 }
  0x92   :  { %v67_v36 = vpop.xlane.xlu1 %66  ;;  %v63_v38 = vpop.xlane.xlu0 %62 }
  0x93   :  { %v104_v37 = vsub.f32 0.0, %v67_v36  ;;  %v102_v39 = vsub.f32 0.0, %v63_v38 }
  0x95   :  { %v114_v40 = vmul.f32 1.442695, %v104_v37  ;;  %v110_v41 = vmul.f32 1.442695, %v102_v39 }
  0x96   :  { %v69_v42 = vpop.xlane.xlu1 %68  ;;  %v65_v44 = vpop.xlane.xlu0 %64 }
  0x97   :  { %275 = vpow2.f32 %v114_v40  ;;  %v105_v43 = vsub.f32 0.0, %v69_v42  ;;  %v103_v45 = vsub.f32 0.0, %v65_v44 }
  0x98   :  { %277 = vpow2.f32 %v110_v41 }
  0x99   :  { %v116_v46 = vmul.f32 1.442695, %v105_v43  ;;  %v112_v47 = vmul.f32 1.442695, %v103_v45 }
  0x9a   :  { %v73_v48 = vpop.xlane.xlu1 %72  ;;  %v71_v50 = vpop.xlane.xlu0 %70 }
  0x9b   :  { %279 = vpow2.f32 %v116_v46  ;;  %v107_v49 = vsub.f32 0.0, %v73_v48  ;;  %v106_v51 = vsub.f32 0.0, %v71_v50 }
  0x9c   :  { %281 = vpow2.f32 %v112_v47 }
  0x9d   :  { %v120_v52 = vmul.f32 1.442695, %v107_v49  ;;  %v118_v53 = vmul.f32 1.442695, %v106_v51 }
  0x9e   :  { %v33_v54 = vpop.xlane.xlu1 %32  ;;  %v31_v56 = vpop.xlane.xlu0 %30 }
  0x9f   :  { %283 = vpow2.f32 %v120_v52  ;;  %v79_v55 = vsub.f32 0.0, %v33_v54  ;;  %v78_v57 = vsub.f32 0.0, %v31_v56 }
  0xa0   :  { %285 = vpow2.f32 %v118_v53 }
  0xa1   :  { %v276_v58 = vpop.eup %275  ;;  %v84_v59 = vmul.f32 1.442695, %v79_v55  ;;  %v82_v62 = vmul.f32 1.442695, %v78_v57 }
  0xa2   :  { %v278_v60 = vpop.eup %277  ;;  %v128_v61 = vadd.f32 1.0, %v276_v58  ;;  %v35_v63 = vpop.xlane.xlu1 %34 }
  0xa3   :  { %v126_v0 = vadd.f32 1.0, %v278_v60  ;;  %287 = vpow2.f32 %v84_v59  ;;  %v80_v1 = vsub.f32 0.0, %v35_v63  ;;  %v75_v2 = vpop.xlane.xlu0 %74 }
  0xa4   :  { %289 = vrcp.f32 %v128_v61  ;;  %v108_v3 = vsub.f32 0.0, %v75_v2 }
  0xa5   :  { %v280_v4 = vpop.eup %279  ;;  %291 = vrcp.f32 %v126_v0  ;;  %v86_v5 = vmul.f32 1.442695, %v80_v1 }
  0xa6   :  { %v282_v6 = vpop.eup %281  ;;  %v129_v7 = vadd.f32 1.0, %v280_v4  ;;  %293 = vpow2.f32 %v82_v62  ;;  %v122_v8 = vmul.f32 1.442695, %v108_v3  ;;  %v37_v9 = vpop.xlane.xlu1 %36 }
  0xa7   :  { %v127_v10 = vadd.f32 1.0, %v282_v6  ;;  %295 = vpow2.f32 %v86_v5  ;;  %v81_v11 = vsub.f32 0.0, %v37_v9  ;;  %v77_v12 = vpop.xlane.xlu0 %76 }
  0xa8   :  { %297 = vrcp.f32 %v129_v7  ;;  %v109_v13 = vsub.f32 0.0, %v77_v12 }
  0xa9   :  { %v284_v14 = vpop.eup %283  ;;  %299 = vrcp.f32 %v127_v10  ;;  %v88_v15 = vmul.f32 1.442695, %v81_v11 }
  0xaa   :  { %v286_v16 = vpop.eup %285  ;;  %v131_v17 = vadd.f32 1.0, %v284_v14  ;;  %301 = vpow2.f32 %v122_v8  ;;  %v124_v18 = vmul.f32 1.442695, %v109_v13 }
  0xab   :  { %v130_v19 = vadd.f32 1.0, %v286_v16  ;;  %303 = vpow2.f32 %v88_v15 }
  0xac   :  { %305 = vrcp.f32 %v131_v17 }
  0xad   :  { %v288_v20 = vpop.eup %287  ;;  %307 = vrcp.f32 %v130_v19 }
  0xae   :  { %v290_v21 = vpop.eup %289  ;;  %v91_v22 = vadd.f32 1.0, %v288_v20  ;;  %309 = vpow2.f32 %v124_v18 }
  0xaf   :  { %v292_v23 = vpop.eup %291  ;;  %v168_v24 = vsub.f32 1.0, %v290_v21 }
  0xb0   :  { %v294_v25 = vpop.eup %293  ;;  %v166_v26 = vsub.f32 1.0, %v292_v23  ;;  %311 = vrcp.f32 %v91_v22 }
  0xb1   :  { %v296_v27 = vpop.eup %295  ;;  %v176_v28 = vadd.f32 1e-15, %v168_v24  ;;  %v90_v29 = vadd.f32 1.0, %v294_v25 }
  0xb2   :  { %v298_v30 = vpop.eup %297  ;;  %v174_v31 = vadd.f32 1e-15, %v166_v26  ;;  %v92_v32 = vadd.f32 1.0, %v296_v27 }
  0xb3   :  { %v300_v33 = vpop.eup %299  ;;  %313 = vlog2.f32 %v176_v28  ;;  %v169_v34 = vsub.f32 1.0, %v298_v30 }
  0xb4   :  { %v302_v35 = vpop.eup %301  ;;  %315 = vlog2.f32 %v174_v31  ;;  %v167_v36 = vsub.f32 1.0, %v300_v33 }
  0xb5   :  { %v304_v37 = vpop.eup %303  ;;  %317 = vrcp.f32 %v90_v29  ;;  %v132_v38 = vadd.f32 1.0, %v302_v35  ;;  %v177_v43 = vadd.f32 1e-15, %v169_v34 }
  0xb6   :  { %v306_v39 = vpop.eup %305  ;;  %v175_v40 = vadd.f32 1e-15, %v167_v36  ;;  %319 = vrcp.f32 %v92_v32  ;;  %v93_v41 = vadd.f32 1.0, %v304_v37 }
  0xb7   :  { %v308_v42 = vpop.eup %307  ;;  %v171_v46 = vsub.f32 1.0, %v306_v39 }
  0xb8   :  { %v310_v44 = vpop.eup %309  ;;  %321 = vlog2.f32 %v175_v40  ;;  %v170_v45 = vsub.f32 1.0, %v308_v42 }
  0xb9   :  { %323 = vrcp.f32 %v132_v38  ;;  %v133_v48 = vadd.f32 1.0, %v310_v44  ;;  %v179_v52 = vadd.f32 1e-15, %v171_v46 }
  0xba   :  { %v312_v47 = vpop.eup %311  ;;  %325 = vrcp.f32 %v93_v41  ;;  %v178_v49 = vadd.f32 1e-15, %v170_v45 }
  0xbb   :  { %327 = vlog2.f32 %v177_v43  ;;  %v151_v50 = vadd.f32 1e-15, %v312_v47 }
  0xbd   :  { %v314_v51 = vpop.eup %313  ;;  %329 = vlog2.f32 %v151_v50 }
  0xbe   :  { %v316_v53 = vpop.eup %315  ;;  %331 = vrcp.f32 %v133_v48  ;;  %v187_v61 = vmul.f32 0.6931472, %v314_v51 }
  0xbf   :  { %v318_v54 = vpop.eup %317  ;;  %333 = vlog2.f32 %v178_v49  ;;  %v183_v56 = vmul.f32 0.6931472, %v316_v53 }
  0xc0   :  { %v320_v55 = vpop.eup %319  ;;  %v150_v57 = vadd.f32 1e-15, %v318_v54  ;;  %335 = vlog2.f32 %v179_v52  ;;  %v200_v7 = vsub.f32 0.0, %v187_v61 }
  0xc1   :  { %v152_v58 = vadd.f32 1e-15, %v320_v55  ;;  %v198_v0 = vsub.f32 0.0, %v183_v56 }
  0xc2   :  { %v322_v59 = vpop.eup %321  ;;  %337 = vlog2.f32 %v150_v57  ;;  %v229_v22 = vsel %vm206_vm0, %v200_v7, 0.0 }
  0xc3   :  { %v324_v60 = vpop.eup %323  ;;  %v185_v62 = vmul.f32 0.6931472, %v322_v59  ;;  %339 = vlog2.f32 %v152_v58  ;;  %v226_v10 = vsel %vm206_vm0, %v198_v0, 0.0 }
  0xc4   :  { %v326_v63 = vpop.eup %325  ;;  %v172_v1 = vsub.f32 1.0, %v324_v60 }
  0xc5   :  { %v328_v2 = vpop.eup %327  ;;  %v199_v3 = vsub.f32 0.0, %v185_v62  ;;  %v153_v4 = vadd.f32 1e-15, %v326_v63 }
  0xc6   :  { %v180_v5 = vadd.f32 1e-15, %v172_v1  ;;  %v189_v11 = vmul.f32 0.6931472, %v328_v2 }
  0xc7   :  { %v330_v6 = vpop.eup %329  ;;  %v227_v8 = vsel %vm206_vm0, %v199_v3, 0.0  ;;  %341 = vlog2.f32 %v153_v4 }
  0xc8   :  { %v332_v9 = vpop.eup %331  ;;  %343 = vlog2.f32 %v180_v5  ;;  %v157_v12 = vmul.f32 0.6931472, %v330_v6  ;;  %v228_v15 = vadd.f32 %v227_v8, %v226_v10  ;;  %v201_v19 = vsub.f32 0.0, %v189_v11 }
  0xc9   :  { %v334_v13 = vpop.eup %333  ;;  %v173_v14 = vsub.f32 1.0, %v332_v9 }
  0xca   :  { %v336_v16 = vpop.eup %335  ;;  %v163_v20 = vsub.f32 0.0, %v157_v12  ;;  %v191_v21 = vmul.f32 0.6931472, %v334_v13  ;;  %v230_v25 = vadd.f32 %v229_v22, %v228_v15  ;;  %v231_v32 = vsel %vm206_vm0, %v201_v19, 0.0 }
  0xcb   :  { %v181_v17 = vadd.f32 1e-15, %v173_v14  ;;  %v193_v28 = vmul.f32 0.6931472, %v336_v16 }
  0xcc   :  { %v338_v18 = vpop.eup %337  ;;  %v208_v30 = vsel %vm206_vm0, %v163_v20, 0.0  ;;  %v202_v31 = vsub.f32 0.0, %v191_v21  ;;  %v232_v35 = vadd.f32 %v231_v32, %v230_v25 }
  0xcd   :  { %v340_v23 = vpop.eup %339  ;;  %v155_v24 = vmul.f32 0.6931472, %v338_v18  ;;  %345 = vlog2.f32 %v181_v17  ;;  %v203_v42 = vsub.f32 0.0, %v193_v28 }
  0xce   :  { %v159_v26 = vmul.f32 0.6931472, %v340_v23  ;;  %v233_v43 = vsel %vm206_vm0, %v202_v31, 0.0 }
  0xcf   :  { %v162_v27 = vsub.f32 0.0, %v155_v24  ;;  %v234_v46 = vadd.f32 %v233_v43, %v232_v35  ;;  %v235_v51 = vsel %vm206_vm0, %v203_v42, 0.0 }
  0xd0   :  { %v164_v29 = vsub.f32 0.0, %v159_v26 }
  0xd1   :  { %v342_v33 = vpop.eup %341  ;;  %v207_v34 = vsel %vm206_vm0, %v162_v27, 0.0  ;;  %v236_v53 = vadd.f32 %v235_v51, %v234_v46 }
  0xd2   :  { %v344_v36 = vpop.eup %343  ;;  %v161_v37 = vmul.f32 0.6931472, %v342_v33  ;;  %v210_v38 = vsel %vm206_vm0, %v164_v29, 0.0  ;;  %v209_v39 = vadd.f32 %v208_v30, %v207_v34 }
  0xd3   :  { %v195_v40 = vmul.f32 0.6931472, %v344_v36 }
  0xd4   :  { %v165_v41 = vsub.f32 0.0, %v161_v37  ;;  %v211_v44 = vadd.f32 %v210_v38, %v209_v39 }
  0xd5   :  { %v204_v45 = vsub.f32 0.0, %v195_v40 }
  0xd6   :  { %v212_v47 = vsel %vm206_vm0, %v165_v41, 0.0 }
  0xd7   :  { %v346_v48 = vpop.eup %345  ;;  %v213_v49 = vadd.f32 %v212_v47, %v211_v44  ;;  %v237_v52 = vsel %vm206_vm0, %v204_v45, 0.0 }
  0xd8   :  { %v197_v50 = vmul.f32 0.6931472, %v346_v48  ;;  %v238_v55 = vadd.f32 %v237_v52, %v236_v53 }
  0xd9   :  { %214 = vadd.xlane.f32.xlu0 %v213_v49 }
  0xda   :  { %v205_v54 = vsub.f32 0.0, %v197_v50 }
  0xdc   :  { %v239_v56 = vsel %vm206_vm0, %v205_v54, 0.0 }
  0xdd   :  { %v240_v57 = vadd.f32 %v239_v56, %v238_v55 }
  0xdf   :  { %241 = vadd.xlane.f32.xlu1 %v240_v57 }
 0x166   :  { %v215_v58 = vpop.xlane.xlu0 %214 }
 0x167   :  { %v216_v59 = vrot.slane %v215_v58, 4 }
 0x169   :  { %v217_v60 = vadd.f32 %v216_v59, %v215_v58 }
 0x16b   :  { %v218_v61 = vrot.slane %v217_v60, 2 }
 0x16c   :  { %v242_v62 = vpop.xlane.xlu1 %241 }
 0x16d   :  { %v243_v63 = vrot.slane %v242_v62, 4  ;;  %v219_v0 = vadd.f32 %v218_v61, %v217_v60 }
 0x16f   :  { %v244_v1 = vadd.f32 %v243_v63, %v242_v62  ;;  %v220_v2 = vrot.slane %v219_v0, 1 }
 0x171   :  { %v245_v3 = vrot.slane %v244_v1, 2  ;;  %v221_v4 = vadd.f32 %v220_v2, %v219_v0 }
 0x173   :  { %v246_v5 = vadd.f32 %v245_v3, %v244_v1  ;;  %270 = vpush %v221_v4 }
 0x175   :  { %v247_v6 = vrot.slane %v246_v5, 1 }
 0x177   :  { %v248_v7 = vadd.f32 %v247_v6, %v246_v5 }
 0x179   :  { %272 = vpush %v248_v7 }
 0x1a4   :  { %s271_s0 = spop %270 }
 0x1a5   :  { %v223_v8 = vstv %s271_s0 }
 0x1a6   :  { %v225_v10 = vmul.f32 0.03125, %v223_v8 }
 0x1aa   :  { %s273_s1 = spop %272 }
 0x1ab   :  { %v250_v9 = vstv %s273_s1 }
 0x1ac   :  { %v252_v11 = vmul.f32 0.015625, %v250_v9 }
 0x1ae   :  { %v253_v12 = vadd.f32 %v252_v11, %v225_v10 }
 0x1b0   :  { %255 = vst.msk [vmem:[#allocation2] sm:$0x1] %vm254_vm1, %v253_v12 }
 0x1b1   :  { %358 = shalt.err (!%p355_p4)
}
 0x1b2   :  { %s359_s15 = scalar_lea.hbm %s497_s4, 16 }
 0x1b3   :  { %p360_p5 = scmp.ne.s32.totalorder %s497_s4, %s359_s15  ;;  %p363_p6 = scmp.lt.u32.totalorder %s359_s15, %s497_s4 }
 0x1b5   :  { %p365_p7 = pnand %p363_p6, %p360_p5 }
 0x1b7   :  { %368 = shalt.err (!%p365_p7)
}
 0x1b8   :  { %265 = dma.vmem_to_hbm [thread:$0]  %s263_s3, 16, %s497_s4, [#allocation3]  }
 0x1b9   :  { %369 = dma.done.wait [#allocation3], 16  }
 0x1ba   :  { %370 = vsyncadd [#allocation3], 4294967280 }
 0x1bb   :  { %269 = vsyncpa [#allocation3], 1 }

// kernel: gcn_bayes_forward.39
= control target key start
LH: loop header
LB: loop body
LE: loop exit
PB: predicated region body
PF: predicated region fallthrough
CT: control target
= control target key end

     0   :  { %s586_s1 = inlined_call_operand.vmem [shape: bf16[128,128], index: 1, kind: input, shape index: {}]   ;;  %s587_s0 = inlined_call_operand.vmem [shape: bf16[128,128], index: 0, kind: input, shape index: {}]   ;;  %s588_s2 = inlined_call_operand.vmem [shape: f32[1,128], index: 2, kind: input, shape index: {}]   ;;  %s589_s3 = inlined_call_operand.vmem [shape: f32[128,128], index: 3, kind: output, shape index: {}]  }
   0x1   :  { %v451_v0 = vld [vmem:[%s586_s1] sm:$0xff]   ;;  %v452_v1 = vld [vmem:[%s586_s1 + $0x8] sm:$0xff]   ;;  %v453_v2 = vld [vmem:[%s586_s1 + $0x10] sm:$0xff]  }
   0x2   :  { %403 = vmatprep.subr.bf16.mxu0 %v451_v0  ;;  %435 = vmatprep.subr.bf16.mxu1 %v451_v0  ;;  %v454_v3 = vld [vmem:[%s586_s1 + $0x18] sm:$0xff]   ;;  %v459_v4 = vld [vmem:[%s587_s0] sm:$0xff]   ;;  %v456_v7 = vld [vmem:[%s586_s1 + $0x28] sm:$0xff]  }
   0x3   :  { %404 = vmatpush3.bf16.msra.mxu0 %v451_v0  ;;  %443 = vmatpush3.bf16.msra.mxu1 %v451_v0  ;;  %v460_v5 = vld [vmem:[%s587_s0 + $0x20] sm:$0xff]   ;;  %v457_v8 = vld [vmem:[%s586_s1 + $0x30] sm:$0xff]   ;;  %v458_v9 = vld [vmem:[%s586_s1 + $0x38] sm:$0xff]  }
   0x4   :  { %405 = vmatprep.subr.bf16.mxu0 %v452_v1  ;;  %436 = vmatprep.subr.bf16.mxu1 %v452_v1  ;;  %v455_v6 = vld [vmem:[%s586_s1 + $0x20] sm:$0xff]   ;;  %v461_v10 = vld [vmem:[%s587_s0 + $0x8] sm:$0xff]   ;;  %v463_v12 = vld [vmem:[%s587_s0 + $0x10] sm:$0xff]  }
   0x5   :  { %419 = vmatprep.mubr.bf16.mxu0 %v459_v4  ;;  %427 = vmatprep.mubr.bf16.mxu1 %v460_v5  ;;  %v462_v11 = vld [vmem:[%s587_s0 + $0x28] sm:$0xff]   ;;  %v464_v13 = vld [vmem:[%s587_s0 + $0x30] sm:$0xff]   ;;  %v465_v14 = vld [vmem:[%s587_s0 + $0x18] sm:$0xff]  }
   0x6   :  { %v466_v15 = vld [vmem:[%s587_s0 + $0x38] sm:$0xff]   ;;  %v386_v16 = vld [vmem:[%s588_s2] ss:$0 sm:$0xff] }
   0x7   :  { %406 = vmatpush3.bf16.msra.mxu0 %v452_v1  ;;  %444 = vmatpush3.bf16.msra.mxu1 %v452_v1 }
   0x8   :  { %407 = vmatprep.subr.bf16.mxu0 %v453_v2  ;;  %437 = vmatprep.subr.bf16.mxu1 %v453_v2 }
   0xb   :  { %408 = vmatpush3.bf16.msra.mxu0 %v453_v2  ;;  %445 = vmatpush3.bf16.msra.mxu1 %v453_v2 }
   0xc   :  { %409 = vmatprep.subr.bf16.mxu0 %v454_v3  ;;  %438 = vmatprep.subr.bf16.mxu1 %v454_v3 }
   0xf   :  { %410 = vmatpush3.bf16.msra.mxu0 %v454_v3  ;;  %446 = vmatpush3.bf16.msra.mxu1 %v454_v3 }
  0x10   :  { %411 = vmatprep.subr.bf16.mxu0 %v455_v6  ;;  %439 = vmatprep.subr.bf16.mxu1 %v455_v6 }
  0x13   :  { %412 = vmatpush3.bf16.msra.mxu0 %v455_v6  ;;  %447 = vmatpush3.bf16.msra.mxu1 %v455_v6 }
  0x14   :  { %413 = vmatprep.subr.bf16.mxu0 %v456_v7  ;;  %440 = vmatprep.subr.bf16.mxu1 %v456_v7 }
  0x17   :  { %414 = vmatpush3.bf16.msra.mxu0 %v456_v7  ;;  %448 = vmatpush3.bf16.msra.mxu1 %v456_v7 }
  0x18   :  { %415 = vmatprep.subr.bf16.mxu0 %v457_v8  ;;  %441 = vmatprep.subr.bf16.mxu1 %v457_v8 }
  0x1b   :  { %416 = vmatpush3.bf16.msra.mxu0 %v457_v8  ;;  %449 = vmatpush3.bf16.msra.mxu1 %v457_v8 }
  0x1c   :  { %417 = vmatprep.subr.bf16.mxu0 %v458_v9  ;;  %442 = vmatprep.subr.bf16.mxu1 %v458_v9 }
  0x1f   :  { %418 = vmatpush3.bf16.msra.mxu0 %v458_v9  ;;  %450 = vmatpush3.bf16.msra.mxu1 %v458_v9 }
  0x22   :  { %420 = vmatmul.mubr.bf16.vlgmr.msra.gmra.mrb[0].mxu0 %v461_v10  ;;  %428 = vmatmul.mubr.bf16.vlgmr.msra.gmra.mrb[0].mxu1 %v462_v11 }
  0x23   :  { %423 = vmatprep.mubr.bf16.mxu0 %v463_v12  ;;  %431 = vmatprep.mubr.bf16.mxu1 %v464_v13 }
  0x2a   :  { %424 = vmatmul.mubr.bf16.gmra.mrb[4].mxu0 %v465_v14  ;;  %432 = vmatmul.mubr.bf16.gmra.mrb[4].mxu1 %v466_v15 }
  0xf5   :  { %v421_v17 = vpop.f32.mrb[0].mxu0  ;;  %v429_v18 = vpop.f32.mrb[0].mxu1 }
  0xf6   :  { %v336_v19 = vadd.f32 %v421_v17, %v386_v16  ;;  %v344_v20 = vadd.f32 %v429_v18, %v386_v16  ;;  %v213_v21 = vpop.f32.mrb[1].mxu0  ;;  %v245_v22 = vpop.f32.mrb[1].mxu1 }
  0xf7   :  { %v334_v23 = vadd.f32 %v386_v16, %v213_v21  ;;  %v342_v24 = vadd.f32 %v386_v16, %v245_v22  ;;  %v422_v25 = vpop.f32.mrb[2].mxu0  ;;  %v430_v26 = vpop.f32.mrb[2].mxu1 }
  0xf8   :  { %352 = vst [vmem:[%s589_s3 + $0x10] sm:$0xff] %v336_v19  ;;  %360 = vst [vmem:[%s589_s3 + $0x50] sm:$0xff] %v344_v20  ;;  %v337_v27 = vadd.f32 %v422_v25, %v386_v16  ;;  %v345_v28 = vadd.f32 %v430_v26, %v386_v16  ;;  %v216_v29 = vpop.f32.mrb[3].mxu0  ;;  %v248_v30 = vpop.f32.mrb[3].mxu1 }
  0xf9   :  { %350 = vst [vmem:[%s589_s3] sm:$0xff] %v334_v23  ;;  %358 = vst [vmem:[%s589_s3 + $0x40] sm:$0xff] %v342_v24  ;;  %v335_v31 = vadd.f32 %v386_v16, %v216_v29  ;;  %v343_v32 = vadd.f32 %v386_v16, %v248_v30 }
  0xfa   :  { %353 = vst [vmem:[%s589_s3 + $0x18] sm:$0xff] %v337_v27  ;;  %361 = vst [vmem:[%s589_s3 + $0x58] sm:$0xff] %v345_v28 }
  0xfb   :  { %351 = vst [vmem:[%s589_s3 + $0x8] sm:$0xff] %v335_v31  ;;  %359 = vst [vmem:[%s589_s3 + $0x48] sm:$0xff] %v343_v32 }
  0xfd   :  { %v425_v33 = vpop.f32.mrb[4].mxu0  ;;  %v433_v34 = vpop.f32.mrb[4].mxu1 }
  0xfe   :  { %v340_v35 = vadd.f32 %v425_v33, %v386_v16  ;;  %v348_v36 = vadd.f32 %v433_v34, %v386_v16  ;;  %v229_v37 = vpop.f32.mrb[5].mxu0  ;;  %v261_v38 = vpop.f32.mrb[5].mxu1 }
  0xff   :  { %v338_v39 = vadd.f32 %v386_v16, %v229_v37  ;;  %v346_v40 = vadd.f32 %v386_v16, %v261_v38  ;;  %v426_v41 = vpop.f32.mrb[6].mxu0  ;;  %v434_v42 = vpop.f32.mrb[6].mxu1 }
 0x100   :  { %356 = vst [vmem:[%s589_s3 + $0x30] sm:$0xff] %v340_v35  ;;  %364 = vst [vmem:[%s589_s3 + $0x70] sm:$0xff] %v348_v36  ;;  %v341_v43 = vadd.f32 %v426_v41, %v386_v16  ;;  %v349_v44 = vadd.f32 %v434_v42, %v386_v16  ;;  %v232_v45 = vpop.f32.mrb[7].mxu0  ;;  %v264_v46 = vpop.f32.mrb[7].mxu1 }
 0x101   :  { %354 = vst [vmem:[%s589_s3 + $0x20] sm:$0xff] %v338_v39  ;;  %362 = vst [vmem:[%s589_s3 + $0x60] sm:$0xff] %v346_v40  ;;  %v339_v47 = vadd.f32 %v386_v16, %v232_v45  ;;  %v347_v48 = vadd.f32 %v386_v16, %v264_v46 }
 0x102   :  { %357 = vst [vmem:[%s589_s3 + $0x38] sm:$0xff] %v341_v43  ;;  %365 = vst [vmem:[%s589_s3 + $0x78] sm:$0xff] %v349_v44 }
 0x103   :  { %355 = vst [vmem:[%s589_s3 + $0x28] sm:$0xff] %v339_v47  ;;  %363 = vst [vmem:[%s589_s3 + $0x68] sm:$0xff] %v347_v48 }

</bundles_post_ra>
